<compile_context>
chip_gen: v6e
topology: v6e:2x2x1
jax: 0.10.0
libtpu: 0.0.40
codegen_flags: <defaults>
</compile_context>

<pallas_src>
import jax
import jax.numpy as jnp
from jax.experimental import pallas as pl
from jax.experimental.pallas import tpu as pltpu


# ----------------------------------------------------------------------------
# Kernel: whole DAE forward (6 matmuls + biases + activations) for one batch
# tile, entirely in VMEM.
# ----------------------------------------------------------------------------
def dae_kernel(x_ref,
               w1_ref, b1_ref, w2_ref, b2_ref, w3_ref, b3_ref,
               w4_ref, b4_ref, w5_ref, b5_ref, w6_ref, b6_ref,
               o_ref):
    # Weights arrive in the matmul dtype (bf16 by default); biases are f32.
    compute_dtype = w1_ref.dtype

    def lin(h, w_ref, b_ref):
        # bf16 x bf16 -> f32 accumulation on the MXU; bias add in f32 on VPU.
        acc = jnp.dot(h.astype(compute_dtype), w_ref[...],
                      preferred_element_type=jnp.float32)
        return acc + b_ref[...]

    h = x_ref[...].astype(jnp.float32)
    # encoder: 3 x (Linear -> ReLU)
    h = jnp.maximum(lin(h, w1_ref, b1_ref), 0.0)
    h = jnp.maximum(lin(h, w2_ref, b2_ref), 0.0)
    h = jnp.maximum(lin(h, w3_ref, b3_ref), 0.0)
    # decoder: 2 x (Linear -> ReLU), then Linear -> Tanh
    h = jnp.maximum(lin(h, w4_ref, b4_ref), 0.0)
    h = jnp.maximum(lin(h, w5_ref, b5_ref), 0.0)
    h = jnp.tanh(lin(h, w6_ref, b6_ref))

    o_ref[...] = h.astype(o_ref.dtype)


def _round_up(n, m):
    return ((n + m - 1) // m) * m


def dae_forward(x, params, *, tm=256, matmul_dtype=jnp.bfloat16,
                out_dtype=None):
    """DAE forward.

    x:      (B, D) float32.
    params: list of 6 (W_(in,out), b_(1,out)) float32 pairs.
    tm:     batch tile (sweepable; 128-512 are sensible; multiple of 8).
    """
    B, D = x.shape
    assert params[-1][0].shape[1] == D

    # Clamp the tile for tiny batches, keep it a multiple of 8 (sublane).
    tm = max(8, _round_up(min(tm, _round_up(B, 8)), 8))
    B_pad = _round_up(B, tm)
    if B_pad != B:
        x = jnp.pad(x, ((0, B_pad - B), (0, 0)))
    grid = (B_pad // tm,)   # many steps at realistic B -> both v7x TCs busy

    out_dtype = x.dtype if out_dtype is None else out_dtype

    # MXU operands in bf16 (halves weight DMA/VMEM); biases stay f32.
    flat_params = []
    for w, b in params:
        flat_params.append(w.astype(matmul_dtype))
        flat_params.append(b.astype(jnp.float32))

    def build(weight_pipeline_mode):
        # x is tiled over the batch; every weight/bias is one full-array block
        # reused at every grid step (constant index_map -> no re-DMA).
        in_specs = [pl.BlockSpec((tm, D), lambda i: (i, 0))]
        for p in flat_params:
            if weight_pipeline_mode is None:
                in_specs.append(pl.BlockSpec(p.shape, lambda i: (0, 0)))
            else:
                in_specs.append(
                    pl.BlockSpec(p.shape, lambda i: (0, 0),
                                 pipeline_mode=weight_pipeline_mode))
        return pl.pallas_call(
            dae_kernel,
            out_shape=jax.ShapeDtypeStruct((B_pad, D), out_dtype),
            grid_spec=pltpu.PrefetchScalarGridSpec(
                num_scalar_prefetch=0,
                grid=grid,
                in_specs=in_specs,
                out_specs=pl.BlockSpec((tm, D), lambda i: (i, 0)),
            ),
            compiler_params=pltpu.CompilerParams(
                dimension_semantics=("parallel",),
                vmem_limit_bytes=32 * 1024 * 1024,
            ),
        )

    try:
        # Grid-invariant weight/bias blocks don't need double buffering.
        out = build(pl.Buffered(1))(x, *flat_params)
    except Exception:
        # Fallback: default buffering; constant index_maps still avoid
        # per-step weight DMA traffic.
        out = build(None)(x, *flat_params)

    return out[:B]


# ----------------------------------------------------------------------------
# Deterministic parameter init (PyTorch-Linear-style uniform(-1/sqrt(in), .))
# ----------------------------------------------------------------------------
def init_params(key, dims):
    params = []
    for i in range(len(dims) - 1):
        key, kw, kb = jax.random.split(key, 3)
        fan_in, fan_out = dims[i], dims[i + 1]
        bound = 1.0 / (fan_in ** 0.5)
        w = jax.random.uniform(kw, (fan_in, fan_out), jnp.float32,
                               minval=-bound, maxval=bound)
        b = jax.random.uniform(kb, (1, fan_out), jnp.float32,
                               minval=-bound, maxval=bound)
        params.append((w, b))
    return params


def dae_reference(x, params):
    """Pure-JAX (f32) reference of the PyTorch forward."""
    h = x
    n = len(params)
    for i, (w, b) in enumerate(params):
        h = h @ w + b
        h = jnp.maximum(h, 0.0) if i < n - 1 else jnp.tanh(h)
    return h


if __name__ == "__main__":
    # Small shapes consistent with the module: c=4, img_size=8 -> D = 256.
    c, img_size, batch = 4, 8, 2
    D = c * img_size ** 2
    dims = [D, 512, 256, 128, 256, 512, D]

    key = jax.random.PRNGKey(0)
    key, kx = jax.random.split(key)
    x = jax.random.normal(kx, (batch, D), jnp.float32)
    params = init_params(key, dims)

    y = dae_forward(x, params)
    y = jax.block_until_ready(y)

    y_ref = dae_reference(x, params)
    assert y.shape == (batch, D), y.shape
    # bf16 MXU operands with f32 accumulation -> loosened tolerance vs f32 ref.
    max_err = float(jnp.max(jnp.abs(y - y_ref)))
    assert max_err < 5e-2, max_err

    print("KERNEL_OK")
</pallas_src>

<mosaic_0001>
module attributes {stable_mosaic.version = 11 : i64} {
  func.func @dae_kernel(%arg0: i32, %arg1: memref<8x256xf32, #tpu.memory_space<vmem>>, %arg2: memref<256x512xbf16, #tpu.memory_space<vmem>>, %arg3: memref<1x512xf32, #tpu.memory_space<vmem>>, %arg4: memref<512x256xbf16, #tpu.memory_space<vmem>>, %arg5: memref<1x256xf32, #tpu.memory_space<vmem>>, %arg6: memref<256x128xbf16, #tpu.memory_space<vmem>>, %arg7: memref<1x128xf32, #tpu.memory_space<vmem>>, %arg8: memref<128x256xbf16, #tpu.memory_space<vmem>>, %arg9: memref<1x256xf32, #tpu.memory_space<vmem>>, %arg10: memref<256x512xbf16, #tpu.memory_space<vmem>>, %arg11: memref<1x512xf32, #tpu.memory_space<vmem>>, %arg12: memref<512x256xbf16, #tpu.memory_space<vmem>>, %arg13: memref<1x256xf32, #tpu.memory_space<vmem>>, %arg14: memref<8x256xf32, #tpu.memory_space<vmem>>) attributes {dimension_semantics = [#tpu.dimension_semantics<parallel>], iteration_bounds = array<i64: 1>, scalar_prefetch = 0 : i64, scratch_operands = 0 : i64, tpu.core_type = #tpu.core_type<tc>, window_params = [{transform_indices = @transform_0, window_bounds = array<i64: 8, 256>}, {pipeline_mode = #tpu.pipeline_mode<synchronous>, transform_indices = @transform_1, window_bounds = array<i64: 256, 512>}, {pipeline_mode = #tpu.pipeline_mode<synchronous>, transform_indices = @transform_2, window_bounds = array<i64: 1, 512>}, {pipeline_mode = #tpu.pipeline_mode<synchronous>, transform_indices = @transform_3, window_bounds = array<i64: 512, 256>}, {pipeline_mode = #tpu.pipeline_mode<synchronous>, transform_indices = @transform_4, window_bounds = array<i64: 1, 256>}, {pipeline_mode = #tpu.pipeline_mode<synchronous>, transform_indices = @transform_5, window_bounds = array<i64: 256, 128>}, {pipeline_mode = #tpu.pipeline_mode<synchronous>, transform_indices = @transform_6, window_bounds = array<i64: 1, 128>}, {pipeline_mode = #tpu.pipeline_mode<synchronous>, transform_indices = @transform_7, window_bounds = array<i64: 128, 256>}, {pipeline_mode = #tpu.pipeline_mode<synchronous>, transform_indices = @transform_8, window_bounds = array<i64: 1, 256>}, {pipeline_mode = #tpu.pipeline_mode<synchronous>, transform_indices = @transform_9, window_bounds = array<i64: 256, 512>}, {pipeline_mode = #tpu.pipeline_mode<synchronous>, transform_indices = @transform_10, window_bounds = array<i64: 1, 512>}, {pipeline_mode = #tpu.pipeline_mode<synchronous>, transform_indices = @transform_11, window_bounds = array<i64: 512, 256>}, {pipeline_mode = #tpu.pipeline_mode<synchronous>, transform_indices = @transform_12, window_bounds = array<i64: 1, 256>}, {transform_indices = @transform_13, window_bounds = array<i64: 8, 256>}]} {
    %c0 = arith.constant 0 : index
    %c0_0 = arith.constant 0 : index
    %0 = vector.load %arg1[%c0, %c0_0] : memref<8x256xf32, #tpu.memory_space<vmem>>, vector<8x256xf32>
    %1 = arith.truncf %0 : vector<8x256xf32> to vector<8x256xbf16>
    %c0_1 = arith.constant 0 : index
    %c0_2 = arith.constant 0 : index
    %2 = vector.load %arg2[%c0_1, %c0_2] : memref<256x512xbf16, #tpu.memory_space<vmem>>, vector<256x512xbf16>
    %cst = arith.constant dense<0.000000e+00> : vector<8x512xf32>
    %3 = tpu.matmul %1, %2, %cst {dimension_numbers = #tpu.dot_dimension_numbers<[1], [0], [0], [1], [0, 0, 1, 1], [], []>} : vector<8x256xbf16>, vector<256x512xbf16>, vector<8x512xf32> -> vector<8x512xf32>
    %c0_3 = arith.constant 0 : index
    %c0_4 = arith.constant 0 : index
    %4 = vector.load %arg3[%c0_3, %c0_4] : memref<1x512xf32, #tpu.memory_space<vmem>>, vector<1x512xf32>
    %5 = vector.broadcast %4 : vector<1x512xf32> to vector<8x512xf32>
    %6 = arith.addf %3, %5 : vector<8x512xf32>
    %cst_5 = arith.constant 0.000000e+00 : f32
    %7 = vector.broadcast %cst_5 : f32 to vector<8x512xf32>
    %8 = arith.maximumf %6, %7 : vector<8x512xf32>
    %9 = arith.truncf %8 : vector<8x512xf32> to vector<8x512xbf16>
    %c0_6 = arith.constant 0 : index
    %c0_7 = arith.constant 0 : index
    %10 = vector.load %arg4[%c0_6, %c0_7] : memref<512x256xbf16, #tpu.memory_space<vmem>>, vector<512x256xbf16>
    %cst_8 = arith.constant dense<0.000000e+00> : vector<8x256xf32>
    %11 = tpu.matmul %9, %10, %cst_8 {dimension_numbers = #tpu.dot_dimension_numbers<[1], [0], [0], [1], [0, 0, 1, 1], [], []>} : vector<8x512xbf16>, vector<512x256xbf16>, vector<8x256xf32> -> vector<8x256xf32>
    %c0_9 = arith.constant 0 : index
    %c0_10 = arith.constant 0 : index
    %12 = vector.load %arg5[%c0_9, %c0_10] : memref<1x256xf32, #tpu.memory_space<vmem>>, vector<1x256xf32>
    %13 = vector.broadcast %12 : vector<1x256xf32> to vector<8x256xf32>
    %14 = arith.addf %11, %13 : vector<8x256xf32>
    %cst_11 = arith.constant 0.000000e+00 : f32
    %15 = vector.broadcast %cst_11 : f32 to vector<8x256xf32>
    %16 = arith.maximumf %14, %15 : vector<8x256xf32>
    %17 = arith.truncf %16 : vector<8x256xf32> to vector<8x256xbf16>
    %c0_12 = arith.constant 0 : index
    %c0_13 = arith.constant 0 : index
    %18 = vector.load %arg6[%c0_12, %c0_13] : memref<256x128xbf16, #tpu.memory_space<vmem>>, vector<256x128xbf16>
    %cst_14 = arith.constant dense<0.000000e+00> : vector<8x128xf32>
    %19 = tpu.matmul %17, %18, %cst_14 {dimension_numbers = #tpu.dot_dimension_numbers<[1], [0], [0], [1], [0, 0, 1, 1], [], []>} : vector<8x256xbf16>, vector<256x128xbf16>, vector<8x128xf32> -> vector<8x128xf32>
    %c0_15 = arith.constant 0 : index
    %c0_16 = arith.constant 0 : index
    %20 = vector.load %arg7[%c0_15, %c0_16] : memref<1x128xf32, #tpu.memory_space<vmem>>, vector<1x128xf32>
    %21 = vector.broadcast %20 : vector<1x128xf32> to vector<8x128xf32>
    %22 = arith.addf %19, %21 : vector<8x128xf32>
    %cst_17 = arith.constant 0.000000e+00 : f32
    %23 = vector.broadcast %cst_17 : f32 to vector<8x128xf32>
    %24 = arith.maximumf %22, %23 : vector<8x128xf32>
    %25 = arith.truncf %24 : vector<8x128xf32> to vector<8x128xbf16>
    %c0_18 = arith.constant 0 : index
    %c0_19 = arith.constant 0 : index
    %26 = vector.load %arg8[%c0_18, %c0_19] : memref<128x256xbf16, #tpu.memory_space<vmem>>, vector<128x256xbf16>
    %cst_20 = arith.constant dense<0.000000e+00> : vector<8x256xf32>
    %27 = tpu.matmul %25, %26, %cst_20 {dimension_numbers = #tpu.dot_dimension_numbers<[1], [0], [0], [1], [0, 0, 1, 1], [], []>} : vector<8x128xbf16>, vector<128x256xbf16>, vector<8x256xf32> -> vector<8x256xf32>
    %c0_21 = arith.constant 0 : index
    %c0_22 = arith.constant 0 : index
    %28 = vector.load %arg9[%c0_21, %c0_22] : memref<1x256xf32, #tpu.memory_space<vmem>>, vector<1x256xf32>
    %29 = vector.broadcast %28 : vector<1x256xf32> to vector<8x256xf32>
    %30 = arith.addf %27, %29 : vector<8x256xf32>
    %cst_23 = arith.constant 0.000000e+00 : f32
    %31 = vector.broadcast %cst_23 : f32 to vector<8x256xf32>
    %32 = arith.maximumf %30, %31 : vector<8x256xf32>
    %33 = arith.truncf %32 : vector<8x256xf32> to vector<8x256xbf16>
    %c0_24 = arith.constant 0 : index
    %c0_25 = arith.constant 0 : index
    %34 = vector.load %arg10[%c0_24, %c0_25] : memref<256x512xbf16, #tpu.memory_space<vmem>>, vector<256x512xbf16>
    %cst_26 = arith.constant dense<0.000000e+00> : vector<8x512xf32>
    %35 = tpu.matmul %33, %34, %cst_26 {dimension_numbers = #tpu.dot_dimension_numbers<[1], [0], [0], [1], [0, 0, 1, 1], [], []>} : vector<8x256xbf16>, vector<256x512xbf16>, vector<8x512xf32> -> vector<8x512xf32>
    %c0_27 = arith.constant 0 : index
    %c0_28 = arith.constant 0 : index
    %36 = vector.load %arg11[%c0_27, %c0_28] : memref<1x512xf32, #tpu.memory_space<vmem>>, vector<1x512xf32>
    %37 = vector.broadcast %36 : vector<1x512xf32> to vector<8x512xf32>
    %38 = arith.addf %35, %37 : vector<8x512xf32>
    %cst_29 = arith.constant 0.000000e+00 : f32
    %39 = vector.broadcast %cst_29 : f32 to vector<8x512xf32>
    %40 = arith.maximumf %38, %39 : vector<8x512xf32>
    %41 = arith.truncf %40 : vector<8x512xf32> to vector<8x512xbf16>
    %c0_30 = arith.constant 0 : index
    %c0_31 = arith.constant 0 : index
    %42 = vector.load %arg12[%c0_30, %c0_31] : memref<512x256xbf16, #tpu.memory_space<vmem>>, vector<512x256xbf16>
    %cst_32 = arith.constant dense<0.000000e+00> : vector<8x256xf32>
    %43 = tpu.matmul %41, %42, %cst_32 {dimension_numbers = #tpu.dot_dimension_numbers<[1], [0], [0], [1], [0, 0, 1, 1], [], []>} : vector<8x512xbf16>, vector<512x256xbf16>, vector<8x256xf32> -> vector<8x256xf32>
    %c0_33 = arith.constant 0 : index
    %c0_34 = arith.constant 0 : index
    %44 = vector.load %arg13[%c0_33, %c0_34] : memref<1x256xf32, #tpu.memory_space<vmem>>, vector<1x256xf32>
    %45 = vector.broadcast %44 : vector<1x256xf32> to vector<8x256xf32>
    %46 = arith.addf %43, %45 : vector<8x256xf32>
    %47 = math.tanh %46 : vector<8x256xf32>
    %c0_35 = arith.constant 0 : index
    %c0_36 = arith.constant 0 : index
    %48 = vector.load %arg14[%c0_35, %c0_36] : memref<8x256xf32, #tpu.memory_space<vmem>>, vector<8x256xf32>
    tpu.vector_store %arg14[%c0_35, %c0_36], %47 {strides = array<i32>} : memref<8x256xf32, #tpu.memory_space<vmem>>, vector<8x256xf32>,
    return
  }
  func.func @transform_0(%arg0: i32) -> (i32, i32) {
    %c0_i32 = arith.constant 0 : i32
    %c0_i32_0 = arith.constant 0 : i32
    return %arg0, %c0_i32 : i32, i32
  }
  func.func @transform_1(%arg0: i32) -> (i32, i32) {
    %c0_i32 = arith.constant 0 : i32
    %c0_i32_0 = arith.constant 0 : i32
    %c0_i32_1 = arith.constant 0 : i32
    return %c0_i32, %c0_i32_0 : i32, i32
  }
  func.func @transform_2(%arg0: i32) -> (i32, i32) {
    %c0_i32 = arith.constant 0 : i32
    %c0_i32_0 = arith.constant 0 : i32
    %c0_i32_1 = arith.constant 0 : i32
    return %c0_i32, %c0_i32_0 : i32, i32
  }
  func.func @transform_3(%arg0: i32) -> (i32, i32) {
    %c0_i32 = arith.constant 0 : i32
    %c0_i32_0 = arith.constant 0 : i32
    %c0_i32_1 = arith.constant 0 : i32
    return %c0_i32, %c0_i32_0 : i32, i32
  }
  func.func @transform_4(%arg0: i32) -> (i32, i32) {
    %c0_i32 = arith.constant 0 : i32
    %c0_i32_0 = arith.constant 0 : i32
    %c0_i32_1 = arith.constant 0 : i32
    return %c0_i32, %c0_i32_0 : i32, i32
  }
  func.func @transform_5(%arg0: i32) -> (i32, i32) {
    %c0_i32 = arith.constant 0 : i32
    %c0_i32_0 = arith.constant 0 : i32
    %c0_i32_1 = arith.constant 0 : i32
    return %c0_i32, %c0_i32_0 : i32, i32
  }
  func.func @transform_6(%arg0: i32) -> (i32, i32) {
    %c0_i32 = arith.constant 0 : i32
    %c0_i32_0 = arith.constant 0 : i32
    %c0_i32_1 = arith.constant 0 : i32
    return %c0_i32, %c0_i32_0 : i32, i32
  }
  func.func @transform_7(%arg0: i32) -> (i32, i32) {
    %c0_i32 = arith.constant 0 : i32
    %c0_i32_0 = arith.constant 0 : i32
    %c0_i32_1 = arith.constant 0 : i32
    return %c0_i32, %c0_i32_0 : i32, i32
  }
  func.func @transform_8(%arg0: i32) -> (i32, i32) {
    %c0_i32 = arith.constant 0 : i32
    %c0_i32_0 = arith.constant 0 : i32
    %c0_i32_1 = arith.constant 0 : i32
    return %c0_i32, %c0_i32_0 : i32, i32
  }
  func.func @transform_9(%arg0: i32) -> (i32, i32) {
    %c0_i32 = arith.constant 0 : i32
    %c0_i32_0 = arith.constant 0 : i32
    %c0_i32_1 = arith.constant 0 : i32
    return %c0_i32, %c0_i32_0 : i32, i32
  }
  func.func @transform_10(%arg0: i32) -> (i32, i32) {
    %c0_i32 = arith.constant 0 : i32
    %c0_i32_0 = arith.constant 0 : i32
    %c0_i32_1 = arith.constant 0 : i32
    return %c0_i32, %c0_i32_0 : i32, i32
  }
  func.func @transform_11(%arg0: i32) -> (i32, i32) {
    %c0_i32 = arith.constant 0 : i32
    %c0_i32_0 = arith.constant 0 : i32
    %c0_i32_1 = arith.constant 0 : i32
    return %c0_i32, %c0_i32_0 : i32, i32
  }
  func.func @transform_12(%arg0: i32) -> (i32, i32) {
    %c0_i32 = arith.constant 0 : i32
    %c0_i32_0 = arith.constant 0 : i32
    %c0_i32_1 = arith.constant 0 : i32
    return %c0_i32, %c0_i32_0 : i32, i32
  }
  func.func @transform_13(%arg0: i32) -> (i32, i32) {
    %c0_i32 = arith.constant 0 : i32
    %c0_i32_0 = arith.constant 0 : i32
    return %arg0, %c0_i32 : i32, i32
  }
}

module attributes {stable_mosaic.version = 11 : i64} {
  func.func @dae_kernel(%arg0: i32, %arg1: memref<8x256xf32, #tpu.memory_space<vmem>>, %arg2: memref<256x512xbf16, #tpu.memory_space<vmem>>, %arg3: memref<1x512xf32, #tpu.memory_space<vmem>>, %arg4: memref<512x256xbf16, #tpu.memory_space<vmem>>, %arg5: memref<1x256xf32, #tpu.memory_space<vmem>>, %arg6: memref<256x128xbf16, #tpu.memory_space<vmem>>, %arg7: memref<1x128xf32, #tpu.memory_space<vmem>>, %arg8: memref<128x256xbf16, #tpu.memory_space<vmem>>, %arg9: memref<1x256xf32, #tpu.memory_space<vmem>>, %arg10: memref<256x512xbf16, #tpu.memory_space<vmem>>, %arg11: memref<1x512xf32, #tpu.memory_space<vmem>>, %arg12: memref<512x256xbf16, #tpu.memory_space<vmem>>, %arg13: memref<1x256xf32, #tpu.memory_space<vmem>>, %arg14: memref<8x256xf32, #tpu.memory_space<vmem>>) attributes {dimension_semantics = [#tpu.dimension_semantics<parallel>], iteration_bounds = array<i64: 1>, scalar_prefetch = 0 : i64, scratch_operands = 0 : i64, tpu.core_type = #tpu.core_type<tc>, window_params = [{transform_indices = @transform_0, window_bounds = array<i64: 8, 256>}, {pipeline_mode = #tpu.pipeline_mode<synchronous>, transform_indices = @transform_1, window_bounds = array<i64: 256, 512>}, {pipeline_mode = #tpu.pipeline_mode<synchronous>, transform_indices = @transform_2, window_bounds = array<i64: 1, 512>}, {pipeline_mode = #tpu.pipeline_mode<synchronous>, transform_indices = @transform_3, window_bounds = array<i64: 512, 256>}, {pipeline_mode = #tpu.pipeline_mode<synchronous>, transform_indices = @transform_4, window_bounds = array<i64: 1, 256>}, {pipeline_mode = #tpu.pipeline_mode<synchronous>, transform_indices = @transform_5, window_bounds = array<i64: 256, 128>}, {pipeline_mode = #tpu.pipeline_mode<synchronous>, transform_indices = @transform_6, window_bounds = array<i64: 1, 128>}, {pipeline_mode = #tpu.pipeline_mode<synchronous>, transform_indices = @transform_7, window_bounds = array<i64: 128, 256>}, {pipeline_mode = #tpu.pipeline_mode<synchronous>, transform_indices = @transform_8, window_bounds = array<i64: 1, 256>}, {pipeline_mode = #tpu.pipeline_mode<synchronous>, transform_indices = @transform_9, window_bounds = array<i64: 256, 512>}, {pipeline_mode = #tpu.pipeline_mode<synchronous>, transform_indices = @transform_10, window_bounds = array<i64: 1, 512>}, {pipeline_mode = #tpu.pipeline_mode<synchronous>, transform_indices = @transform_11, window_bounds = array<i64: 512, 256>}, {pipeline_mode = #tpu.pipeline_mode<synchronous>, transform_indices = @transform_12, window_bounds = array<i64: 1, 256>}, {transform_indices = @transform_13, window_bounds = array<i64: 8, 256>}]} {
    %c0 = arith.constant 0 : index
    %c0_0 = arith.constant 0 : index
    %0 = vector.load %arg1[%c0, %c0_0] : memref<8x256xf32, #tpu.memory_space<vmem>>, vector<8x256xf32>
    %1 = arith.truncf %0 : vector<8x256xf32> to vector<8x256xbf16>
    %c0_1 = arith.constant 0 : index
    %c0_2 = arith.constant 0 : index
    %2 = vector.load %arg2[%c0_1, %c0_2] : memref<256x512xbf16, #tpu.memory_space<vmem>>, vector<256x512xbf16>
    %cst = arith.constant dense<0.000000e+00> : vector<8x512xf32>
    %3 = tpu.matmul %1, %2, %cst {dimension_numbers = #tpu.dot_dimension_numbers<[1], [0], [0], [1], [0, 0, 1, 1], [], []>} : vector<8x256xbf16>, vector<256x512xbf16>, vector<8x512xf32> -> vector<8x512xf32>
    %c0_3 = arith.constant 0 : index
    %c0_4 = arith.constant 0 : index
    %4 = vector.load %arg3[%c0_3, %c0_4] : memref<1x512xf32, #tpu.memory_space<vmem>>, vector<1x512xf32>
    %5 = vector.broadcast %4 : vector<1x512xf32> to vector<8x512xf32>
    %6 = arith.addf %3, %5 : vector<8x512xf32>
    %cst_5 = arith.constant 0.000000e+00 : f32
    %7 = vector.broadcast %cst_5 : f32 to vector<8x512xf32>
    %8 = arith.maximumf %6, %7 : vector<8x512xf32>
    %9 = arith.truncf %8 : vector<8x512xf32> to vector<8x512xbf16>
    %c0_6 = arith.constant 0 : index
    %c0_7 = arith.constant 0 : index
    %10 = vector.load %arg4[%c0_6, %c0_7] : memref<512x256xbf16, #tpu.memory_space<vmem>>, vector<512x256xbf16>
    %cst_8 = arith.constant dense<0.000000e+00> : vector<8x256xf32>
    %11 = tpu.matmul %9, %10, %cst_8 {dimension_numbers = #tpu.dot_dimension_numbers<[1], [0], [0], [1], [0, 0, 1, 1], [], []>} : vector<8x512xbf16>, vector<512x256xbf16>, vector<8x256xf32> -> vector<8x256xf32>
    %c0_9 = arith.constant 0 : index
    %c0_10 = arith.constant 0 : index
    %12 = vector.load %arg5[%c0_9, %c0_10] : memref<1x256xf32, #tpu.memory_space<vmem>>, vector<1x256xf32>
    %13 = vector.broadcast %12 : vector<1x256xf32> to vector<8x256xf32>
    %14 = arith.addf %11, %13 : vector<8x256xf32>
    %cst_11 = arith.constant 0.000000e+00 : f32
    %15 = vector.broadcast %cst_11 : f32 to vector<8x256xf32>
    %16 = arith.maximumf %14, %15 : vector<8x256xf32>
    %17 = arith.truncf %16 : vector<8x256xf32> to vector<8x256xbf16>
    %c0_12 = arith.constant 0 : index
    %c0_13 = arith.constant 0 : index
    %18 = vector.load %arg6[%c0_12, %c0_13] : memref<256x128xbf16, #tpu.memory_space<vmem>>, vector<256x128xbf16>
    %cst_14 = arith.constant dense<0.000000e+00> : vector<8x128xf32>
    %19 = tpu.matmul %17, %18, %cst_14 {dimension_numbers = #tpu.dot_dimension_numbers<[1], [0], [0], [1], [0, 0, 1, 1], [], []>} : vector<8x256xbf16>, vector<256x128xbf16>, vector<8x128xf32> -> vector<8x128xf32>
    %c0_15 = arith.constant 0 : index
    %c0_16 = arith.constant 0 : index
    %20 = vector.load %arg7[%c0_15, %c0_16] : memref<1x128xf32, #tpu.memory_space<vmem>>, vector<1x128xf32>
    %21 = vector.broadcast %20 : vector<1x128xf32> to vector<8x128xf32>
    %22 = arith.addf %19, %21 : vector<8x128xf32>
    %cst_17 = arith.constant 0.000000e+00 : f32
    %23 = vector.broadcast %cst_17 : f32 to vector<8x128xf32>
    %24 = arith.maximumf %22, %23 : vector<8x128xf32>
    %25 = arith.truncf %24 : vector<8x128xf32> to vector<8x128xbf16>
    %c0_18 = arith.constant 0 : index
    %c0_19 = arith.constant 0 : index
    %26 = vector.load %arg8[%c0_18, %c0_19] : memref<128x256xbf16, #tpu.memory_space<vmem>>, vector<128x256xbf16>
    %cst_20 = arith.constant dense<0.000000e+00> : vector<8x256xf32>
    %27 = tpu.matmul %25, %26, %cst_20 {dimension_numbers = #tpu.dot_dimension_numbers<[1], [0], [0], [1], [0, 0, 1, 1], [], []>} : vector<8x128xbf16>, vector<128x256xbf16>, vector<8x256xf32> -> vector<8x256xf32>
    %c0_21 = arith.constant 0 : index
    %c0_22 = arith.constant 0 : index
    %28 = vector.load %arg9[%c0_21, %c0_22] : memref<1x256xf32, #tpu.memory_space<vmem>>, vector<1x256xf32>
    %29 = vector.broadcast %28 : vector<1x256xf32> to vector<8x256xf32>
    %30 = arith.addf %27, %29 : vector<8x256xf32>
    %cst_23 = arith.constant 0.000000e+00 : f32
    %31 = vector.broadcast %cst_23 : f32 to vector<8x256xf32>
    %32 = arith.maximumf %30, %31 : vector<8x256xf32>
    %33 = arith.truncf %32 : vector<8x256xf32> to vector<8x256xbf16>
    %c0_24 = arith.constant 0 : index
    %c0_25 = arith.constant 0 : index
    %34 = vector.load %arg10[%c0_24, %c0_25] : memref<256x512xbf16, #tpu.memory_space<vmem>>, vector<256x512xbf16>
    %cst_26 = arith.constant dense<0.000000e+00> : vector<8x512xf32>
    %35 = tpu.matmul %33, %34, %cst_26 {dimension_numbers = #tpu.dot_dimension_numbers<[1], [0], [0], [1], [0, 0, 1, 1], [], []>} : vector<8x256xbf16>, vector<256x512xbf16>, vector<8x512xf32> -> vector<8x512xf32>
    %c0_27 = arith.constant 0 : index
    %c0_28 = arith.constant 0 : index
    %36 = vector.load %arg11[%c0_27, %c0_28] : memref<1x512xf32, #tpu.memory_space<vmem>>, vector<1x512xf32>
    %37 = vector.broadcast %36 : vector<1x512xf32> to vector<8x512xf32>
    %38 = arith.addf %35, %37 : vector<8x512xf32>
    %cst_29 = arith.constant 0.000000e+00 : f32
    %39 = vector.broadcast %cst_29 : f32 to vector<8x512xf32>
    %40 = arith.maximumf %38, %39 : vector<8x512xf32>
    %41 = arith.truncf %40 : vector<8x512xf32> to vector<8x512xbf16>
    %c0_30 = arith.constant 0 : index
    %c0_31 = arith.constant 0 : index
    %42 = vector.load %arg12[%c0_30, %c0_31] : memref<512x256xbf16, #tpu.memory_space<vmem>>, vector<512x256xbf16>
    %cst_32 = arith.constant dense<0.000000e+00> : vector<8x256xf32>
    %43 = tpu.matmul %41, %42, %cst_32 {dimension_numbers = #tpu.dot_dimension_numbers<[1], [0], [0], [1], [0, 0, 1, 1], [], []>} : vector<8x512xbf16>, vector<512x256xbf16>, vector<8x256xf32> -> vector<8x256xf32>
    %c0_33 = arith.constant 0 : index
    %c0_34 = arith.constant 0 : index
    %44 = vector.load %arg13[%c0_33, %c0_34] : memref<1x256xf32, #tpu.memory_space<vmem>>, vector<1x256xf32>
    %45 = vector.broadcast %44 : vector<1x256xf32> to vector<8x256xf32>
    %46 = arith.addf %43, %45 : vector<8x256xf32>
    %47 = math.tanh %46 : vector<8x256xf32>
    %c0_35 = arith.constant 0 : index
    %c0_36 = arith.constant 0 : index
    %48 = vector.load %arg14[%c0_35, %c0_36] : memref<8x256xf32, #tpu.memory_space<vmem>>, vector<8x256xf32>
    tpu.vector_store %arg14[%c0_35, %c0_36], %47 {strides = array<i32>} : memref<8x256xf32, #tpu.memory_space<vmem>>, vector<8x256xf32>,
    return
  }
  func.func @transform_0(%arg0: i32) -> (i32, i32) {
    %c0_i32 = arith.constant 0 : i32
    %c0_i32_0 = arith.constant 0 : i32
    return %arg0, %c0_i32 : i32, i32
  }
  func.func @transform_1(%arg0: i32) -> (i32, i32) {
    %c0_i32 = arith.constant 0 : i32
    %c0_i32_0 = arith.constant 0 : i32
    %c0_i32_1 = arith.constant 0 : i32
    return %c0_i32, %c0_i32_0 : i32, i32
  }
  func.func @transform_2(%arg0: i32) -> (i32, i32) {
    %c0_i32 = arith.constant 0 : i32
    %c0_i32_0 = arith.constant 0 : i32
    %c0_i32_1 = arith.constant 0 : i32
    return %c0_i32, %c0_i32_0 : i32, i32
  }
  func.func @transform_3(%arg0: i32) -> (i32, i32) {
    %c0_i32 = arith.constant 0 : i32
    %c0_i32_0 = arith.constant 0 : i32
    %c0_i32_1 = arith.constant 0 : i32
    return %c0_i32, %c0_i32_0 : i32, i32
  }
  func.func @transform_4(%arg0: i32) -> (i32, i32) {
    %c0_i32 = arith.constant 0 : i32
    %c0_i32_0 = arith.constant 0 : i32
    %c0_i32_1 = arith.constant 0 : i32
    return %c0_i32, %c0_i32_0 : i32, i32
  }
  func.func @transform_5(%arg0: i32) -> (i32, i32) {
    %c0_i32 = arith.constant 0 : i32
    %c0_i32_0 = arith.constant 0 : i32
    %c0_i32_1 = arith.constant 0 : i32
    return %c0_i32, %c0_i32_0 : i32, i32
  }
  func.func @transform_6(%arg0: i32) -> (i32, i32) {
    %c0_i32 = arith.constant 0 : i32
    %c0_i32_0 = arith.constant 0 : i32
    %c0_i32_1 = arith.constant 0 : i32
    return %c0_i32, %c0_i32_0 : i32, i32
  }
  func.func @transform_7(%arg0: i32) -> (i32, i32) {
    %c0_i32 = arith.constant 0 : i32
    %c0_i32_0 = arith.constant 0 : i32
    %c0_i32_1 = arith.constant 0 : i32
    return %c0_i32, %c0_i32_0 : i32, i32
  }
  func.func @transform_8(%arg0: i32) -> (i32, i32) {
    %c0_i32 = arith.constant 0 : i32
    %c0_i32_0 = arith.constant 0 : i32
    %c0_i32_1 = arith.constant 0 : i32
    return %c0_i32, %c0_i32_0 : i32, i32
  }
  func.func @transform_9(%arg0: i32) -> (i32, i32) {
    %c0_i32 = arith.constant 0 : i32
    %c0_i32_0 = arith.constant 0 : i32
    %c0_i32_1 = arith.constant 0 : i32
    return %c0_i32, %c0_i32_0 : i32, i32
  }
  func.func @transform_10(%arg0: i32) -> (i32, i32) {
    %c0_i32 = arith.constant 0 : i32
    %c0_i32_0 = arith.constant 0 : i32
    %c0_i32_1 = arith.constant 0 : i32
    return %c0_i32, %c0_i32_0 : i32, i32
  }
  func.func @transform_11(%arg0: i32) -> (i32, i32) {
    %c0_i32 = arith.constant 0 : i32
    %c0_i32_0 = arith.constant 0 : i32
    %c0_i32_1 = arith.constant 0 : i32
    return %c0_i32, %c0_i32_0 : i32, i32
  }
  func.func @transform_12(%arg0: i32) -> (i32, i32) {
    %c0_i32 = arith.constant 0 : i32
    %c0_i32_0 = arith.constant 0 : i32
    %c0_i32_1 = arith.constant 0 : i32
    return %c0_i32, %c0_i32_0 : i32, i32
  }
  func.func @transform_13(%arg0: i32) -> (i32, i32) {
    %c0_i32 = arith.constant 0 : i32
    %c0_i32_0 = arith.constant 0 : i32
    return %arg0, %c0_i32 : i32, i32
  }
}

</mosaic_0001>

<bundles_post_ra>
// kernel: tpu_custom_call.1
= control target key start
LH: loop header
LB: loop body
LE: loop exit
PB: predicated region body
PF: predicated region fallthrough
CT: control target
= control target key end

     0   :  { %18 = vsyncpa [#allocation3], 0  ;;  %s3611_s0 = inlined_call_operand.hbm [shape: f32[8,256], index: 0, kind: input, shape index: {}]   ;;  %s3612_s1 = inlined_call_operand.hbm [shape: bf16[256,512], index: 1, kind: input, shape index: {}]   ;;  %s3613_s2 = inlined_call_operand.hbm [shape: f32[1,512], index: 2, kind: input, shape index: {}]   ;;  %s3614_s3 = inlined_call_operand.hbm [shape: bf16[512,256], index: 3, kind: input, shape index: {}]   ;;  %s3615_s4 = inlined_call_operand.vmem [shape: f32[1,256], index: 4, kind: input, shape index: {}]   ;;  %s3616_s5 = inlined_call_operand.hbm [shape: bf16[256,128], index: 5, kind: input, shape index: {}]   ;;  %s3617_s6 = inlined_call_operand.hbm [shape: f32[1,128], index: 6, kind: input, shape index: {}]   ;;  %s3618_s7 = inlined_call_operand.hbm [shape: bf16[128,256], index: 7, kind: input, shape index: {}]   ;;  %s3619_s8 = inlined_call_operand.vmem [shape: f32[1,256], index: 8, kind: input, shape index: {}]   ;;  %s3620_s9 = inlined_call_operand.hbm [shape: bf16[256,512], index: 9, kind: input, shape index: {}]   ;;  %s3621_s10 = inlined_call_operand.vmem [shape: f32[1,512], index: 10, kind: input, shape index: {}]   ;;  %s3622_s11 = inlined_call_operand.hbm [shape: bf16[512,256], index: 11, kind: input, shape index: {}]   ;;  %s3623_s12 = inlined_call_operand.vmem [shape: f32[1,256], index: 12, kind: input, shape index: {}]   ;;  %s3624_s13 = inlined_call_operand.hbm [shape: f32[8,256], index: 13, kind: output, shape index: {}]  }
   0x1   :  { %19 = vsyncpa [#allocation6], 0 }
   0x2   :  { %20 = vsyncpa [#allocation9], 0 }
   0x3   :  { %21 = vsyncpa [#allocation12], 0 }
   0x4   :  { %22 = vsyncpa [#allocation15], 0 }
   0x5   :  { %23 = vsyncpa [#allocation4], 0  ;;  %s3439_s25 = smov [#allocation5]  }
   0x6   :  { %s39_s26 = sshll.u32 %s3439_s25, 4  ;;  %s40_s26 = int_to_ptr.vmem [resolvable:$true] %s39_s26 }
   0x7   :  { %s3235_s27 = scalar_lea.vmem %s40_s26, 8192  ;;  %p3240_p1 = scmp.lt.s32.totalorder %s40_s26, %s40_s26 }
   0x8   :  { %p3236_p0 = scmp.ne.s32.totalorder %s40_s26, %s3235_s27  ;;  %p3241_p2 = scmp.lt.s32.totalorder %s3235_s27, %s3235_s27 }
   0xa   :  { %p3242_p3 = por %p3241_p2, %p3240_p1 }
   0xc   :  { %p3243_p4 = pnand %p3242_p3, %p3236_p0 }
   0xe   :  { %3246 = shalt.err (!%p3243_p4)
}
   0xf   :  { %s3440_s28 = smov 256   ;;  %s3441_s29 = smov 16  }
  0x10   :  { %45 = dma.hbm_to_vmem [thread:$0]  %s3612_s1, 8192, %s40_s26, [#allocation6], %s3440_s28, %s3440_s28, %s3441_s29  }
  0x11   :  { %s3442_s15 = smov [#allocation8]  }
  0x12   :  { %s61_s16 = sshll.u32 %s3442_s15, 4  ;;  %s62_s16 = int_to_ptr.vmem [resolvable:$true] %s61_s16 }
  0x13   :  { %s3255_s17 = scalar_lea.vmem %s62_s16, 8192  ;;  %p3260_p6 = scmp.lt.s32.totalorder %s62_s16, %s62_s16 }
  0x14   :  { %p3256_p5 = scmp.ne.s32.totalorder %s62_s16, %s3255_s17  ;;  %p3261_p7 = scmp.lt.s32.totalorder %s3255_s17, %s3255_s17 }
  0x16   :  { %p3262_p8 = por %p3261_p7, %p3260_p6 }
  0x18   :  { %p3263_p9 = pnand %p3262_p8, %p3256_p5 }
  0x1a   :  { %3266 = shalt.err (!%p3263_p9)
}
  0x1b   :  { %s3443_s18 = smov 128   ;;  %s3444_s19 = smov 8  }
  0x1c   :  { %67 = dma.hbm_to_vmem [thread:$0]  %s3614_s3, 8192, %s62_s16, [#allocation9], %s3443_s18, %s3443_s18, %s3444_s19  }
  0x1d   :  { %s3445_s1 = smov [#allocation11]   ;;  %s3446_s23 = smov [#allocation14]  }
  0x1e   :  { %s88_s22 = sshll.u32 %s3445_s1, 4  ;;  %s111_s24 = sshll.u32 %s3446_s23, 4  ;;  %s89_s22 = int_to_ptr.vmem [resolvable:$true] %s88_s22  ;;  %s112_s24 = int_to_ptr.vmem [resolvable:$true] %s111_s24 }
  0x1f   :  { %s3275_s25 = scalar_lea.vmem %s89_s22, 16  ;;  %s3279_s26 = scalar_lea.vmem %s89_s22, 32 }
  0x20   :  { %p3276_p10 = scmp.ne.s32.totalorder %s89_s22, %s3275_s25  ;;  %p3280_p11 = scmp.lt.s32.totalorder %s89_s22, %s89_s22 }
  0x21   :  { %p3281_p12 = scmp.lt.s32.totalorder %s3279_s26, %s3275_s25 }
  0x23   :  { %p3282_p13 = por %p3281_p12, %p3280_p11 }
  0x25   :  { %p3283_p0 = pnand %p3282_p13, %p3276_p10 }
  0x27   :  { %3286 = shalt.err (!%p3283_p0)
}
  0x28   :  { %91 = dma.hbm_to_vmem [thread:$0]  %s3617_s6, 16, %s89_s22, [#allocation12]  }
  0x29   :  { %s3295_s14 = scalar_lea.vmem %s112_s24, 8192  ;;  %p3300_p2 = scmp.lt.s32.totalorder %s112_s24, %s112_s24 }
  0x2a   :  { %p3296_p1 = scmp.ne.s32.totalorder %s112_s24, %s3295_s14  ;;  %p3301_p3 = scmp.lt.s32.totalorder %s3295_s14, %s3295_s14 }
  0x2c   :  { %p3302_p4 = por %p3301_p3, %p3300_p2 }
  0x2e   :  { %p3303_p5 = pnand %p3302_p4, %p3296_p1 }
  0x30   :  { %3306 = shalt.err (!%p3303_p5)
}
  0x31   :  { %117 = dma.hbm_to_vmem [thread:$0]  %s3620_s9, 8192, %s112_s24, [#allocation15], %s3440_s28, %s3440_s28, %s3441_s29  }
  0x32   :  { %s3447_s16 = smov [#allocation2]   ;;  %s3448_s20 = smov [#allocation7]  }
  0x33   :  { %s30_s17 = sshll.u32 %s3447_s16, 4  ;;  %s52_s21 = sshll.u32 %s3448_s20, 4  ;;  %s31_s17 = int_to_ptr.vmem [resolvable:$true] %s30_s17  ;;  %s53_s21 = int_to_ptr.vmem [resolvable:$true] %s52_s21 }
  0x34   :  { %s3315_s6 = scalar_lea.vmem %s31_s17, 256  ;;  %p3320_p7 = scmp.lt.s32.totalorder %s31_s17, %s31_s17 }
  0x35   :  { %p3316_p6 = scmp.ne.s32.totalorder %s31_s17, %s3315_s6  ;;  %p3321_p8 = scmp.lt.s32.totalorder %s3315_s6, %s3315_s6 }
  0x37   :  { %p3322_p9 = por %p3321_p8, %p3320_p7 }
  0x39   :  { %p3323_p10 = pnand %p3322_p9, %p3316_p6 }
  0x3b   :  { %3326 = shalt.err (!%p3323_p10)
}
  0x3c   :  { %33 = dma.hbm_to_vmem [thread:$0]  %s3611_s0, 256, %s31_s17, [#allocation3]  }
  0x3d   :  { %s3335_s23 = scalar_lea.vmem %s53_s21, 64  ;;  %p3340_p12 = scmp.lt.s32.totalorder %s53_s21, %s53_s21 }
  0x3e   :  { %p3336_p11 = scmp.ne.s32.totalorder %s53_s21, %s3335_s23  ;;  %p3341_p13 = scmp.lt.s32.totalorder %s3335_s23, %s3335_s23 }
  0x40   :  { %p3342_p0 = por %p3341_p13, %p3340_p12 }
  0x42   :  { %p3343_p1 = pnand %p3342_p0, %p3336_p11 }
  0x44   :  { %3346 = shalt.err (!%p3343_p1)
}
  0x45   :  { %55 = dma.hbm_to_vmem [thread:$0]  %s3613_s2, 64, %s53_s21, [#allocation6]  }
  0x46   :  { %s3449_s29 = smov [#allocation10]  }
  0x47   :  { %s75_s24 = sshll.u32 %s3449_s29, 4  ;;  %s76_s24 = int_to_ptr.vmem [resolvable:$true] %s75_s24 }
  0x48   :  { %s3355_s25 = scalar_lea.vmem %s76_s24, 2048  ;;  %p3360_p3 = scmp.lt.s32.totalorder %s76_s24, %s76_s24 }
  0x49   :  { %p3356_p2 = scmp.ne.s32.totalorder %s76_s24, %s3355_s25  ;;  %p3361_p4 = scmp.lt.s32.totalorder %s3355_s25, %s3355_s25 }
  0x4b   :  { %p3362_p5 = por %p3361_p4, %p3360_p3 }
  0x4d   :  { %p3363_p6 = pnand %p3362_p5, %p3356_p2 }
  0x4f   :  { %3366 = shalt.err (!%p3363_p6)
}
  0x50   :  { %s3450_s0 = smov 64   ;;  %s3451_s26 = smov 4  }
  0x51   :  { %81 = dma.hbm_to_vmem [thread:$0]  %s3616_s5, 2048, %s76_s24, [#allocation9], %s3450_s0, %s3450_s0, %s3451_s26  }
  0x52   :  { %s3452_s14 = smov [#allocation13]   ;;  %s3453_s2 = smov [#allocation16]  }
  0x53   :  { %s97_s3 = sshll.u32 %s3452_s14, 4  ;;  %s125_s15 = sshll.u32 %s3453_s2, 4  ;;  %s98_s3 = int_to_ptr.vmem [resolvable:$true] %s97_s3  ;;  %s126_s15 = int_to_ptr.vmem [resolvable:$true] %s125_s15 }
  0x54   :  { %s3375_s16 = scalar_lea.vmem %s98_s3, 2048  ;;  %p3380_p8 = scmp.lt.s32.totalorder %s98_s3, %s98_s3 }
  0x55   :  { %p3376_p7 = scmp.ne.s32.totalorder %s98_s3, %s3375_s16  ;;  %p3381_p9 = scmp.lt.s32.totalorder %s3375_s16, %s3375_s16 }
  0x57   :  { %p3382_p10 = por %p3381_p9, %p3380_p8 }
  0x59   :  { %p3383_p11 = pnand %p3382_p10, %p3376_p7 }
  0x5b   :  { %3386 = shalt.err (!%p3383_p11)
}
  0x5c   :  { %103 = dma.hbm_to_vmem [thread:$0]  %s3618_s7, 2048, %s98_s3, [#allocation12], %s3443_s18, %s3443_s18, %s3444_s19  }
  0x5d   :  { %s3395_s5 = scalar_lea.vmem %s126_s15, 8192  ;;  %p3400_p13 = scmp.lt.s32.totalorder %s126_s15, %s126_s15 }
  0x5e   :  { %p3396_p12 = scmp.ne.s32.totalorder %s126_s15, %s3395_s5  ;;  %p3401_p0 = scmp.lt.s32.totalorder %s3395_s5, %s3395_s5 }
  0x60   :  { %p3402_p1 = por %p3401_p0, %p3400_p13 }
  0x62   :  { %p3403_p2 = pnand %p3402_p1, %p3396_p12 }
  0x64   :  { %3406 = shalt.err (!%p3403_p2)
}
  0x65   :  { %131 = dma.hbm_to_vmem [thread:$0]  %s3622_s11, 8192, %s126_s15, [#allocation15], %s3443_s18, %s3443_s18, %s3444_s19  }
  0x66   :  { %3427 = dma.done.wait [#allocation3], 256  }
  0x67   :  { %3428 = vsyncadd [#allocation3], 4294967040 }
  0x68   :  { %3429 = dma.done.wait [#allocation6], 8256  }
  0x69   :  { %3430 = vsyncadd [#allocation6], 4294959040 }
  0x6a   :  { %3431 = dma.done.wait [#allocation9], 10240  }
  0x6b   :  { %3432 = vsyncadd [#allocation9], 4294957056 }
  0x6c   :  { %3433 = dma.done.wait [#allocation12], 2064  }
  0x6d   :  { %3434 = vsyncadd [#allocation12], 4294965232 }
  0x6e   :  { %3435 = dma.done.wait [#allocation15], 16384  }
  0x6f   :  { %3436 = vsyncadd [#allocation15], 4294950912  ;;  %v2799_v0 = vld [vmem:[#allocation5 + $0xe4] ss:$16 sps:$4 sm:$0xff]   ;;  %v2801_v1 = vld [vmem:[#allocation5 + $0xec] ss:$16 sps:$4 sm:$0xff]  }
  0x70   :  { %572 = vmatprep.subr.bf16.mxu0 %v2799_v0  ;;  %v2803_v2 = vld [vmem:[#allocation5 + $0xe0] ss:$16 sps:$4 sm:$0xff]   ;;  %v2804_v3 = vld [vmem:[#allocation5 + $0xe8] ss:$16 sps:$4 sm:$0xff]   ;;  %613 = vmatprep.subr.bf16.mxu1 %v2801_v1  ;;  %v2805_v4 = vld [vmem:[#allocation5 + $0xc4] ss:$16 sps:$4 sm:$0xff]  }
  0x71   :  { %573 = vmatpush1.bf16.msra.mxu0 %v2803_v2  ;;  %614 = vmatpush1.bf16.msra.mxu1 %v2804_v3  ;;  %v2807_v5 = vld [vmem:[#allocation5 + $0xcc] ss:$16 sps:$4 sm:$0xff]   ;;  %v2809_v6 = vld [vmem:[#allocation5 + $0xc0] ss:$16 sps:$4 sm:$0xff]   ;;  %v2810_v7 = vld [vmem:[#allocation5 + $0xc8] ss:$16 sps:$4 sm:$0xff]  }
  0x72   :  { %574 = vmatprep.subr.bf16.mxu0 %v2805_v4  ;;  %615 = vmatprep.subr.bf16.mxu1 %v2807_v5  ;;  %v2811_v8 = vld [vmem:[#allocation5 + $0xa4] ss:$16 sps:$4 sm:$0xff]   ;;  %v2813_v9 = vld [vmem:[#allocation5 + $0xac] ss:$16 sps:$4 sm:$0xff]   ;;  %v2815_v10 = vld [vmem:[#allocation5 + $0xa0] ss:$16 sps:$4 sm:$0xff]  }
  0x73   :  { %v2816_v11 = vld [vmem:[#allocation5 + $0xa8] ss:$16 sps:$4 sm:$0xff]   ;;  %v2817_v12 = vld [vmem:[#allocation5 + $0x84] ss:$16 sps:$4 sm:$0xff]   ;;  %v2819_v13 = vld [vmem:[#allocation5 + $0x8c] ss:$16 sps:$4 sm:$0xff]  }
  0x74   :  { %v2821_v14 = vld [vmem:[#allocation5 + $0x80] ss:$16 sps:$4 sm:$0xff]   ;;  %v2822_v15 = vld [vmem:[#allocation5 + $0x88] ss:$16 sps:$4 sm:$0xff]   ;;  %v2823_v16 = vld [vmem:[#allocation5 + $0x64] ss:$16 sps:$4 sm:$0xff]  }
  0x75   :  { %575 = vmatpush1.bf16.msra.mxu0 %v2809_v6  ;;  %616 = vmatpush1.bf16.msra.mxu1 %v2810_v7  ;;  %v2825_v17 = vld [vmem:[#allocation5 + $0x6c] ss:$16 sps:$4 sm:$0xff]   ;;  %v2827_v18 = vld [vmem:[#allocation5 + $0x60] ss:$16 sps:$4 sm:$0xff]   ;;  %v2828_v19 = vld [vmem:[#allocation5 + $0x68] ss:$16 sps:$4 sm:$0xff]  }
  0x76   :  { %576 = vmatprep.subr.bf16.mxu0 %v2811_v8  ;;  %617 = vmatprep.subr.bf16.mxu1 %v2813_v9  ;;  %v2829_v20 = vld [vmem:[#allocation5 + $0x44] ss:$16 sps:$4 sm:$0xff]   ;;  %v2831_v21 = vld [vmem:[#allocation5 + $0x4c] ss:$16 sps:$4 sm:$0xff]   ;;  %v2833_v22 = vld [vmem:[#allocation5 + $0x40] ss:$16 sps:$4 sm:$0xff]  }
  0x77   :  { %v2834_v23 = vld [vmem:[#allocation5 + $0x48] ss:$16 sps:$4 sm:$0xff]   ;;  %v2835_v24 = vld [vmem:[#allocation5 + $0x24] ss:$16 sps:$4 sm:$0xff]   ;;  %v2837_v25 = vld [vmem:[#allocation5 + $0x2c] ss:$16 sps:$4 sm:$0xff]  }
  0x78   :  { %v2839_v26 = vld [vmem:[#allocation5 + $0x20] ss:$16 sps:$4 sm:$0xff]   ;;  %v2840_v27 = vld [vmem:[#allocation5 + $0x28] ss:$16 sps:$4 sm:$0xff]   ;;  %v2841_v28 = vld [vmem:[#allocation5 + $0x4] ss:$16 sps:$4 sm:$0xff]  }
  0x79   :  { %577 = vmatpush1.bf16.msra.mxu0 %v2815_v10  ;;  %618 = vmatpush1.bf16.msra.mxu1 %v2816_v11  ;;  %v2843_v29 = vld [vmem:[#allocation5 + $0xc] ss:$16 sps:$4 sm:$0xff]   ;;  %v2845_v30 = vld [vmem:[#allocation5] ss:$16 sps:$4 sm:$0xff]   ;;  %v2846_v31 = vld [vmem:[#allocation5 + $0x8] ss:$16 sps:$4 sm:$0xff]  }
  0x7a   :  { %578 = vmatprep.subr.bf16.mxu0 %v2817_v12  ;;  %619 = vmatprep.subr.bf16.mxu1 %v2819_v13  ;;  %v2847_v32 = vld [vmem:[#allocation5 + $0x1e4] ss:$16 sps:$4 sm:$0xff]   ;;  %v2849_v33 = vld [vmem:[#allocation5 + $0x1ec] ss:$16 sps:$4 sm:$0xff]   ;;  %v2851_v34 = vld [vmem:[#allocation5 + $0x1e0] ss:$16 sps:$4 sm:$0xff]  }
  0x7b   :  { %v2852_v35 = vld [vmem:[#allocation5 + $0x1e8] ss:$16 sps:$4 sm:$0xff]   ;;  %v2853_v36 = vld [vmem:[#allocation5 + $0x1c4] ss:$16 sps:$4 sm:$0xff]   ;;  %v2855_v37 = vld [vmem:[#allocation5 + $0x1cc] ss:$16 sps:$4 sm:$0xff]  }
  0x7c   :  { %v2857_v38 = vld [vmem:[#allocation5 + $0x1c0] ss:$16 sps:$4 sm:$0xff]   ;;  %v2858_v39 = vld [vmem:[#allocation5 + $0x1c8] ss:$16 sps:$4 sm:$0xff]   ;;  %v2859_v40 = vld [vmem:[#allocation5 + $0x1a4] ss:$16 sps:$4 sm:$0xff]  }
  0x7d   :  { %579 = vmatpush1.bf16.msra.mxu0 %v2821_v14  ;;  %620 = vmatpush1.bf16.msra.mxu1 %v2822_v15  ;;  %v2861_v41 = vld [vmem:[#allocation5 + $0x1ac] ss:$16 sps:$4 sm:$0xff]   ;;  %v2863_v42 = vld [vmem:[#allocation5 + $0x1a0] ss:$16 sps:$4 sm:$0xff]   ;;  %v2864_v43 = vld [vmem:[#allocation5 + $0x1a8] ss:$16 sps:$4 sm:$0xff]  }
  0x7e   :  { %580 = vmatprep.subr.bf16.mxu0 %v2823_v16  ;;  %621 = vmatprep.subr.bf16.mxu1 %v2825_v17  ;;  %v2865_v44 = vld [vmem:[#allocation5 + $0x184] ss:$16 sps:$4 sm:$0xff]   ;;  %v2867_v45 = vld [vmem:[#allocation5 + $0x18c] ss:$16 sps:$4 sm:$0xff]   ;;  %v2869_v48 = vld [vmem:[#allocation5 + $0x180] ss:$16 sps:$4 sm:$0xff]  }
  0x7f   :  { %v163_v46 = vld [vmem:[#allocation2 + $0x8] sm:$0xff]  ;;  %v2871_v50 = vld [vmem:[#allocation5 + $0x164] ss:$16 sps:$4 sm:$0xff]   ;;  %v2875_v52 = vld [vmem:[#allocation5 + $0x160] ss:$16 sps:$4 sm:$0xff]   ;;  %s3455_s22 = smov [#allocation17]  }
  0x80   :  { %v165_v47 = vpack.c.bf16 %v163_v46, %v163_v46  ;;  %v2870_v49 = vld [vmem:[#allocation5 + $0x188] ss:$16 sps:$4 sm:$0xff]   ;;  %v2873_v51 = vld [vmem:[#allocation5 + $0x16c] ss:$16 sps:$4 sm:$0xff]   ;;  %v2877_v54 = vld [vmem:[#allocation5 + $0x144] ss:$16 sps:$4 sm:$0xff]  }
  0x81   :  { %581 = vmatpush1.bf16.msra.mxu0 %v2827_v18  ;;  %622 = vmatpush1.bf16.msra.mxu1 %v2828_v19  ;;  %v2876_v53 = vld [vmem:[#allocation5 + $0x168] ss:$16 sps:$4 sm:$0xff]   ;;  %v2879_v55 = vld [vmem:[#allocation5 + $0x14c] ss:$16 sps:$4 sm:$0xff]   ;;  %v2881_v56 = vld [vmem:[#allocation5 + $0x140] ss:$16 sps:$4 sm:$0xff]  }
  0x82   :  { %582 = vmatprep.subr.bf16.mxu0 %v2829_v20  ;;  %623 = vmatprep.subr.bf16.mxu1 %v2831_v21  ;;  %v2882_v57 = vld [vmem:[#allocation5 + $0x148] ss:$16 sps:$4 sm:$0xff]   ;;  %v2883_v58 = vld [vmem:[#allocation5 + $0x124] ss:$16 sps:$4 sm:$0xff]   ;;  %v2885_v59 = vld [vmem:[#allocation5 + $0x12c] ss:$16 sps:$4 sm:$0xff]  }
  0x83   :  { %604 = vmatprep.mubr.bf16.mxu0 %v165_v47  ;;  %645 = vmatprep.mubr.bf16.mxu1 %v165_v47  ;;  %v2887_v60 = vld [vmem:[#allocation5 + $0x120] ss:$16 sps:$4 sm:$0xff]   ;;  %v2888_v61 = vld [vmem:[#allocation5 + $0x128] ss:$16 sps:$4 sm:$0xff]   ;;  %v2889_v62 = vld [vmem:[#allocation5 + $0x104] ss:$16 sps:$4 sm:$0xff]  }
  0x84   :  { %v2891_v63 = vld [vmem:[#allocation5 + $0x10c] ss:$16 sps:$4 sm:$0xff]   ;;  %v2893_v0 = vld [vmem:[#allocation5 + $0x100] ss:$16 sps:$4 sm:$0xff]   ;;  %v2894_v1 = vld [vmem:[#allocation5 + $0x108] ss:$16 sps:$4 sm:$0xff]  }
  0x85   :  { %583 = vmatpush1.bf16.msra.mxu0 %v2833_v22  ;;  %624 = vmatpush1.bf16.msra.mxu1 %v2834_v23  ;;  %v162_v2 = vld [vmem:[#allocation2] sm:$0xff]  ;;  %v2897_v3 = vld [vmem:[#allocation8 + $0x74] ss:$8 sps:$4 sm:$0xff]   ;;  %v2901_v10 = vld [vmem:[#allocation8 + $0x60] ss:$8 sps:$4 sm:$0xff]  }
  0x86   :  { %584 = vmatprep.subr.bf16.mxu0 %v2835_v24  ;;  %625 = vmatprep.subr.bf16.mxu1 %v2837_v25  ;;  %v2900_v4 = vld [vmem:[#allocation8 + $0x174] ss:$8 sps:$4 sm:$0xff]   ;;  %v164_v5 = vpack.c.bf16 %v162_v2, %v162_v2  ;;  %v2895_v6 = vld [vmem:[#allocation8 + $0x70] ss:$8 sps:$4 sm:$0xff]   ;;  %v2903_v8 = vld [vmem:[#allocation8 + $0x64] ss:$8 sps:$4 sm:$0xff]  }
  0x87   :  { %v2898_v7 = vld [vmem:[#allocation8 + $0x170] ss:$8 sps:$4 sm:$0xff]   ;;  %v2906_v9 = vld [vmem:[#allocation8 + $0x164] ss:$8 sps:$4 sm:$0xff]   ;;  %v2904_v11 = vld [vmem:[#allocation8 + $0x160] ss:$8 sps:$4 sm:$0xff]  }
  0x88   :  { %v2909_v12 = vld [vmem:[#allocation8 + $0x54] ss:$8 sps:$4 sm:$0xff]   ;;  %v2907_v14 = vld [vmem:[#allocation8 + $0x50] ss:$8 sps:$4 sm:$0xff]   ;;  %v2915_v16 = vld [vmem:[#allocation8 + $0x44] ss:$8 sps:$4 sm:$0xff]  }
  0x89   :  { %585 = vmatpush1.bf16.msra.mxu0 %v2839_v26  ;;  %626 = vmatpush1.bf16.msra.mxu1 %v2840_v27  ;;  %v2912_v13 = vld [vmem:[#allocation8 + $0x154] ss:$8 sps:$4 sm:$0xff]   ;;  %v2910_v15 = vld [vmem:[#allocation8 + $0x150] ss:$8 sps:$4 sm:$0xff]   ;;  %v2918_v17 = vld [vmem:[#allocation8 + $0x144] ss:$8 sps:$4 sm:$0xff]  }
  0x8a   :  { %586 = vmatprep.subr.bf16.mxu0 %v2841_v28  ;;  %627 = vmatprep.subr.bf16.mxu1 %v2843_v29  ;;  %v2913_v18 = vld [vmem:[#allocation8 + $0x40] ss:$8 sps:$4 sm:$0xff]   ;;  %v2921_v20 = vld [vmem:[#allocation8 + $0x34] ss:$8 sps:$4 sm:$0xff]   ;;  %v2919_v22 = vld [vmem:[#allocation8 + $0x30] ss:$8 sps:$4 sm:$0xff]  }
  0x8b   :  { %v2916_v19 = vld [vmem:[#allocation8 + $0x140] ss:$8 sps:$4 sm:$0xff]   ;;  %v2924_v21 = vld [vmem:[#allocation8 + $0x134] ss:$8 sps:$4 sm:$0xff]   ;;  %v2922_v23 = vld [vmem:[#allocation8 + $0x130] ss:$8 sps:$4 sm:$0xff]  }
  0x8c   :  { %v2927_v24 = vld [vmem:[#allocation8 + $0x24] ss:$8 sps:$4 sm:$0xff]   ;;  %v2925_v26 = vld [vmem:[#allocation8 + $0x20] ss:$8 sps:$4 sm:$0xff]   ;;  %v2933_v28 = vld [vmem:[#allocation8 + $0x14] ss:$8 sps:$4 sm:$0xff]  }
  0x8d   :  { %587 = vmatpush1.bf16.msra.mxu0 %v2845_v30  ;;  %628 = vmatpush1.bf16.msra.mxu1 %v2846_v31  ;;  %v2930_v25 = vld [vmem:[#allocation8 + $0x124] ss:$8 sps:$4 sm:$0xff]   ;;  %v2928_v27 = vld [vmem:[#allocation8 + $0x120] ss:$8 sps:$4 sm:$0xff]   ;;  %v2936_v29 = vld [vmem:[#allocation8 + $0x114] ss:$8 sps:$4 sm:$0xff]  }
  0x8e   :  { %588 = vmatprep.subr.bf16.mxu0 %v2847_v32  ;;  %629 = vmatprep.subr.bf16.mxu1 %v2849_v33  ;;  %v2931_v30 = vld [vmem:[#allocation8 + $0x10] ss:$8 sps:$4 sm:$0xff]   ;;  %v2939_v32 = vld [vmem:[#allocation8 + $0x4] ss:$8 sps:$4 sm:$0xff]   ;;  %v2985_v2 = vld [vmem:[#allocation8 + $0x80] ss:$8 sps:$4 sm:$0xff]  }
  0x8f   :  { %v2934_v31 = vld [vmem:[#allocation8 + $0x110] ss:$8 sps:$4 sm:$0xff]   ;;  %v2942_v33 = vld [vmem:[#allocation8 + $0x104] ss:$8 sps:$4 sm:$0xff]  }
  0x90   :  { %v2955_v46 = vld [vmem:[#allocation8 + $0xd0] ss:$8 sps:$4 sm:$0xff]  }
  0x91   :  { %589 = vmatpush2.bf16.msra.mxu0 %v2851_v34  ;;  %630 = vmatpush2.bf16.msra.mxu1 %v2852_v35  ;;  %v2937_v34 = vld [vmem:[#allocation8] ss:$8 sps:$4 sm:$0xff]   ;;  %v2958_v47 = vld [vmem:[#allocation8 + $0x1d0] ss:$8 sps:$4 sm:$0xff]  }
  0x92   :  { %590 = vmatprep.subr.bf16.mxu0 %v2853_v36  ;;  %631 = vmatprep.subr.bf16.mxu1 %v2855_v37  ;;  %v2940_v35 = vld [vmem:[#allocation8 + $0x100] ss:$8 sps:$4 sm:$0xff]   ;;  %v2945_v36 = vld [vmem:[#allocation8 + $0xf4] ss:$8 sps:$4 sm:$0xff]  }
  0x93   :  { %v2948_v37 = vld [vmem:[#allocation8 + $0x1f4] ss:$8 sps:$4 sm:$0xff]  }
  0x95   :  { %591 = vmatpush2.bf16.msra.mxu0 %v2857_v38  ;;  %632 = vmatpush2.bf16.msra.mxu1 %v2858_v39  ;;  %v2943_v38 = vld [vmem:[#allocation8 + $0xf0] ss:$8 sps:$4 sm:$0xff]  }
  0x96   :  { %592 = vmatprep.subr.bf16.mxu0 %v2859_v40  ;;  %633 = vmatprep.subr.bf16.mxu1 %v2861_v41  ;;  %v2946_v39 = vld [vmem:[#allocation8 + $0x1f0] ss:$8 sps:$4 sm:$0xff]   ;;  %v2951_v40 = vld [vmem:[#allocation8 + $0xe4] ss:$8 sps:$4 sm:$0xff]  }
  0x97   :  { %v2954_v41 = vld [vmem:[#allocation8 + $0x1e4] ss:$8 sps:$4 sm:$0xff]  }
  0x99   :  { %593 = vmatpush2.bf16.msra.mxu0 %v2863_v42  ;;  %634 = vmatpush2.bf16.msra.mxu1 %v2864_v43  ;;  %v2949_v42 = vld [vmem:[#allocation8 + $0xe0] ss:$8 sps:$4 sm:$0xff]  }
  0x9a   :  { %594 = vmatprep.subr.bf16.mxu0 %v2865_v44  ;;  %635 = vmatprep.subr.bf16.mxu1 %v2867_v45  ;;  %v2952_v43 = vld [vmem:[#allocation8 + $0x1e0] ss:$8 sps:$4 sm:$0xff]   ;;  %v2957_v44 = vld [vmem:[#allocation8 + $0xd4] ss:$8 sps:$4 sm:$0xff]  }
  0x9b   :  { %v2960_v45 = vld [vmem:[#allocation8 + $0x1d4] ss:$8 sps:$4 sm:$0xff]  }
  0x9d   :  { %595 = vmatpush2.bf16.msra.mxu0 %v2869_v48  ;;  %636 = vmatpush2.bf16.msra.mxu1 %v2870_v49  ;;  %v2963_v48 = vld [vmem:[#allocation8 + $0xc4] ss:$8 sps:$4 sm:$0xff]  }
  0x9e   :  { %596 = vmatprep.subr.bf16.mxu0 %v2871_v50  ;;  %637 = vmatprep.subr.bf16.mxu1 %v2873_v51  ;;  %v2966_v49 = vld [vmem:[#allocation8 + $0x1c4] ss:$8 sps:$4 sm:$0xff]   ;;  %v2961_v50 = vld [vmem:[#allocation8 + $0xc0] ss:$8 sps:$4 sm:$0xff]  }
  0x9f   :  { %v2964_v51 = vld [vmem:[#allocation8 + $0x1c0] ss:$8 sps:$4 sm:$0xff]  }
  0xa1   :  { %597 = vmatpush2.bf16.msra.mxu0 %v2875_v52  ;;  %638 = vmatpush2.bf16.msra.mxu1 %v2876_v53  ;;  %v2969_v52 = vld [vmem:[#allocation8 + $0xb4] ss:$8 sps:$4 sm:$0xff]  }
  0xa2   :  { %598 = vmatprep.subr.bf16.mxu0 %v2877_v54  ;;  %639 = vmatprep.subr.bf16.mxu1 %v2879_v55  ;;  %v2972_v53 = vld [vmem:[#allocation8 + $0x1b4] ss:$8 sps:$4 sm:$0xff]   ;;  %v2967_v54 = vld [vmem:[#allocation8 + $0xb0] ss:$8 sps:$4 sm:$0xff]  }
  0xa3   :  { %v2970_v55 = vld [vmem:[#allocation8 + $0x1b0] ss:$8 sps:$4 sm:$0xff]  }
  0xa5   :  { %599 = vmatpush2.bf16.msra.mxu0 %v2881_v56  ;;  %640 = vmatpush2.bf16.msra.mxu1 %v2882_v57  ;;  %v2975_v56 = vld [vmem:[#allocation8 + $0xa4] ss:$8 sps:$4 sm:$0xff]  }
  0xa6   :  { %600 = vmatprep.subr.bf16.mxu0 %v2883_v58  ;;  %641 = vmatprep.subr.bf16.mxu1 %v2885_v59  ;;  %v2978_v57 = vld [vmem:[#allocation8 + $0x1a4] ss:$8 sps:$4 sm:$0xff]   ;;  %v2973_v58 = vld [vmem:[#allocation8 + $0xa0] ss:$8 sps:$4 sm:$0xff]  }
  0xa7   :  { %v2976_v59 = vld [vmem:[#allocation8 + $0x1a0] ss:$8 sps:$4 sm:$0xff]  }
  0xa9   :  { %601 = vmatpush2.bf16.msra.mxu0 %v2887_v60  ;;  %642 = vmatpush2.bf16.msra.mxu1 %v2888_v61  ;;  %v2981_v60 = vld [vmem:[#allocation8 + $0x94] ss:$8 sps:$4 sm:$0xff]  }
  0xaa   :  { %602 = vmatprep.subr.bf16.mxu0 %v2889_v62  ;;  %643 = vmatprep.subr.bf16.mxu1 %v2891_v63  ;;  %v2984_v61 = vld [vmem:[#allocation8 + $0x194] ss:$8 sps:$4 sm:$0xff]   ;;  %v2979_v62 = vld [vmem:[#allocation8 + $0x90] ss:$8 sps:$4 sm:$0xff]  }
  0xab   :  { %v2982_v63 = vld [vmem:[#allocation8 + $0x190] ss:$8 sps:$4 sm:$0xff]  }
  0xad   :  { %603 = vmatpush2.bf16.msra.mxu0 %v2893_v0  ;;  %644 = vmatpush2.bf16.msra.mxu1 %v2894_v1  ;;  %v2987_v0 = vld [vmem:[#allocation8 + $0x84] ss:$8 sps:$4 sm:$0xff]  }
  0xae   :  { %1058 = vmatprep.subr.bf16.mxu0 %v2897_v3  ;;  %1099 = vmatprep.subr.bf16.mxu1 %v2900_v4  ;;  %v2990_v1 = vld [vmem:[#allocation8 + $0x184] ss:$8 sps:$4 sm:$0xff]   ;;  %v2988_v3 = vld [vmem:[#allocation8 + $0x180] ss:$8 sps:$4 sm:$0xff]   ;;  %v2991_v4 = vld [vmem:[#allocation10 + $0x78] sm:$0xff]  }
  0xb0   :  { %605 = vmatmul.mubr.bf16.vlgmr.msra.gmra.mxu0 %v164_v5  ;;  %646 = vmatmul.mubr.bf16.vlgmr.msra.gmra.mxu1 %v164_v5  ;;  %v232_v5 = vlaneseq }
  0xb1   :  { %1059 = vmatpush1.bf16.msra.mxu0 %v2895_v6  ;;  %1100 = vmatpush1.bf16.msra.mxu1 %v2898_v7 }
  0xb2   :  { %1060 = vmatprep.subr.bf16.mxu0 %v2903_v8  ;;  %1101 = vmatprep.subr.bf16.mxu1 %v2906_v9  ;;  %v3568_v6 = vshrl.u32 %v232_v5, 7  ;;  %v230_v9 = vld [vmem:[#allocation7] sm:$0xf] }
  0xb4   :  { %v3571_v7 = vsub.s32 0, %v3568_v6  ;;  %v242_v8 = vsub.s32 2, %v3568_v6 }
  0xb5   :  { %1061 = vmatpush1.bf16.msra.mxu0 %v2901_v10  ;;  %1102 = vmatpush1.bf16.msra.mxu1 %v2904_v11  ;;  %v3575_v10 = vsub.s32 1, %v3568_v6  ;;  %v246_v11 = vsub.s32 3, %v3568_v6 }
  0xb6   :  { %1062 = vmatprep.subr.bf16.mxu0 %v2909_v12  ;;  %1103 = vmatprep.subr.bf16.mxu1 %v2912_v13  ;;  %v235_v12 = vrot.slane %v230_v9, %v3571_v7  ;;  %v243_v13 = vrot.slane %v230_v9, %v242_v8 }
  0xb9   :  { %1063 = vmatpush1.bf16.msra.mxu0 %v2907_v14  ;;  %1104 = vmatpush1.bf16.msra.mxu1 %v2910_v15  ;;  %v239_v14 = vrot.slane %v230_v9, %v3575_v10  ;;  %v247_v15 = vrot.slane %v230_v9, %v246_v11 }
  0xba   :  { %1064 = vmatprep.subr.bf16.mxu0 %v2915_v16  ;;  %1105 = vmatprep.subr.bf16.mxu1 %v2918_v17 }
  0xbd   :  { %1065 = vmatpush1.bf16.msra.mxu0 %v2913_v18  ;;  %1106 = vmatpush1.bf16.msra.mxu1 %v2916_v19 }
  0xbe   :  { %1066 = vmatprep.subr.bf16.mxu0 %v2921_v20  ;;  %1107 = vmatprep.subr.bf16.mxu1 %v2924_v21 }
  0xc1   :  { %1067 = vmatpush1.bf16.msra.mxu0 %v2919_v22  ;;  %1108 = vmatpush1.bf16.msra.mxu1 %v2922_v23 }
  0xc2   :  { %1068 = vmatprep.subr.bf16.mxu0 %v2927_v24  ;;  %1109 = vmatprep.subr.bf16.mxu1 %v2930_v25 }
  0xc5   :  { %1069 = vmatpush1.bf16.msra.mxu0 %v2925_v26  ;;  %1110 = vmatpush1.bf16.msra.mxu1 %v2928_v27 }
  0xc6   :  { %1070 = vmatprep.subr.bf16.mxu0 %v2933_v28  ;;  %1111 = vmatprep.subr.bf16.mxu1 %v2936_v29 }
  0xc9   :  { %1071 = vmatpush1.bf16.msra.mxu0 %v2931_v30  ;;  %1112 = vmatpush1.bf16.msra.mxu1 %v2934_v31 }
  0xca   :  { %1072 = vmatprep.subr.bf16.mxu0 %v2939_v32  ;;  %1113 = vmatprep.subr.bf16.mxu1 %v2942_v33 }
  0xcd   :  { %1073 = vmatpush1.bf16.msra.mxu0 %v2937_v34  ;;  %1114 = vmatpush1.bf16.msra.mxu1 %v2940_v35  ;;  %v2992_v35 = vld [vmem:[#allocation10 + $0x38] sm:$0xff]  }
  0xce   :  { %1074 = vmatprep.subr.bf16.mxu0 %v2945_v36  ;;  %1115 = vmatprep.subr.bf16.mxu1 %v2948_v37  ;;  %v2993_v37 = vld [vmem:[#allocation10 + $0x70] sm:$0xff]  }
  0xd1   :  { %1075 = vmatpush2.bf16.msra.mxu0 %v2943_v38  ;;  %1116 = vmatpush2.bf16.msra.mxu1 %v2946_v39  ;;  %v2994_v38 = vld [vmem:[#allocation10 + $0x30] sm:$0xff]   ;;  %v2995_v39 = vld [vmem:[#allocation10 + $0x68] sm:$0xff]  }
  0xd2   :  { %1076 = vmatprep.subr.bf16.mxu0 %v2951_v40  ;;  %1117 = vmatprep.subr.bf16.mxu1 %v2954_v41  ;;  %v2996_v40 = vld [vmem:[#allocation10 + $0x28] sm:$0xff]   ;;  %v2997_v41 = vld [vmem:[#allocation10 + $0x60] sm:$0xff]  }
  0xd5   :  { %1077 = vmatpush2.bf16.msra.mxu0 %v2949_v42  ;;  %1118 = vmatpush2.bf16.msra.mxu1 %v2952_v43  ;;  %v2998_v42 = vld [vmem:[#allocation10 + $0x20] sm:$0xff]   ;;  %v2999_v43 = vld [vmem:[#allocation10 + $0x58] sm:$0xff]  }
  0xd6   :  { %1078 = vmatprep.subr.bf16.mxu0 %v2957_v44  ;;  %1119 = vmatprep.subr.bf16.mxu1 %v2960_v45  ;;  %v3000_v44 = vld [vmem:[#allocation10 + $0x18] sm:$0xff]   ;;  %v3001_v45 = vld [vmem:[#allocation10 + $0x50] sm:$0xff]  }
  0xd9   :  { %1079 = vmatpush2.bf16.msra.mxu0 %v2955_v46  ;;  %1120 = vmatpush2.bf16.msra.mxu1 %v2958_v47  ;;  %v3002_v46 = vld [vmem:[#allocation10 + $0x10] sm:$0xff]   ;;  %v3003_v47 = vld [vmem:[#allocation10 + $0x48] sm:$0xff]  }
  0xda   :  { %1080 = vmatprep.subr.bf16.mxu0 %v2963_v48  ;;  %1121 = vmatprep.subr.bf16.mxu1 %v2966_v49  ;;  %v3004_v48 = vld [vmem:[#allocation10 + $0x8] sm:$0xff]   ;;  %v3005_v49 = vld [vmem:[#allocation10 + $0x40] sm:$0xff]  }
  0xdd   :  { %1081 = vmatpush2.bf16.msra.mxu0 %v2961_v50  ;;  %1122 = vmatpush2.bf16.msra.mxu1 %v2964_v51  ;;  %v3006_v50 = vld [vmem:[#allocation10] sm:$0xff]   ;;  %v3007_v51 = vld [vmem:[#allocation13 + $0x70] ss:$8 sps:$4 sm:$0xff]  }
  0xde   :  { %1082 = vmatprep.subr.bf16.mxu0 %v2969_v52  ;;  %1123 = vmatprep.subr.bf16.mxu1 %v2972_v53  ;;  %v3009_v52 = vld [vmem:[#allocation13 + $0x74] ss:$8 sps:$4 sm:$0xff]   ;;  %v3012_v53 = vld [vmem:[#allocation13 + $0x64] ss:$8 sps:$4 sm:$0xff]  }
  0xe1   :  { %1083 = vmatpush2.bf16.msra.mxu0 %v2967_v54  ;;  %1124 = vmatpush2.bf16.msra.mxu1 %v2970_v55  ;;  %v3010_v54 = vld [vmem:[#allocation13 + $0x60] ss:$8 sps:$4 sm:$0xff]   ;;  %v3015_v55 = vld [vmem:[#allocation13 + $0x54] ss:$8 sps:$4 sm:$0xff]  }
  0xe2   :  { %1084 = vmatprep.subr.bf16.mxu0 %v2975_v56  ;;  %1125 = vmatprep.subr.bf16.mxu1 %v2978_v57  ;;  %v3013_v56 = vld [vmem:[#allocation13 + $0x50] ss:$8 sps:$4 sm:$0xff]   ;;  %v3018_v57 = vld [vmem:[#allocation13 + $0x44] ss:$8 sps:$4 sm:$0xff]  }
  0xe5   :  { %1085 = vmatpush2.bf16.msra.mxu0 %v2973_v58  ;;  %1126 = vmatpush2.bf16.msra.mxu1 %v2976_v59  ;;  %v3016_v58 = vld [vmem:[#allocation13 + $0x40] ss:$8 sps:$4 sm:$0xff]   ;;  %v3021_v59 = vld [vmem:[#allocation13 + $0x34] ss:$8 sps:$4 sm:$0xff]  }
  0xe6   :  { %1086 = vmatprep.subr.bf16.mxu0 %v2981_v60  ;;  %1127 = vmatprep.subr.bf16.mxu1 %v2984_v61  ;;  %v3019_v60 = vld [vmem:[#allocation13 + $0x30] ss:$8 sps:$4 sm:$0xff]   ;;  %v3024_v61 = vld [vmem:[#allocation13 + $0x24] ss:$8 sps:$4 sm:$0xff]  }
  0xe9   :  { %1087 = vmatpush2.bf16.msra.mxu0 %v2979_v62  ;;  %1128 = vmatpush2.bf16.msra.mxu1 %v2982_v63  ;;  %v3022_v62 = vld [vmem:[#allocation13 + $0x20] ss:$8 sps:$4 sm:$0xff]  }
  0xea   :  { %1088 = vmatprep.subr.bf16.mxu0 %v2987_v0  ;;  %1129 = vmatprep.subr.bf16.mxu1 %v2990_v1  ;;  %v726_v63 = vld [vmem:[%s3615_s4] sm:$0x3] }
  0xeb   :  { %v731_v0 = vrot.slane %v726_v63, %v3571_v7  ;;  %v735_v1 = vrot.slane %v726_v63, %v3575_v10 }
  0xed   :  { %1089 = vmatpush2.bf16.msra.mxu0 %v2985_v2  ;;  %1130 = vmatpush2.bf16.msra.mxu1 %v2988_v3 }
  0xee   :  { %2760 = vmatprep.subr.bf16.mxu0 %v2991_v4  ;;  %1429 = vmatprep.subr.bf16.mxu1 %v3009_v52  ;;  %v3097_v52 = vld [vmem:[#allocation14 + $0x180] ss:$16 sps:$4 sm:$0xff]  }
 0x170   :  { %v606_v16 = vpop.f32.mrf.mxu0  ;;  %v647_v17 = vpop.f32.mrf.mxu1 }
 0x171   :  { %v607_v18 = vadd.f32 %v606_v16, %v235_v12  ;;  %v648_v19 = vadd.f32 %v647_v17, %v243_v13 }
 0x172   :  { %v608_v20 = vpop.f32.mrf.mxu0  ;;  %v649_v21 = vpop.f32.mrf.mxu1 }
 0x173   :  { %v656_v22 = vmax.f32 %v648_v19, 0.0  ;;  %v609_v23 = vadd.f32 %v608_v20, %v239_v14  ;;  %v650_v24 = vadd.f32 %v649_v21, %v247_v15  ;;  %v654_v25 = vmax.f32 %v607_v18, 0.0 }
 0x174   :  { %v610_v26 = vpop.f32.mrf.mxu0  ;;  %v651_v27 = vpop.f32.mrf.mxu1 }
 0x175   :  { %v655_v28 = vmax.f32 %v609_v23, 0.0  ;;  %v657_v29 = vmax.f32 %v650_v24, 0.0  ;;  %v660_v30 = vpack.c.bf16 %v656_v22, %v656_v22  ;;  %v658_v36 = vpack.c.bf16 %v654_v25, %v654_v25  ;;  %v3027_v23 = vld [vmem:[#allocation13 + $0x14] ss:$8 sps:$4 sm:$0xff]   ;;  %v3025_v24 = vld [vmem:[#allocation13 + $0x10] ss:$8 sps:$4 sm:$0xff]  }
 0x176   :  { %v611_v31 = vpop.f32.mrf.mxu0  ;;  %v652_v32 = vpop.f32.mrf.mxu1  ;;  %v3030_v25 = vld [vmem:[#allocation13 + $0x4] ss:$8 sps:$4 sm:$0xff]   ;;  %v3028_v26 = vld [vmem:[#allocation13] ss:$8 sps:$4 sm:$0xff]   ;;  %v3454_v27 = vmov 0  }
 0x177   :  { %v659_v33 = vpack.c.bf16 %v655_v28, %v655_v28  ;;  %v661_v34 = vpack.c.bf16 %v657_v29, %v657_v29  ;;  %v3031_v28 = vld [vmem:[#allocation14 + $0xe0] ss:$16 sps:$4 sm:$0xff]   ;;  %v3033_v29 = vld [vmem:[#allocation14 + $0xe4] ss:$16 sps:$4 sm:$0xff]  }
 0x178   :  { %v3039_v31 = vld [vmem:[#allocation14 + $0xc4] ss:$16 sps:$4 sm:$0xff]   ;;  %v3037_v32 = vld [vmem:[#allocation14 + $0xc0] ss:$16 sps:$4 sm:$0xff]  }
 0x179   :  { %1090 = vmatprep.mubr.bf16.mxu0 %v659_v33  ;;  %1131 = vmatprep.mubr.bf16.mxu1 %v661_v34  ;;  %v3045_v33 = vld [vmem:[#allocation14 + $0xa4] ss:$16 sps:$4 sm:$0xff]   ;;  %v3043_v34 = vld [vmem:[#allocation14 + $0xa0] ss:$16 sps:$4 sm:$0xff]  }
 0x17a   :  { %1091 = vmatmul.mubr.bf16.vlgmr.msra.gmra.mxu0 %v658_v36  ;;  %1132 = vmatmul.mubr.bf16.vlgmr.msra.gmra.mxu1 %v660_v30  ;;  %v3036_v30 = vld [vmem:[#allocation14 + $0xec] ss:$16 sps:$4 sm:$0xff]   ;;  %v3049_v36 = vld [vmem:[#allocation14 + $0x80] ss:$16 sps:$4 sm:$0xff]  }
 0x17b   :  { %2761 = vmatpush3.bf16.msra.mxu0 %v2992_v35  ;;  %1430 = vmatpush1.bf16.msra.mxu1 %v3007_v51  ;;  %v3051_v35 = vld [vmem:[#allocation14 + $0x84] ss:$16 sps:$4 sm:$0xff]  }
 0x17c   :  { %2762 = vmatprep.subr.bf16.mxu0 %v2993_v37  ;;  %1431 = vmatprep.subr.bf16.mxu1 %v3012_v53  ;;  %v3057_v37 = vld [vmem:[#allocation14 + $0x64] ss:$16 sps:$4 sm:$0xff]  }
 0x17d   :  { %1461 = vmatprep.mubr.bf16.mxu1 %v3454_v27  ;;  %v3099_v51 = vld [vmem:[#allocation14 + $0x184] ss:$16 sps:$4 sm:$0xff]   ;;  %v3094_v27 = vld [vmem:[#allocation14 + $0x1a8] ss:$16 sps:$4 sm:$0xff]  }
 0x17e   :  { %v3105_v53 = vld [vmem:[#allocation14 + $0x164] ss:$16 sps:$4 sm:$0xff]  }
 0x17f   :  { %2763 = vmatpush3.bf16.msra.mxu0 %v2994_v38  ;;  %1432 = vmatpush1.bf16.msra.mxu1 %v3010_v54  ;;  %v3055_v38 = vld [vmem:[#allocation14 + $0x60] ss:$16 sps:$4 sm:$0xff]  }
 0x180   :  { %2764 = vmatprep.subr.bf16.mxu0 %v2995_v39  ;;  %1433 = vmatprep.subr.bf16.mxu1 %v3015_v55  ;;  %v3063_v39 = vld [vmem:[#allocation14 + $0x44] ss:$16 sps:$4 sm:$0xff]   ;;  %v3103_v54 = vld [vmem:[#allocation14 + $0x160] ss:$16 sps:$4 sm:$0xff]  }
 0x181   :  { %v3111_v55 = vld [vmem:[#allocation14 + $0x144] ss:$16 sps:$4 sm:$0xff]  }
 0x183   :  { %2765 = vmatpush3.bf16.msra.mxu0 %v2996_v40  ;;  %1434 = vmatpush1.bf16.msra.mxu1 %v3013_v56  ;;  %v3061_v40 = vld [vmem:[#allocation14 + $0x40] ss:$16 sps:$4 sm:$0xff]  }
 0x184   :  { %2766 = vmatprep.subr.bf16.mxu0 %v2997_v41  ;;  %1435 = vmatprep.subr.bf16.mxu1 %v3018_v57  ;;  %v3069_v41 = vld [vmem:[#allocation14 + $0x24] ss:$16 sps:$4 sm:$0xff]   ;;  %v3109_v56 = vld [vmem:[#allocation14 + $0x140] ss:$16 sps:$4 sm:$0xff]  }
 0x187   :  { %2767 = vmatpush3.bf16.msra.mxu0 %v2998_v42  ;;  %1436 = vmatpush1.bf16.msra.mxu1 %v3016_v58  ;;  %v3067_v42 = vld [vmem:[#allocation14 + $0x20] ss:$16 sps:$4 sm:$0xff]   ;;  %v2599_v58 = vld [vmem:[#allocation11] ss:$0 sm:$0xff] }
 0x188   :  { %2768 = vmatprep.subr.bf16.mxu0 %v2999_v43  ;;  %1437 = vmatprep.subr.bf16.mxu1 %v3021_v59  ;;  %v3075_v43 = vld [vmem:[#allocation14 + $0x4] ss:$16 sps:$4 sm:$0xff]  }
 0x18b   :  { %2769 = vmatpush3.bf16.msra.mxu0 %v3000_v44  ;;  %1438 = vmatpush1.bf16.msra.mxu1 %v3019_v60  ;;  %v3073_v44 = vld [vmem:[#allocation14] ss:$16 sps:$4 sm:$0xff]  }
 0x18c   :  { %2770 = vmatprep.subr.bf16.mxu0 %v3001_v45  ;;  %1439 = vmatprep.subr.bf16.mxu1 %v3024_v61  ;;  %v3081_v45 = vld [vmem:[#allocation14 + $0x1e4] ss:$16 sps:$4 sm:$0xff]  }
 0x18f   :  { %2771 = vmatpush3.bf16.msra.mxu0 %v3002_v46  ;;  %1440 = vmatpush1.bf16.msra.mxu1 %v3022_v62  ;;  %v3079_v46 = vld [vmem:[#allocation14 + $0x1e0] ss:$16 sps:$4 sm:$0xff]  }
 0x190   :  { %2772 = vmatprep.subr.bf16.mxu0 %v3003_v47  ;;  %1441 = vmatprep.subr.bf16.mxu1 %v3027_v23  ;;  %v3087_v47 = vld [vmem:[#allocation14 + $0x1c4] ss:$16 sps:$4 sm:$0xff]   ;;  %v3082_v23 = vld [vmem:[#allocation14 + $0x1e8] ss:$16 sps:$4 sm:$0xff]  }
 0x193   :  { %2773 = vmatpush3.bf16.msra.mxu0 %v3004_v48  ;;  %1442 = vmatpush1.bf16.msra.mxu1 %v3025_v24  ;;  %v3085_v48 = vld [vmem:[#allocation14 + $0x1c0] ss:$16 sps:$4 sm:$0xff]   ;;  %v3090_v24 = vld [vmem:[#allocation14 + $0x1cc] ss:$16 sps:$4 sm:$0xff]  }
 0x194   :  { %2774 = vmatprep.subr.bf16.mxu0 %v3005_v49  ;;  %1443 = vmatprep.subr.bf16.mxu1 %v3030_v25  ;;  %v3093_v49 = vld [vmem:[#allocation14 + $0x1a4] ss:$16 sps:$4 sm:$0xff]   ;;  %v3088_v25 = vld [vmem:[#allocation14 + $0x1c8] ss:$16 sps:$4 sm:$0xff]  }
 0x197   :  { %2775 = vmatpush3.bf16.msra.mxu0 %v3006_v50  ;;  %1444 = vmatpush1.bf16.msra.mxu1 %v3028_v26  ;;  %v3091_v50 = vld [vmem:[#allocation14 + $0x1a0] ss:$16 sps:$4 sm:$0xff]   ;;  %v3096_v26 = vld [vmem:[#allocation14 + $0x1ac] ss:$16 sps:$4 sm:$0xff]  }
 0x198   :  { %1880 = vmatprep.subr.bf16.mxu0 %v3033_v29  ;;  %1921 = vmatprep.subr.bf16.mxu1 %v3036_v30  ;;  %v3100_v29 = vld [vmem:[#allocation14 + $0x188] ss:$16 sps:$4 sm:$0xff]   ;;  %v3108_v30 = vld [vmem:[#allocation14 + $0x16c] ss:$16 sps:$4 sm:$0xff]  }
 0x23a   :  { %v1092_v2 = vpop.f32.mrf.mxu0  ;;  %v1133_v3 = vpop.f32.mrf.mxu1 }
 0x23b   :  { %v1093_v4 = vadd.f32 %v1092_v2, %v731_v0 }
 0x23c   :  { %v1094_v5 = vpop.f32.mrf.mxu0  ;;  %v1135_v9 = vpop.f32.mrf.mxu1 }
 0x23d   :  { %v1134_v12 = vadd.f32 %v1133_v3, %v1093_v4  ;;  %v1095_v13 = vadd.f32 %v1094_v5, %v735_v1  ;;  %v3034_v1 = vld [vmem:[#allocation14 + $0xe8] ss:$16 sps:$4 sm:$0xff]   ;;  %v3042_v3 = vld [vmem:[#allocation14 + $0xcc] ss:$16 sps:$4 sm:$0xff]  }
 0x23e   :  { %v1096_v14 = vpop.f32.mrf.mxu0  ;;  %v1137_v15 = vpop.f32.mrf.mxu1  ;;  %v3040_v4 = vld [vmem:[#allocation14 + $0xc8] ss:$16 sps:$4 sm:$0xff]   ;;  %v3048_v5 = vld [vmem:[#allocation14 + $0xac] ss:$16 sps:$4 sm:$0xff]  }
 0x23f   :  { %v1136_v16 = vadd.f32 %v1135_v9, %v1095_v13  ;;  %v1140_v17 = vmax.f32 %v1134_v12, 0.0  ;;  %v3046_v9 = vld [vmem:[#allocation14 + $0xa8] ss:$16 sps:$4 sm:$0xff]   ;;  %v3054_v12 = vld [vmem:[#allocation14 + $0x8c] ss:$16 sps:$4 sm:$0xff]  }
 0x240   :  { %v1097_v18 = vpop.f32.mrf.mxu0  ;;  %v1138_v19 = vpop.f32.mrf.mxu1  ;;  %v3052_v13 = vld [vmem:[#allocation14 + $0x88] ss:$16 sps:$4 sm:$0xff]   ;;  %v3060_v14 = vld [vmem:[#allocation14 + $0x6c] ss:$16 sps:$4 sm:$0xff]  }
 0x241   :  { %v1141_v20 = vmax.f32 %v1136_v16, 0.0  ;;  %v1142_v22 = vpack.c.bf16 %v1140_v17, %v1140_v17  ;;  %v3058_v15 = vld [vmem:[#allocation14 + $0x68] ss:$16 sps:$4 sm:$0xff]   ;;  %v3066_v16 = vld [vmem:[#allocation14 + $0x4c] ss:$16 sps:$4 sm:$0xff]  }
 0x242   :  { %v3064_v17 = vld [vmem:[#allocation14 + $0x48] ss:$16 sps:$4 sm:$0xff]   ;;  %v3072_v18 = vld [vmem:[#allocation14 + $0x2c] ss:$16 sps:$4 sm:$0xff]  }
 0x243   :  { %v1143_v21 = vpack.c.bf16 %v1141_v20, %v1141_v20  ;;  %v3070_v19 = vld [vmem:[#allocation14 + $0x28] ss:$16 sps:$4 sm:$0xff]   ;;  %v3078_v20 = vld [vmem:[#allocation14 + $0xc] ss:$16 sps:$4 sm:$0xff]  }
 0x245   :  { %1311 = vmatprep.mubr.bf16.mxu0 %v1143_v21  ;;  %v3076_v21 = vld [vmem:[#allocation14 + $0x8] ss:$16 sps:$4 sm:$0xff]  }
 0x246   :  { %1312 = vmatmul.mubr.bf16.vlgmr.msra.gmra.mxu0 %v1142_v22  ;;  %v3084_v22 = vld [vmem:[#allocation14 + $0x1ec] ss:$16 sps:$4 sm:$0xff]  }
 0x247   :  { %1881 = vmatpush1.bf16.msra.mxu0 %v3031_v28  ;;  %v3102_v28 = vld [vmem:[#allocation14 + $0x18c] ss:$16 sps:$4 sm:$0xff]  }
 0x248   :  { %1882 = vmatprep.subr.bf16.mxu0 %v3039_v31  ;;  %v3106_v31 = vld [vmem:[#allocation14 + $0x168] ss:$16 sps:$4 sm:$0xff]  }
 0x24b   :  { %1883 = vmatpush1.bf16.msra.mxu0 %v3037_v32  ;;  %v3114_v32 = vld [vmem:[#allocation14 + $0x14c] ss:$16 sps:$4 sm:$0xff]  }
 0x24c   :  { %1884 = vmatprep.subr.bf16.mxu0 %v3045_v33  ;;  %v3112_v33 = vld [vmem:[#allocation14 + $0x148] ss:$16 sps:$4 sm:$0xff]  }
 0x24f   :  { %1885 = vmatpush1.bf16.msra.mxu0 %v3043_v34  ;;  %v3117_v34 = vld [vmem:[#allocation14 + $0x124] ss:$16 sps:$4 sm:$0xff]  }
 0x250   :  { %1886 = vmatprep.subr.bf16.mxu0 %v3051_v35  ;;  %v3120_v35 = vld [vmem:[#allocation14 + $0x12c] ss:$16 sps:$4 sm:$0xff]  }
 0x253   :  { %1887 = vmatpush1.bf16.msra.mxu0 %v3049_v36  ;;  %v3115_v36 = vld [vmem:[#allocation14 + $0x120] ss:$16 sps:$4 sm:$0xff]  }
 0x254   :  { %1888 = vmatprep.subr.bf16.mxu0 %v3057_v37  ;;  %v3118_v37 = vld [vmem:[#allocation14 + $0x128] ss:$16 sps:$4 sm:$0xff]  }
 0x257   :  { %1889 = vmatpush1.bf16.msra.mxu0 %v3055_v38  ;;  %v3123_v38 = vld [vmem:[#allocation14 + $0x104] ss:$16 sps:$4 sm:$0xff]  }
 0x258   :  { %1890 = vmatprep.subr.bf16.mxu0 %v3063_v39  ;;  %v3126_v39 = vld [vmem:[#allocation14 + $0x10c] ss:$16 sps:$4 sm:$0xff]  }
 0x25b   :  { %1891 = vmatpush1.bf16.msra.mxu0 %v3061_v40  ;;  %v3121_v40 = vld [vmem:[#allocation14 + $0x100] ss:$16 sps:$4 sm:$0xff]  }
 0x25c   :  { %1892 = vmatprep.subr.bf16.mxu0 %v3069_v41  ;;  %v3124_v41 = vld [vmem:[#allocation14 + $0x108] ss:$16 sps:$4 sm:$0xff]  }
 0x25f   :  { %1893 = vmatpush1.bf16.msra.mxu0 %v3067_v42  ;;  %v3129_v42 = vld [vmem:[#allocation16 + $0x74] ss:$8 sps:$4 sm:$0xff]  }
 0x260   :  { %1894 = vmatprep.subr.bf16.mxu0 %v3075_v43  ;;  %v3132_v43 = vld [vmem:[#allocation16 + $0x174] ss:$8 sps:$4 sm:$0xff]  }
 0x263   :  { %1895 = vmatpush1.bf16.msra.mxu0 %v3073_v44  ;;  %v1337_v44 = vld [vmem:[%s3619_s8] sm:$0x3] }
 0x264   :  { %1896 = vmatprep.subr.bf16.mxu0 %v3081_v45  ;;  %v1342_v45 = vrot.slane %v1337_v44, %v3571_v7 }
 0x267   :  { %1897 = vmatpush2.bf16.msra.mxu0 %v3079_v46  ;;  %v1346_v46 = vrot.slane %v1337_v44, %v3575_v10  ;;  %v3201_v44 = vld [vmem:[#allocation16 + $0xb4] ss:$8 sps:$4 sm:$0xff]  }
 0x268   :  { %1898 = vmatprep.subr.bf16.mxu0 %v3087_v47 }
 0x26b   :  { %1899 = vmatpush2.bf16.msra.mxu0 %v3085_v48 }
 0x26c   :  { %1900 = vmatprep.subr.bf16.mxu0 %v3093_v49 }
 0x26f   :  { %1901 = vmatpush2.bf16.msra.mxu0 %v3091_v50 }
 0x270   :  { %1902 = vmatprep.subr.bf16.mxu0 %v3099_v51 }
 0x273   :  { %1903 = vmatpush2.bf16.msra.mxu0 %v3097_v52 }
 0x274   :  { %1904 = vmatprep.subr.bf16.mxu0 %v3105_v53 }
 0x277   :  { %1905 = vmatpush2.bf16.msra.mxu0 %v3103_v54 }
 0x278   :  { %1906 = vmatprep.subr.bf16.mxu0 %v3111_v55 }
 0x27b   :  { %1907 = vmatpush2.bf16.msra.mxu0 %v3109_v56  ;;  %v3127_v56 = vld [vmem:[#allocation16 + $0x70] ss:$8 sps:$4 sm:$0xff]  }
 0x27c   :  { %1908 = vmatprep.subr.bf16.mxu0 %v3117_v34  ;;  %v3181_v34 = vld [vmem:[#allocation16 + $0xe0] ss:$8 sps:$4 sm:$0xff]  }
 0x27f   :  { %1909 = vmatpush2.bf16.msra.mxu0 %v3115_v36  ;;  %v3189_v36 = vld [vmem:[#allocation16 + $0xd4] ss:$8 sps:$4 sm:$0xff]  }
 0x280   :  { %1910 = vmatprep.subr.bf16.mxu0 %v3123_v38  ;;  %v3187_v38 = vld [vmem:[#allocation16 + $0xd0] ss:$8 sps:$4 sm:$0xff]  }
 0x283   :  { %1911 = vmatpush2.bf16.msra.mxu0 %v3121_v40  ;;  %v3195_v40 = vld [vmem:[#allocation16 + $0xc4] ss:$8 sps:$4 sm:$0xff]  }
 0x284   :  { %2366 = vmatprep.subr.bf16.mxu0 %v3129_v42  ;;  %v3193_v42 = vld [vmem:[#allocation16 + $0xc0] ss:$8 sps:$4 sm:$0xff]  }
 0x306   :  { %v2776_v57 = vpop.f32.mrf.mxu0 }
 0x308   :  { %v2777_v59 = vpop.f32.mrf.mxu0 }
 0x309   :  { %v2778_v60 = vadd.f32 %v2777_v59, %v2776_v57  ;;  %v3130_v57 = vld [vmem:[#allocation16 + $0x170] ss:$8 sps:$4 sm:$0xff]   ;;  %v3135_v59 = vld [vmem:[#allocation16 + $0x64] ss:$8 sps:$4 sm:$0xff]  }
 0x30a   :  { %v2779_v61 = vpop.f32.mrf.mxu0 }
 0x30b   :  { %v1314_v62 = vadd.f32 %v2778_v60, %v2599_v58  ;;  %v3138_v60 = vld [vmem:[#allocation16 + $0x164] ss:$8 sps:$4 sm:$0xff]   ;;  %v3133_v61 = vld [vmem:[#allocation16 + $0x60] ss:$8 sps:$4 sm:$0xff]  }
 0x30c   :  { %v2780_v63 = vpop.f32.mrf.mxu0 }
 0x30d   :  { %v1319_v0 = vmax.f32 %v1314_v62, 0.0  ;;  %v3136_v62 = vld [vmem:[#allocation16 + $0x160] ss:$8 sps:$4 sm:$0xff]   ;;  %v3141_v63 = vld [vmem:[#allocation16 + $0x54] ss:$8 sps:$4 sm:$0xff]  }
 0x30f   :  { %v1320_v2 = vpack.c.bf16 %v1319_v0, %v1319_v0  ;;  %v3144_v0 = vld [vmem:[#allocation16 + $0x154] ss:$8 sps:$4 sm:$0xff]  }
 0x311   :  { %1462 = vmatmul.mubr.bf16.vlgmr.msra.gmra.mxu1 %v1320_v2  ;;  %v3142_v2 = vld [vmem:[#allocation16 + $0x150] ss:$8 sps:$4 sm:$0xff]  }
 0x312   :  { %1922 = vmatpush1.bf16.msra.mxu1 %v3034_v1  ;;  %v3139_v1 = vld [vmem:[#allocation16 + $0x50] ss:$8 sps:$4 sm:$0xff]  }
 0x313   :  { %1923 = vmatprep.subr.bf16.mxu1 %v3042_v3  ;;  %v3147_v3 = vld [vmem:[#allocation16 + $0x44] ss:$8 sps:$4 sm:$0xff]  }
 0x316   :  { %1924 = vmatpush1.bf16.msra.mxu1 %v3040_v4  ;;  %v3150_v4 = vld [vmem:[#allocation16 + $0x144] ss:$8 sps:$4 sm:$0xff]  }
 0x317   :  { %1925 = vmatprep.subr.bf16.mxu1 %v3048_v5  ;;  %v3145_v5 = vld [vmem:[#allocation16 + $0x40] ss:$8 sps:$4 sm:$0xff]  }
 0x31a   :  { %1926 = vmatpush1.bf16.msra.mxu1 %v3046_v9  ;;  %v3148_v9 = vld [vmem:[#allocation16 + $0x140] ss:$8 sps:$4 sm:$0xff]  }
 0x31b   :  { %1927 = vmatprep.subr.bf16.mxu1 %v3054_v12  ;;  %v3153_v12 = vld [vmem:[#allocation16 + $0x34] ss:$8 sps:$4 sm:$0xff]  }
 0x31e   :  { %1928 = vmatpush1.bf16.msra.mxu1 %v3052_v13  ;;  %v3156_v13 = vld [vmem:[#allocation16 + $0x134] ss:$8 sps:$4 sm:$0xff]  }
 0x31f   :  { %1929 = vmatprep.subr.bf16.mxu1 %v3060_v14  ;;  %v3151_v14 = vld [vmem:[#allocation16 + $0x30] ss:$8 sps:$4 sm:$0xff]  }
 0x322   :  { %1930 = vmatpush1.bf16.msra.mxu1 %v3058_v15  ;;  %v3154_v15 = vld [vmem:[#allocation16 + $0x130] ss:$8 sps:$4 sm:$0xff]  }
 0x323   :  { %1931 = vmatprep.subr.bf16.mxu1 %v3066_v16  ;;  %v3159_v16 = vld [vmem:[#allocation16 + $0x24] ss:$8 sps:$4 sm:$0xff]  }
 0x326   :  { %1932 = vmatpush1.bf16.msra.mxu1 %v3064_v17  ;;  %v3162_v17 = vld [vmem:[#allocation16 + $0x124] ss:$8 sps:$4 sm:$0xff]  }
 0x327   :  { %1933 = vmatprep.subr.bf16.mxu1 %v3072_v18  ;;  %v3157_v18 = vld [vmem:[#allocation16 + $0x20] ss:$8 sps:$4 sm:$0xff]  }
 0x32a   :  { %1934 = vmatpush1.bf16.msra.mxu1 %v3070_v19  ;;  %v3160_v19 = vld [vmem:[#allocation16 + $0x120] ss:$8 sps:$4 sm:$0xff]  }
 0x32b   :  { %1935 = vmatprep.subr.bf16.mxu1 %v3078_v20  ;;  %v3165_v20 = vld [vmem:[#allocation16 + $0x14] ss:$8 sps:$4 sm:$0xff]  }
 0x32e   :  { %1936 = vmatpush1.bf16.msra.mxu1 %v3076_v21  ;;  %v3168_v21 = vld [vmem:[#allocation16 + $0x114] ss:$8 sps:$4 sm:$0xff]  }
 0x32f   :  { %1937 = vmatprep.subr.bf16.mxu1 %v3084_v22  ;;  %v3163_v22 = vld [vmem:[#allocation16 + $0x10] ss:$8 sps:$4 sm:$0xff]  }
 0x332   :  { %1938 = vmatpush2.bf16.msra.mxu1 %v3082_v23  ;;  %v3166_v23 = vld [vmem:[#allocation16 + $0x110] ss:$8 sps:$4 sm:$0xff]  }
 0x333   :  { %1939 = vmatprep.subr.bf16.mxu1 %v3090_v24  ;;  %v3171_v24 = vld [vmem:[#allocation16 + $0x4] ss:$8 sps:$4 sm:$0xff]  }
 0x336   :  { %1940 = vmatpush2.bf16.msra.mxu1 %v3088_v25  ;;  %v3174_v25 = vld [vmem:[#allocation16 + $0x104] ss:$8 sps:$4 sm:$0xff]  }
 0x337   :  { %1941 = vmatprep.subr.bf16.mxu1 %v3096_v26  ;;  %v3169_v26 = vld [vmem:[#allocation16] ss:$8 sps:$4 sm:$0xff]  }
 0x33a   :  { %1942 = vmatpush2.bf16.msra.mxu1 %v3094_v27  ;;  %v3172_v27 = vld [vmem:[#allocation16 + $0x100] ss:$8 sps:$4 sm:$0xff]  }
 0x33b   :  { %1943 = vmatprep.subr.bf16.mxu1 %v3102_v28  ;;  %v3177_v28 = vld [vmem:[#allocation16 + $0xf4] ss:$8 sps:$4 sm:$0xff]  }
 0x33e   :  { %1944 = vmatpush2.bf16.msra.mxu1 %v3100_v29  ;;  %v3180_v29 = vld [vmem:[#allocation16 + $0x1f4] ss:$8 sps:$4 sm:$0xff]  }
 0x33f   :  { %1945 = vmatprep.subr.bf16.mxu1 %v3108_v30  ;;  %v3175_v30 = vld [vmem:[#allocation16 + $0xf0] ss:$8 sps:$4 sm:$0xff]  }
 0x342   :  { %1946 = vmatpush2.bf16.msra.mxu1 %v3106_v31  ;;  %v3178_v31 = vld [vmem:[#allocation16 + $0x1f0] ss:$8 sps:$4 sm:$0xff]  }
 0x343   :  { %1947 = vmatprep.subr.bf16.mxu1 %v3114_v32  ;;  %v3183_v32 = vld [vmem:[#allocation16 + $0xe4] ss:$8 sps:$4 sm:$0xff]  }
 0x346   :  { %1948 = vmatpush2.bf16.msra.mxu1 %v3112_v33  ;;  %v3186_v33 = vld [vmem:[#allocation16 + $0x1e4] ss:$8 sps:$4 sm:$0xff]  }
 0x347   :  { %1949 = vmatprep.subr.bf16.mxu1 %v3120_v35  ;;  %v3184_v35 = vld [vmem:[#allocation16 + $0x1e0] ss:$8 sps:$4 sm:$0xff]  }
 0x34a   :  { %1950 = vmatpush2.bf16.msra.mxu1 %v3118_v37  ;;  %v3192_v37 = vld [vmem:[#allocation16 + $0x1d4] ss:$8 sps:$4 sm:$0xff]  }
 0x34b   :  { %1951 = vmatprep.subr.bf16.mxu1 %v3126_v39  ;;  %v3190_v39 = vld [vmem:[#allocation16 + $0x1d0] ss:$8 sps:$4 sm:$0xff]  }
 0x34e   :  { %1952 = vmatpush2.bf16.msra.mxu1 %v3124_v41  ;;  %v3198_v41 = vld [vmem:[#allocation16 + $0x1c4] ss:$8 sps:$4 sm:$0xff]  }
 0x34f   :  { %2407 = vmatprep.subr.bf16.mxu1 %v3132_v43  ;;  %v3196_v43 = vld [vmem:[#allocation16 + $0x1c0] ss:$8 sps:$4 sm:$0xff]  }
 0x3d1   :  { %v1463_v47 = vpop.f32.mrf.mxu1 }
 0x3d2   :  { %v1464_v48 = vadd.f32 %v1463_v47, %v1342_v45  ;;  %v3204_v45 = vld [vmem:[#allocation16 + $0x1b4] ss:$8 sps:$4 sm:$0xff]   ;;  %v3202_v47 = vld [vmem:[#allocation16 + $0x1b0] ss:$8 sps:$4 sm:$0xff]  }
 0x3d3   :  { %v1465_v49 = vpop.f32.mrf.mxu1 }
 0x3d4   :  { %v1466_v50 = vadd.f32 %v1465_v49, %v1346_v46  ;;  %v1470_v51 = vmax.f32 %v1464_v48, 0.0  ;;  %v3199_v46 = vld [vmem:[#allocation16 + $0xb0] ss:$8 sps:$4 sm:$0xff]   ;;  %v3207_v48 = vld [vmem:[#allocation16 + $0xa4] ss:$8 sps:$4 sm:$0xff]  }
 0x3d5   :  { %v1467_v52 = vpop.f32.mrf.mxu1  ;;  %v3210_v49 = vld [vmem:[#allocation16 + $0x1a4] ss:$8 sps:$4 sm:$0xff]  }
 0x3d6   :  { %v1471_v53 = vmax.f32 %v1466_v50, 0.0  ;;  %v1472_v58 = vpack.c.bf16 %v1470_v51, %v1470_v51  ;;  %v3205_v50 = vld [vmem:[#allocation16 + $0xa0] ss:$8 sps:$4 sm:$0xff]   ;;  %v3213_v52 = vld [vmem:[#allocation16 + $0x94] ss:$8 sps:$4 sm:$0xff]  }
 0x3d7   :  { %v1468_v54 = vpop.f32.mrf.mxu1  ;;  %v3208_v51 = vld [vmem:[#allocation16 + $0x1a0] ss:$8 sps:$4 sm:$0xff]  }
 0x3d8   :  { %v1473_v55 = vpack.c.bf16 %v1471_v53, %v1471_v53  ;;  %v3216_v53 = vld [vmem:[#allocation16 + $0x194] ss:$8 sps:$4 sm:$0xff]   ;;  %v3211_v54 = vld [vmem:[#allocation16 + $0x90] ss:$8 sps:$4 sm:$0xff]  }
 0x3da   :  { %1912 = vmatprep.mubr.bf16.mxu0 %v1473_v55  ;;  %1953 = vmatprep.mubr.bf16.mxu1 %v1473_v55  ;;  %v3214_v55 = vld [vmem:[#allocation16 + $0x190] ss:$8 sps:$4 sm:$0xff]  }
 0x3db   :  { %1913 = vmatmul.mubr.bf16.vlgmr.msra.gmra.mxu0 %v1472_v58  ;;  %1954 = vmatmul.mubr.bf16.vlgmr.msra.gmra.mxu1 %v1472_v58  ;;  %v3217_v58 = vld [vmem:[#allocation16 + $0x80] ss:$8 sps:$4 sm:$0xff]  }
 0x3dc   :  { %2367 = vmatpush1.bf16.msra.mxu0 %v3127_v56  ;;  %2408 = vmatpush1.bf16.msra.mxu1 %v3130_v57  ;;  %v3219_v56 = vld [vmem:[#allocation16 + $0x84] ss:$8 sps:$4 sm:$0xff]  }
 0x3dd   :  { %2368 = vmatprep.subr.bf16.mxu0 %v3135_v59  ;;  %2409 = vmatprep.subr.bf16.mxu1 %v3138_v60  ;;  %v3222_v57 = vld [vmem:[#allocation16 + $0x184] ss:$8 sps:$4 sm:$0xff]   ;;  %v3220_v59 = vld [vmem:[#allocation16 + $0x180] ss:$8 sps:$4 sm:$0xff]  }
 0x3de   :  { %v1538_v60 = vld [vmem:[%s3621_s10] sm:$0xf] }
 0x3e0   :  { %2369 = vmatpush1.bf16.msra.mxu0 %v3133_v61  ;;  %2410 = vmatpush1.bf16.msra.mxu1 %v3136_v62  ;;  %v1543_v61 = vrot.slane %v1538_v60, %v3571_v7  ;;  %v1551_v62 = vrot.slane %v1538_v60, %v242_v8 }
 0x3e1   :  { %2370 = vmatprep.subr.bf16.mxu0 %v3141_v63  ;;  %2411 = vmatprep.subr.bf16.mxu1 %v3144_v0  ;;  %v1547_v63 = vrot.slane %v1538_v60, %v3575_v10  ;;  %v1555_v0 = vrot.slane %v1538_v60, %v246_v11 }
 0x3e4   :  { %2371 = vmatpush1.bf16.msra.mxu0 %v3139_v1  ;;  %2412 = vmatpush1.bf16.msra.mxu1 %v3142_v2 }
 0x3e5   :  { %2372 = vmatprep.subr.bf16.mxu0 %v3147_v3  ;;  %2413 = vmatprep.subr.bf16.mxu1 %v3150_v4 }
 0x3e8   :  { %2373 = vmatpush1.bf16.msra.mxu0 %v3145_v5  ;;  %2414 = vmatpush1.bf16.msra.mxu1 %v3148_v9 }
 0x3e9   :  { %2374 = vmatprep.subr.bf16.mxu0 %v3153_v12  ;;  %2415 = vmatprep.subr.bf16.mxu1 %v3156_v13 }
 0x3ec   :  { %2375 = vmatpush1.bf16.msra.mxu0 %v3151_v14  ;;  %2416 = vmatpush1.bf16.msra.mxu1 %v3154_v15 }
 0x3ed   :  { %2376 = vmatprep.subr.bf16.mxu0 %v3159_v16  ;;  %2417 = vmatprep.subr.bf16.mxu1 %v3162_v17 }
 0x3f0   :  { %2377 = vmatpush1.bf16.msra.mxu0 %v3157_v18  ;;  %2418 = vmatpush1.bf16.msra.mxu1 %v3160_v19 }
 0x3f1   :  { %2378 = vmatprep.subr.bf16.mxu0 %v3165_v20  ;;  %2419 = vmatprep.subr.bf16.mxu1 %v3168_v21 }
 0x3f4   :  { %2379 = vmatpush1.bf16.msra.mxu0 %v3163_v22  ;;  %2420 = vmatpush1.bf16.msra.mxu1 %v3166_v23  ;;  %v2034_v23 = vld [vmem:[%s3623_s12] sm:$0x3]  ;;  %s2458_s12 = sshll.u32 %s3455_s22, 4  ;;  %s2459_s12 = int_to_ptr.vmem [resolvable:$true] %s2458_s12 }
 0x3f5   :  { %2380 = vmatprep.subr.bf16.mxu0 %v3171_v24  ;;  %2421 = vmatprep.subr.bf16.mxu1 %v3174_v25  ;;  %v2039_v24 = vrot.slane %v2034_v23, %v3571_v7  ;;  %v2043_v25 = vrot.slane %v2034_v23, %v3575_v10  ;;  %s3407_s23 = scalar_lea.vmem %s2459_s12, 256  ;;  %p3412_p4 = scmp.lt.s32.totalorder %s2459_s12, %s2459_s12 }
 0x3f6   :  { %p3408_p3 = scmp.ne.s32.totalorder %s2459_s12, %s3407_s23  ;;  %p3413_p5 = scmp.lt.s32.totalorder %s3407_s23, %s3407_s23 }
 0x3f8   :  { %2381 = vmatpush1.bf16.msra.mxu0 %v3169_v26  ;;  %2422 = vmatpush1.bf16.msra.mxu1 %v3172_v27  ;;  %p3414_p6 = por %p3413_p5, %p3412_p4 }
 0x3f9   :  { %2382 = vmatprep.subr.bf16.mxu0 %v3177_v28  ;;  %2423 = vmatprep.subr.bf16.mxu1 %v3180_v29 }
 0x3fa   :  { %p3415_p7 = pnand %p3414_p6, %p3408_p3 }
 0x3fc   :  { %2383 = vmatpush2.bf16.msra.mxu0 %v3175_v30  ;;  %2424 = vmatpush2.bf16.msra.mxu1 %v3178_v31 }
 0x3fd   :  { %2384 = vmatprep.subr.bf16.mxu0 %v3183_v32  ;;  %2425 = vmatprep.subr.bf16.mxu1 %v3186_v33 }
 0x400   :  { %2385 = vmatpush2.bf16.msra.mxu0 %v3181_v34  ;;  %2426 = vmatpush2.bf16.msra.mxu1 %v3184_v35 }
 0x401   :  { %2386 = vmatprep.subr.bf16.mxu0 %v3189_v36  ;;  %2427 = vmatprep.subr.bf16.mxu1 %v3192_v37 }
 0x404   :  { %2387 = vmatpush2.bf16.msra.mxu0 %v3187_v38  ;;  %2428 = vmatpush2.bf16.msra.mxu1 %v3190_v39 }
 0x405   :  { %2388 = vmatprep.subr.bf16.mxu0 %v3195_v40  ;;  %2429 = vmatprep.subr.bf16.mxu1 %v3198_v41 }
 0x408   :  { %2389 = vmatpush2.bf16.msra.mxu0 %v3193_v42  ;;  %2430 = vmatpush2.bf16.msra.mxu1 %v3196_v43 }
 0x409   :  { %2390 = vmatprep.subr.bf16.mxu0 %v3201_v44  ;;  %2431 = vmatprep.subr.bf16.mxu1 %v3204_v45 }
 0x40c   :  { %2391 = vmatpush2.bf16.msra.mxu0 %v3199_v46  ;;  %2432 = vmatpush2.bf16.msra.mxu1 %v3202_v47 }
 0x40d   :  { %2392 = vmatprep.subr.bf16.mxu0 %v3207_v48  ;;  %2433 = vmatprep.subr.bf16.mxu1 %v3210_v49 }
 0x410   :  { %2393 = vmatpush2.bf16.msra.mxu0 %v3205_v50  ;;  %2434 = vmatpush2.bf16.msra.mxu1 %v3208_v51 }
 0x411   :  { %2394 = vmatprep.subr.bf16.mxu0 %v3213_v52  ;;  %2435 = vmatprep.subr.bf16.mxu1 %v3216_v53 }
 0x414   :  { %2395 = vmatpush2.bf16.msra.mxu0 %v3211_v54  ;;  %2436 = vmatpush2.bf16.msra.mxu1 %v3214_v55 }
 0x415   :  { %2396 = vmatprep.subr.bf16.mxu0 %v3219_v56  ;;  %2437 = vmatprep.subr.bf16.mxu1 %v3222_v57 }
 0x418   :  { %2397 = vmatpush2.bf16.msra.mxu0 %v3217_v58  ;;  %2438 = vmatpush2.bf16.msra.mxu1 %v3220_v59 }
 0x49b   :  { %v1914_v1 = vpop.f32.mrf.mxu0  ;;  %v1955_v2 = vpop.f32.mrf.mxu1 }
 0x49c   :  { %v1915_v3 = vadd.f32 %v1914_v1, %v1543_v61  ;;  %v1956_v4 = vadd.f32 %v1955_v2, %v1551_v62 }
 0x49d   :  { %v1916_v5 = vpop.f32.mrf.mxu0  ;;  %v1957_v9 = vpop.f32.mrf.mxu1 }
 0x49e   :  { %v1917_v12 = vadd.f32 %v1916_v5, %v1547_v63  ;;  %v1958_v13 = vadd.f32 %v1957_v9, %v1555_v0  ;;  %v1962_v14 = vmax.f32 %v1915_v3, 0.0  ;;  %v1964_v15 = vmax.f32 %v1956_v4, 0.0 }
 0x49f   :  { %v1918_v16 = vpop.f32.mrf.mxu0  ;;  %v1959_v17 = vpop.f32.mrf.mxu1 }
 0x4a0   :  { %v1963_v18 = vmax.f32 %v1917_v12, 0.0  ;;  %v1965_v19 = vmax.f32 %v1958_v13, 0.0  ;;  %v1966_v6 = vpack.c.bf16 %v1962_v14, %v1962_v14  ;;  %v1968_v11 = vpack.c.bf16 %v1964_v15, %v1964_v15 }
 0x4a1   :  { %v1919_v8 = vpop.f32.mrf.mxu0  ;;  %v1960_v20 = vpop.f32.mrf.mxu1 }
 0x4a2   :  { %v1967_v21 = vpack.c.bf16 %v1963_v18, %v1963_v18  ;;  %v1969_v22 = vpack.c.bf16 %v1965_v19, %v1965_v19 }
 0x4a4   :  { %2398 = vmatprep.mubr.bf16.mxu0 %v1967_v21  ;;  %2439 = vmatprep.mubr.bf16.mxu1 %v1969_v22 }
 0x4a5   :  { %2399 = vmatmul.mubr.bf16.vlgmr.msra.gmra.mxu0 %v1966_v6  ;;  %2440 = vmatmul.mubr.bf16.vlgmr.msra.gmra.mxu1 %v1968_v11 }
 0x565   :  { %v2400_v26 = vpop.f32.mrf.mxu0  ;;  %v2441_v27 = vpop.f32.mrf.mxu1 }
 0x566   :  { %v2401_v28 = vadd.f32 %v2400_v26, %v2039_v24 }
 0x567   :  { %v2402_v29 = vpop.f32.mrf.mxu0  ;;  %v2443_v30 = vpop.f32.mrf.mxu1 }
 0x568   :  { %v2442_v31 = vadd.f32 %v2441_v27, %v2401_v28  ;;  %v2403_v32 = vadd.f32 %v2402_v29, %v2043_v25 }
 0x569   :  { %v2404_v33 = vpop.f32.mrf.mxu0  ;;  %v2445_v34 = vpop.f32.mrf.mxu1 }
 0x56a   :  { %3223 = vtanh.f32 %v2442_v31  ;;  %v2444_v35 = vadd.f32 %v2443_v30, %v2403_v32 }
 0x56b   :  { %v2405_v36 = vpop.f32.mrf.mxu0  ;;  %v2446_v37 = vpop.f32.mrf.mxu1 }
 0x56c   :  { %3225 = vtanh.f32 %v2444_v35 }
 0x577   :  { %v3224_v38 = vpop.eup %3223 }
 0x578   :  { %2450 = vst [vmem:[#allocation17] sm:$0xff] %v3224_v38 }
 0x579   :  { %v3226_v7 = vpop.eup %3225 }
 0x57a   :  { %2451 = vst [vmem:[#allocation17 + $0x8] sm:$0xff] %v3226_v7 }
 0x57b   :  { %3418 = shalt.err (!%p3415_p7)
}
 0x57c   :  { %2461 = dma.vmem_to_hbm [thread:$0]  %s2459_s12, 256, %s3624_s13, [#allocation4]  }
 0x57d   :  { %3437 = dma.done.wait [#allocation4], 256  }
 0x57e   :  { %3438 = vsyncadd [#allocation4], 4294967040 }
 0x57f   :  { %2465 = vsyncpa [#allocation3], 1 }
 0x580   :  { %2466 = vsyncpa [#allocation6], 1 }
 0x581   :  { %2467 = vsyncpa [#allocation9], 1 }
 0x582   :  { %2468 = vsyncpa [#allocation12], 1 }
 0x583   :  { %2469 = vsyncpa [#allocation15], 1 }
 0x584   :  { %2470 = vsyncpa [#allocation4], 1 }

// kernel: tpu_custom_call.1
= control target key start
LH: loop header
LB: loop body
LE: loop exit
PB: predicated region body
PF: predicated region fallthrough
CT: control target
= control target key end

     0   :  { %18 = vsyncpa [#allocation3], 0  ;;  %s3611_s0 = inlined_call_operand.hbm [shape: f32[8,256], index: 0, kind: input, shape index: {}]   ;;  %s3612_s1 = inlined_call_operand.hbm [shape: bf16[256,512], index: 1, kind: input, shape index: {}]   ;;  %s3613_s2 = inlined_call_operand.hbm [shape: f32[1,512], index: 2, kind: input, shape index: {}]   ;;  %s3614_s3 = inlined_call_operand.hbm [shape: bf16[512,256], index: 3, kind: input, shape index: {}]   ;;  %s3615_s4 = inlined_call_operand.vmem [shape: f32[1,256], index: 4, kind: input, shape index: {}]   ;;  %s3616_s5 = inlined_call_operand.hbm [shape: bf16[256,128], index: 5, kind: input, shape index: {}]   ;;  %s3617_s6 = inlined_call_operand.hbm [shape: f32[1,128], index: 6, kind: input, shape index: {}]   ;;  %s3618_s7 = inlined_call_operand.hbm [shape: bf16[128,256], index: 7, kind: input, shape index: {}]   ;;  %s3619_s8 = inlined_call_operand.vmem [shape: f32[1,256], index: 8, kind: input, shape index: {}]   ;;  %s3620_s9 = inlined_call_operand.hbm [shape: bf16[256,512], index: 9, kind: input, shape index: {}]   ;;  %s3621_s10 = inlined_call_operand.vmem [shape: f32[1,512], index: 10, kind: input, shape index: {}]   ;;  %s3622_s11 = inlined_call_operand.hbm [shape: bf16[512,256], index: 11, kind: input, shape index: {}]   ;;  %s3623_s12 = inlined_call_operand.vmem [shape: f32[1,256], index: 12, kind: input, shape index: {}]   ;;  %s3624_s13 = inlined_call_operand.hbm [shape: f32[8,256], index: 13, kind: output, shape index: {}]  }
   0x1   :  { %19 = vsyncpa [#allocation6], 0 }
   0x2   :  { %20 = vsyncpa [#allocation9], 0 }
   0x3   :  { %21 = vsyncpa [#allocation12], 0 }
   0x4   :  { %22 = vsyncpa [#allocation15], 0 }
   0x5   :  { %23 = vsyncpa [#allocation4], 0  ;;  %s3439_s25 = smov [#allocation5]  }
   0x6   :  { %s39_s26 = sshll.u32 %s3439_s25, 4  ;;  %s40_s26 = int_to_ptr.vmem [resolvable:$true] %s39_s26 }
   0x7   :  { %s3235_s27 = scalar_lea.vmem %s40_s26, 8192  ;;  %p3240_p1 = scmp.lt.s32.totalorder %s40_s26, %s40_s26 }
   0x8   :  { %p3236_p0 = scmp.ne.s32.totalorder %s40_s26, %s3235_s27  ;;  %p3241_p2 = scmp.lt.s32.totalorder %s3235_s27, %s3235_s27 }
   0xa   :  { %p3242_p3 = por %p3241_p2, %p3240_p1 }
   0xc   :  { %p3243_p4 = pnand %p3242_p3, %p3236_p0 }
   0xe   :  { %3246 = shalt.err (!%p3243_p4)
}
   0xf   :  { %s3440_s28 = smov 256   ;;  %s3441_s29 = smov 16  }
  0x10   :  { %45 = dma.hbm_to_vmem [thread:$0]  %s3612_s1, 8192, %s40_s26, [#allocation6], %s3440_s28, %s3440_s28, %s3441_s29  }
  0x11   :  { %s3442_s15 = smov [#allocation8]  }
  0x12   :  { %s61_s16 = sshll.u32 %s3442_s15, 4  ;;  %s62_s16 = int_to_ptr.vmem [resolvable:$true] %s61_s16 }
  0x13   :  { %s3255_s17 = scalar_lea.vmem %s62_s16, 8192  ;;  %p3260_p6 = scmp.lt.s32.totalorder %s62_s16, %s62_s16 }
  0x14   :  { %p3256_p5 = scmp.ne.s32.totalorder %s62_s16, %s3255_s17  ;;  %p3261_p7 = scmp.lt.s32.totalorder %s3255_s17, %s3255_s17 }
  0x16   :  { %p3262_p8 = por %p3261_p7, %p3260_p6 }
  0x18   :  { %p3263_p9 = pnand %p3262_p8, %p3256_p5 }
  0x1a   :  { %3266 = shalt.err (!%p3263_p9)
}
  0x1b   :  { %s3443_s18 = smov 128   ;;  %s3444_s19 = smov 8  }
  0x1c   :  { %67 = dma.hbm_to_vmem [thread:$0]  %s3614_s3, 8192, %s62_s16, [#allocation9], %s3443_s18, %s3443_s18, %s3444_s19  }
  0x1d   :  { %s3445_s1 = smov [#allocation11]   ;;  %s3446_s23 = smov [#allocation14]  }
  0x1e   :  { %s88_s22 = sshll.u32 %s3445_s1, 4  ;;  %s111_s24 = sshll.u32 %s3446_s23, 4  ;;  %s89_s22 = int_to_ptr.vmem [resolvable:$true] %s88_s22  ;;  %s112_s24 = int_to_ptr.vmem [resolvable:$true] %s111_s24 }
  0x1f   :  { %s3275_s25 = scalar_lea.vmem %s89_s22, 16  ;;  %s3279_s26 = scalar_lea.vmem %s89_s22, 32 }
  0x20   :  { %p3276_p10 = scmp.ne.s32.totalorder %s89_s22, %s3275_s25  ;;  %p3280_p11 = scmp.lt.s32.totalorder %s89_s22, %s89_s22 }
  0x21   :  { %p3281_p12 = scmp.lt.s32.totalorder %s3279_s26, %s3275_s25 }
  0x23   :  { %p3282_p13 = por %p3281_p12, %p3280_p11 }
  0x25   :  { %p3283_p0 = pnand %p3282_p13, %p3276_p10 }
  0x27   :  { %3286 = shalt.err (!%p3283_p0)
}
  0x28   :  { %91 = dma.hbm_to_vmem [thread:$0]  %s3617_s6, 16, %s89_s22, [#allocation12]  }
  0x29   :  { %s3295_s14 = scalar_lea.vmem %s112_s24, 8192  ;;  %p3300_p2 = scmp.lt.s32.totalorder %s112_s24, %s112_s24 }
  0x2a   :  { %p3296_p1 = scmp.ne.s32.totalorder %s112_s24, %s3295_s14  ;;  %p3301_p3 = scmp.lt.s32.totalorder %s3295_s14, %s3295_s14 }
  0x2c   :  { %p3302_p4 = por %p3301_p3, %p3300_p2 }
  0x2e   :  { %p3303_p5 = pnand %p3302_p4, %p3296_p1 }
  0x30   :  { %3306 = shalt.err (!%p3303_p5)
}
  0x31   :  { %117 = dma.hbm_to_vmem [thread:$0]  %s3620_s9, 8192, %s112_s24, [#allocation15], %s3440_s28, %s3440_s28, %s3441_s29  }
  0x32   :  { %s3447_s16 = smov [#allocation2]   ;;  %s3448_s20 = smov [#allocation7]  }
  0x33   :  { %s30_s17 = sshll.u32 %s3447_s16, 4  ;;  %s52_s21 = sshll.u32 %s3448_s20, 4  ;;  %s31_s17 = int_to_ptr.vmem [resolvable:$true] %s30_s17  ;;  %s53_s21 = int_to_ptr.vmem [resolvable:$true] %s52_s21 }
  0x34   :  { %s3315_s6 = scalar_lea.vmem %s31_s17, 256  ;;  %p3320_p7 = scmp.lt.s32.totalorder %s31_s17, %s31_s17 }
  0x35   :  { %p3316_p6 = scmp.ne.s32.totalorder %s31_s17, %s3315_s6  ;;  %p3321_p8 = scmp.lt.s32.totalorder %s3315_s6, %s3315_s6 }
  0x37   :  { %p3322_p9 = por %p3321_p8, %p3320_p7 }
  0x39   :  { %p3323_p10 = pnand %p3322_p9, %p3316_p6 }
  0x3b   :  { %3326 = shalt.err (!%p3323_p10)
}
  0x3c   :  { %33 = dma.hbm_to_vmem [thread:$0]  %s3611_s0, 256, %s31_s17, [#allocation3]  }
  0x3d   :  { %s3335_s23 = scalar_lea.vmem %s53_s21, 64  ;;  %p3340_p12 = scmp.lt.s32.totalorder %s53_s21, %s53_s21 }
  0x3e   :  { %p3336_p11 = scmp.ne.s32.totalorder %s53_s21, %s3335_s23  ;;  %p3341_p13 = scmp.lt.s32.totalorder %s3335_s23, %s3335_s23 }
  0x40   :  { %p3342_p0 = por %p3341_p13, %p3340_p12 }
  0x42   :  { %p3343_p1 = pnand %p3342_p0, %p3336_p11 }
  0x44   :  { %3346 = shalt.err (!%p3343_p1)
}
  0x45   :  { %55 = dma.hbm_to_vmem [thread:$0]  %s3613_s2, 64, %s53_s21, [#allocation6]  }
  0x46   :  { %s3449_s29 = smov [#allocation10]  }
  0x47   :  { %s75_s24 = sshll.u32 %s3449_s29, 4  ;;  %s76_s24 = int_to_ptr.vmem [resolvable:$true] %s75_s24 }
  0x48   :  { %s3355_s25 = scalar_lea.vmem %s76_s24, 2048  ;;  %p3360_p3 = scmp.lt.s32.totalorder %s76_s24, %s76_s24 }
  0x49   :  { %p3356_p2 = scmp.ne.s32.totalorder %s76_s24, %s3355_s25  ;;  %p3361_p4 = scmp.lt.s32.totalorder %s3355_s25, %s3355_s25 }
  0x4b   :  { %p3362_p5 = por %p3361_p4, %p3360_p3 }
  0x4d   :  { %p3363_p6 = pnand %p3362_p5, %p3356_p2 }
  0x4f   :  { %3366 = shalt.err (!%p3363_p6)
}
  0x50   :  { %s3450_s0 = smov 64   ;;  %s3451_s26 = smov 4  }
  0x51   :  { %81 = dma.hbm_to_vmem [thread:$0]  %s3616_s5, 2048, %s76_s24, [#allocation9], %s3450_s0, %s3450_s0, %s3451_s26  }
  0x52   :  { %s3452_s14 = smov [#allocation13]   ;;  %s3453_s2 = smov [#allocation16]  }
  0x53   :  { %s97_s3 = sshll.u32 %s3452_s14, 4  ;;  %s125_s15 = sshll.u32 %s3453_s2, 4  ;;  %s98_s3 = int_to_ptr.vmem [resolvable:$true] %s97_s3  ;;  %s126_s15 = int_to_ptr.vmem [resolvable:$true] %s125_s15 }
  0x54   :  { %s3375_s16 = scalar_lea.vmem %s98_s3, 2048  ;;  %p3380_p8 = scmp.lt.s32.totalorder %s98_s3, %s98_s3 }
  0x55   :  { %p3376_p7 = scmp.ne.s32.totalorder %s98_s3, %s3375_s16  ;;  %p3381_p9 = scmp.lt.s32.totalorder %s3375_s16, %s3375_s16 }
  0x57   :  { %p3382_p10 = por %p3381_p9, %p3380_p8 }
  0x59   :  { %p3383_p11 = pnand %p3382_p10, %p3376_p7 }
  0x5b   :  { %3386 = shalt.err (!%p3383_p11)
}
  0x5c   :  { %103 = dma.hbm_to_vmem [thread:$0]  %s3618_s7, 2048, %s98_s3, [#allocation12], %s3443_s18, %s3443_s18, %s3444_s19  }
  0x5d   :  { %s3395_s5 = scalar_lea.vmem %s126_s15, 8192  ;;  %p3400_p13 = scmp.lt.s32.totalorder %s126_s15, %s126_s15 }
  0x5e   :  { %p3396_p12 = scmp.ne.s32.totalorder %s126_s15, %s3395_s5  ;;  %p3401_p0 = scmp.lt.s32.totalorder %s3395_s5, %s3395_s5 }
  0x60   :  { %p3402_p1 = por %p3401_p0, %p3400_p13 }
  0x62   :  { %p3403_p2 = pnand %p3402_p1, %p3396_p12 }
  0x64   :  { %3406 = shalt.err (!%p3403_p2)
}
  0x65   :  { %131 = dma.hbm_to_vmem [thread:$0]  %s3622_s11, 8192, %s126_s15, [#allocation15], %s3443_s18, %s3443_s18, %s3444_s19  }
  0x66   :  { %3427 = dma.done.wait [#allocation3], 256  }
  0x67   :  { %3428 = vsyncadd [#allocation3], 4294967040 }
  0x68   :  { %3429 = dma.done.wait [#allocation6], 8256  }
  0x69   :  { %3430 = vsyncadd [#allocation6], 4294959040 }
  0x6a   :  { %3431 = dma.done.wait [#allocation9], 10240  }
  0x6b   :  { %3432 = vsyncadd [#allocation9], 4294957056 }
  0x6c   :  { %3433 = dma.done.wait [#allocation12], 2064  }
  0x6d   :  { %3434 = vsyncadd [#allocation12], 4294965232 }
  0x6e   :  { %3435 = dma.done.wait [#allocation15], 16384  }
  0x6f   :  { %3436 = vsyncadd [#allocation15], 4294950912  ;;  %v2799_v0 = vld [vmem:[#allocation5 + $0xe4] ss:$16 sps:$4 sm:$0xff]   ;;  %v2801_v1 = vld [vmem:[#allocation5 + $0xec] ss:$16 sps:$4 sm:$0xff]  }
  0x70   :  { %572 = vmatprep.subr.bf16.mxu0 %v2799_v0  ;;  %v2803_v2 = vld [vmem:[#allocation5 + $0xe0] ss:$16 sps:$4 sm:$0xff]   ;;  %v2804_v3 = vld [vmem:[#allocation5 + $0xe8] ss:$16 sps:$4 sm:$0xff]   ;;  %613 = vmatprep.subr.bf16.mxu1 %v2801_v1  ;;  %v2805_v4 = vld [vmem:[#allocation5 + $0xc4] ss:$16 sps:$4 sm:$0xff]  }
  0x71   :  { %573 = vmatpush1.bf16.msra.mxu0 %v2803_v2  ;;  %614 = vmatpush1.bf16.msra.mxu1 %v2804_v3  ;;  %v2807_v5 = vld [vmem:[#allocation5 + $0xcc] ss:$16 sps:$4 sm:$0xff]   ;;  %v2809_v6 = vld [vmem:[#allocation5 + $0xc0] ss:$16 sps:$4 sm:$0xff]   ;;  %v2810_v7 = vld [vmem:[#allocation5 + $0xc8] ss:$16 sps:$4 sm:$0xff]  }
  0x72   :  { %574 = vmatprep.subr.bf16.mxu0 %v2805_v4  ;;  %615 = vmatprep.subr.bf16.mxu1 %v2807_v5  ;;  %v2811_v8 = vld [vmem:[#allocation5 + $0xa4] ss:$16 sps:$4 sm:$0xff]   ;;  %v2813_v9 = vld [vmem:[#allocation5 + $0xac] ss:$16 sps:$4 sm:$0xff]   ;;  %v2815_v10 = vld [vmem:[#allocation5 + $0xa0] ss:$16 sps:$4 sm:$0xff]  }
  0x73   :  { %v2816_v11 = vld [vmem:[#allocation5 + $0xa8] ss:$16 sps:$4 sm:$0xff]   ;;  %v2817_v12 = vld [vmem:[#allocation5 + $0x84] ss:$16 sps:$4 sm:$0xff]   ;;  %v2819_v13 = vld [vmem:[#allocation5 + $0x8c] ss:$16 sps:$4 sm:$0xff]  }
  0x74   :  { %v2821_v14 = vld [vmem:[#allocation5 + $0x80] ss:$16 sps:$4 sm:$0xff]   ;;  %v2822_v15 = vld [vmem:[#allocation5 + $0x88] ss:$16 sps:$4 sm:$0xff]   ;;  %v2823_v16 = vld [vmem:[#allocation5 + $0x64] ss:$16 sps:$4 sm:$0xff]  }
  0x75   :  { %575 = vmatpush1.bf16.msra.mxu0 %v2809_v6  ;;  %616 = vmatpush1.bf16.msra.mxu1 %v2810_v7  ;;  %v2825_v17 = vld [vmem:[#allocation5 + $0x6c] ss:$16 sps:$4 sm:$0xff]   ;;  %v2827_v18 = vld [vmem:[#allocation5 + $0x60] ss:$16 sps:$4 sm:$0xff]   ;;  %v2828_v19 = vld [vmem:[#allocation5 + $0x68] ss:$16 sps:$4 sm:$0xff]  }
  0x76   :  { %576 = vmatprep.subr.bf16.mxu0 %v2811_v8  ;;  %617 = vmatprep.subr.bf16.mxu1 %v2813_v9  ;;  %v2829_v20 = vld [vmem:[#allocation5 + $0x44] ss:$16 sps:$4 sm:$0xff]   ;;  %v2831_v21 = vld [vmem:[#allocation5 + $0x4c] ss:$16 sps:$4 sm:$0xff]   ;;  %v2833_v22 = vld [vmem:[#allocation5 + $0x40] ss:$16 sps:$4 sm:$0xff]  }
  0x77   :  { %v2834_v23 = vld [vmem:[#allocation5 + $0x48] ss:$16 sps:$4 sm:$0xff]   ;;  %v2835_v24 = vld [vmem:[#allocation5 + $0x24] ss:$16 sps:$4 sm:$0xff]   ;;  %v2837_v25 = vld [vmem:[#allocation5 + $0x2c] ss:$16 sps:$4 sm:$0xff]  }
  0x78   :  { %v2839_v26 = vld [vmem:[#allocation5 + $0x20] ss:$16 sps:$4 sm:$0xff]   ;;  %v2840_v27 = vld [vmem:[#allocation5 + $0x28] ss:$16 sps:$4 sm:$0xff]   ;;  %v2841_v28 = vld [vmem:[#allocation5 + $0x4] ss:$16 sps:$4 sm:$0xff]  }
  0x79   :  { %577 = vmatpush1.bf16.msra.mxu0 %v2815_v10  ;;  %618 = vmatpush1.bf16.msra.mxu1 %v2816_v11  ;;  %v2843_v29 = vld [vmem:[#allocation5 + $0xc] ss:$16 sps:$4 sm:$0xff]   ;;  %v2845_v30 = vld [vmem:[#allocation5] ss:$16 sps:$4 sm:$0xff]   ;;  %v2846_v31 = vld [vmem:[#allocation5 + $0x8] ss:$16 sps:$4 sm:$0xff]  }
  0x7a   :  { %578 = vmatprep.subr.bf16.mxu0 %v2817_v12  ;;  %619 = vmatprep.subr.bf16.mxu1 %v2819_v13  ;;  %v2847_v32 = vld [vmem:[#allocation5 + $0x1e4] ss:$16 sps:$4 sm:$0xff]   ;;  %v2849_v33 = vld [vmem:[#allocation5 + $0x1ec] ss:$16 sps:$4 sm:$0xff]   ;;  %v2851_v34 = vld [vmem:[#allocation5 + $0x1e0] ss:$16 sps:$4 sm:$0xff]  }
  0x7b   :  { %v2852_v35 = vld [vmem:[#allocation5 + $0x1e8] ss:$16 sps:$4 sm:$0xff]   ;;  %v2853_v36 = vld [vmem:[#allocation5 + $0x1c4] ss:$16 sps:$4 sm:$0xff]   ;;  %v2855_v37 = vld [vmem:[#allocation5 + $0x1cc] ss:$16 sps:$4 sm:$0xff]  }
  0x7c   :  { %v2857_v38 = vld [vmem:[#allocation5 + $0x1c0] ss:$16 sps:$4 sm:$0xff]   ;;  %v2858_v39 = vld [vmem:[#allocation5 + $0x1c8] ss:$16 sps:$4 sm:$0xff]   ;;  %v2859_v40 = vld [vmem:[#allocation5 + $0x1a4] ss:$16 sps:$4 sm:$0xff]  }
  0x7d   :  { %579 = vmatpush1.bf16.msra.mxu0 %v2821_v14  ;;  %620 = vmatpush1.bf16.msra.mxu1 %v2822_v15  ;;  %v2861_v41 = vld [vmem:[#allocation5 + $0x1ac] ss:$16 sps:$4 sm:$0xff]   ;;  %v2863_v42 = vld [vmem:[#allocation5 + $0x1a0] ss:$16 sps:$4 sm:$0xff]   ;;  %v2864_v43 = vld [vmem:[#allocation5 + $0x1a8] ss:$16 sps:$4 sm:$0xff]  }
  0x7e   :  { %580 = vmatprep.subr.bf16.mxu0 %v2823_v16  ;;  %621 = vmatprep.subr.bf16.mxu1 %v2825_v17  ;;  %v2865_v44 = vld [vmem:[#allocation5 + $0x184] ss:$16 sps:$4 sm:$0xff]   ;;  %v2867_v45 = vld [vmem:[#allocation5 + $0x18c] ss:$16 sps:$4 sm:$0xff]   ;;  %v2869_v48 = vld [vmem:[#allocation5 + $0x180] ss:$16 sps:$4 sm:$0xff]  }
  0x7f   :  { %v163_v46 = vld [vmem:[#allocation2 + $0x8] sm:$0xff]  ;;  %v2871_v50 = vld [vmem:[#allocation5 + $0x164] ss:$16 sps:$4 sm:$0xff]   ;;  %v2875_v52 = vld [vmem:[#allocation5 + $0x160] ss:$16 sps:$4 sm:$0xff]   ;;  %s3455_s22 = smov [#allocation17]  }
  0x80   :  { %v165_v47 = vpack.c.bf16 %v163_v46, %v163_v46  ;;  %v2870_v49 = vld [vmem:[#allocation5 + $0x188] ss:$16 sps:$4 sm:$0xff]   ;;  %v2873_v51 = vld [vmem:[#allocation5 + $0x16c] ss:$16 sps:$4 sm:$0xff]   ;;  %v2877_v54 = vld [vmem:[#allocation5 + $0x144] ss:$16 sps:$4 sm:$0xff]  }
  0x81   :  { %581 = vmatpush1.bf16.msra.mxu0 %v2827_v18  ;;  %622 = vmatpush1.bf16.msra.mxu1 %v2828_v19  ;;  %v2876_v53 = vld [vmem:[#allocation5 + $0x168] ss:$16 sps:$4 sm:$0xff]   ;;  %v2879_v55 = vld [vmem:[#allocation5 + $0x14c] ss:$16 sps:$4 sm:$0xff]   ;;  %v2881_v56 = vld [vmem:[#allocation5 + $0x140] ss:$16 sps:$4 sm:$0xff]  }
  0x82   :  { %582 = vmatprep.subr.bf16.mxu0 %v2829_v20  ;;  %623 = vmatprep.subr.bf16.mxu1 %v2831_v21  ;;  %v2882_v57 = vld [vmem:[#allocation5 + $0x148] ss:$16 sps:$4 sm:$0xff]   ;;  %v2883_v58 = vld [vmem:[#allocation5 + $0x124] ss:$16 sps:$4 sm:$0xff]   ;;  %v2885_v59 = vld [vmem:[#allocation5 + $0x12c] ss:$16 sps:$4 sm:$0xff]  }
  0x83   :  { %604 = vmatprep.mubr.bf16.mxu0 %v165_v47  ;;  %645 = vmatprep.mubr.bf16.mxu1 %v165_v47  ;;  %v2887_v60 = vld [vmem:[#allocation5 + $0x120] ss:$16 sps:$4 sm:$0xff]   ;;  %v2888_v61 = vld [vmem:[#allocation5 + $0x128] ss:$16 sps:$4 sm:$0xff]   ;;  %v2889_v62 = vld [vmem:[#allocation5 + $0x104] ss:$16 sps:$4 sm:$0xff]  }
  0x84   :  { %v2891_v63 = vld [vmem:[#allocation5 + $0x10c] ss:$16 sps:$4 sm:$0xff]   ;;  %v2893_v0 = vld [vmem:[#allocation5 + $0x100] ss:$16 sps:$4 sm:$0xff]   ;;  %v2894_v1 = vld [vmem:[#allocation5 + $0x108] ss:$16 sps:$4 sm:$0xff]  }
  0x85   :  { %583 = vmatpush1.bf16.msra.mxu0 %v2833_v22  ;;  %624 = vmatpush1.bf16.msra.mxu1 %v2834_v23  ;;  %v162_v2 = vld [vmem:[#allocation2] sm:$0xff]  ;;  %v2897_v3 = vld [vmem:[#allocation8 + $0x74] ss:$8 sps:$4 sm:$0xff]   ;;  %v2901_v10 = vld [vmem:[#allocation8 + $0x60] ss:$8 sps:$4 sm:$0xff]  }
  0x86   :  { %584 = vmatprep.subr.bf16.mxu0 %v2835_v24  ;;  %625 = vmatprep.subr.bf16.mxu1 %v2837_v25  ;;  %v2900_v4 = vld [vmem:[#allocation8 + $0x174] ss:$8 sps:$4 sm:$0xff]   ;;  %v164_v5 = vpack.c.bf16 %v162_v2, %v162_v2  ;;  %v2895_v6 = vld [vmem:[#allocation8 + $0x70] ss:$8 sps:$4 sm:$0xff]   ;;  %v2903_v8 = vld [vmem:[#allocation8 + $0x64] ss:$8 sps:$4 sm:$0xff]  }
  0x87   :  { %v2898_v7 = vld [vmem:[#allocation8 + $0x170] ss:$8 sps:$4 sm:$0xff]   ;;  %v2906_v9 = vld [vmem:[#allocation8 + $0x164] ss:$8 sps:$4 sm:$0xff]   ;;  %v2904_v11 = vld [vmem:[#allocation8 + $0x160] ss:$8 sps:$4 sm:$0xff]  }
  0x88   :  { %v2909_v12 = vld [vmem:[#allocation8 + $0x54] ss:$8 sps:$4 sm:$0xff]   ;;  %v2907_v14 = vld [vmem:[#allocation8 + $0x50] ss:$8 sps:$4 sm:$0xff]   ;;  %v2915_v16 = vld [vmem:[#allocation8 + $0x44] ss:$8 sps:$4 sm:$0xff]  }
  0x89   :  { %585 = vmatpush1.bf16.msra.mxu0 %v2839_v26  ;;  %626 = vmatpush1.bf16.msra.mxu1 %v2840_v27  ;;  %v2912_v13 = vld [vmem:[#allocation8 + $0x154] ss:$8 sps:$4 sm:$0xff]   ;;  %v2910_v15 = vld [vmem:[#allocation8 + $0x150] ss:$8 sps:$4 sm:$0xff]   ;;  %v2918_v17 = vld [vmem:[#allocation8 + $0x144] ss:$8 sps:$4 sm:$0xff]  }
  0x8a   :  { %586 = vmatprep.subr.bf16.mxu0 %v2841_v28  ;;  %627 = vmatprep.subr.bf16.mxu1 %v2843_v29  ;;  %v2913_v18 = vld [vmem:[#allocation8 + $0x40] ss:$8 sps:$4 sm:$0xff]   ;;  %v2921_v20 = vld [vmem:[#allocation8 + $0x34] ss:$8 sps:$4 sm:$0xff]   ;;  %v2919_v22 = vld [vmem:[#allocation8 + $0x30] ss:$8 sps:$4 sm:$0xff]  }
  0x8b   :  { %v2916_v19 = vld [vmem:[#allocation8 + $0x140] ss:$8 sps:$4 sm:$0xff]   ;;  %v2924_v21 = vld [vmem:[#allocation8 + $0x134] ss:$8 sps:$4 sm:$0xff]   ;;  %v2922_v23 = vld [vmem:[#allocation8 + $0x130] ss:$8 sps:$4 sm:$0xff]  }
  0x8c   :  { %v2927_v24 = vld [vmem:[#allocation8 + $0x24] ss:$8 sps:$4 sm:$0xff]   ;;  %v2925_v26 = vld [vmem:[#allocation8 + $0x20] ss:$8 sps:$4 sm:$0xff]   ;;  %v2933_v28 = vld [vmem:[#allocation8 + $0x14] ss:$8 sps:$4 sm:$0xff]  }
  0x8d   :  { %587 = vmatpush1.bf16.msra.mxu0 %v2845_v30  ;;  %628 = vmatpush1.bf16.msra.mxu1 %v2846_v31  ;;  %v2930_v25 = vld [vmem:[#allocation8 + $0x124] ss:$8 sps:$4 sm:$0xff]   ;;  %v2928_v27 = vld [vmem:[#allocation8 + $0x120] ss:$8 sps:$4 sm:$0xff]   ;;  %v2936_v29 = vld [vmem:[#allocation8 + $0x114] ss:$8 sps:$4 sm:$0xff]  }
  0x8e   :  { %588 = vmatprep.subr.bf16.mxu0 %v2847_v32  ;;  %629 = vmatprep.subr.bf16.mxu1 %v2849_v33  ;;  %v2931_v30 = vld [vmem:[#allocation8 + $0x10] ss:$8 sps:$4 sm:$0xff]   ;;  %v2939_v32 = vld [vmem:[#allocation8 + $0x4] ss:$8 sps:$4 sm:$0xff]   ;;  %v2985_v2 = vld [vmem:[#allocation8 + $0x80] ss:$8 sps:$4 sm:$0xff]  }
  0x8f   :  { %v2934_v31 = vld [vmem:[#allocation8 + $0x110] ss:$8 sps:$4 sm:$0xff]   ;;  %v2942_v33 = vld [vmem:[#allocation8 + $0x104] ss:$8 sps:$4 sm:$0xff]  }
  0x90   :  { %v2955_v46 = vld [vmem:[#allocation8 + $0xd0] ss:$8 sps:$4 sm:$0xff]  }
  0x91   :  { %589 = vmatpush2.bf16.msra.mxu0 %v2851_v34  ;;  %630 = vmatpush2.bf16.msra.mxu1 %v2852_v35  ;;  %v2937_v34 = vld [vmem:[#allocation8] ss:$8 sps:$4 sm:$0xff]   ;;  %v2958_v47 = vld [vmem:[#allocation8 + $0x1d0] ss:$8 sps:$4 sm:$0xff]  }
  0x92   :  { %590 = vmatprep.subr.bf16.mxu0 %v2853_v36  ;;  %631 = vmatprep.subr.bf16.mxu1 %v2855_v37  ;;  %v2940_v35 = vld [vmem:[#allocation8 + $0x100] ss:$8 sps:$4 sm:$0xff]   ;;  %v2945_v36 = vld [vmem:[#allocation8 + $0xf4] ss:$8 sps:$4 sm:$0xff]  }
  0x93   :  { %v2948_v37 = vld [vmem:[#allocation8 + $0x1f4] ss:$8 sps:$4 sm:$0xff]  }
  0x95   :  { %591 = vmatpush2.bf16.msra.mxu0 %v2857_v38  ;;  %632 = vmatpush2.bf16.msra.mxu1 %v2858_v39  ;;  %v2943_v38 = vld [vmem:[#allocation8 + $0xf0] ss:$8 sps:$4 sm:$0xff]  }
  0x96   :  { %592 = vmatprep.subr.bf16.mxu0 %v2859_v40  ;;  %633 = vmatprep.subr.bf16.mxu1 %v2861_v41  ;;  %v2946_v39 = vld [vmem:[#allocation8 + $0x1f0] ss:$8 sps:$4 sm:$0xff]   ;;  %v2951_v40 = vld [vmem:[#allocation8 + $0xe4] ss:$8 sps:$4 sm:$0xff]  }
  0x97   :  { %v2954_v41 = vld [vmem:[#allocation8 + $0x1e4] ss:$8 sps:$4 sm:$0xff]  }
  0x99   :  { %593 = vmatpush2.bf16.msra.mxu0 %v2863_v42  ;;  %634 = vmatpush2.bf16.msra.mxu1 %v2864_v43  ;;  %v2949_v42 = vld [vmem:[#allocation8 + $0xe0] ss:$8 sps:$4 sm:$0xff]  }
  0x9a   :  { %594 = vmatprep.subr.bf16.mxu0 %v2865_v44  ;;  %635 = vmatprep.subr.bf16.mxu1 %v2867_v45  ;;  %v2952_v43 = vld [vmem:[#allocation8 + $0x1e0] ss:$8 sps:$4 sm:$0xff]   ;;  %v2957_v44 = vld [vmem:[#allocation8 + $0xd4] ss:$8 sps:$4 sm:$0xff]  }
  0x9b   :  { %v2960_v45 = vld [vmem:[#allocation8 + $0x1d4] ss:$8 sps:$4 sm:$0xff]  }
  0x9d   :  { %595 = vmatpush2.bf16.msra.mxu0 %v2869_v48  ;;  %636 = vmatpush2.bf16.msra.mxu1 %v2870_v49  ;;  %v2963_v48 = vld [vmem:[#allocation8 + $0xc4] ss:$8 sps:$4 sm:$0xff]  }
  0x9e   :  { %596 = vmatprep.subr.bf16.mxu0 %v2871_v50  ;;  %637 = vmatprep.subr.bf16.mxu1 %v2873_v51  ;;  %v2966_v49 = vld [vmem:[#allocation8 + $0x1c4] ss:$8 sps:$4 sm:$0xff]   ;;  %v2961_v50 = vld [vmem:[#allocation8 + $0xc0] ss:$8 sps:$4 sm:$0xff]  }
  0x9f   :  { %v2964_v51 = vld [vmem:[#allocation8 + $0x1c0] ss:$8 sps:$4 sm:$0xff]  }
  0xa1   :  { %597 = vmatpush2.bf16.msra.mxu0 %v2875_v52  ;;  %638 = vmatpush2.bf16.msra.mxu1 %v2876_v53  ;;  %v2969_v52 = vld [vmem:[#allocation8 + $0xb4] ss:$8 sps:$4 sm:$0xff]  }
  0xa2   :  { %598 = vmatprep.subr.bf16.mxu0 %v2877_v54  ;;  %639 = vmatprep.subr.bf16.mxu1 %v2879_v55  ;;  %v2972_v53 = vld [vmem:[#allocation8 + $0x1b4] ss:$8 sps:$4 sm:$0xff]   ;;  %v2967_v54 = vld [vmem:[#allocation8 + $0xb0] ss:$8 sps:$4 sm:$0xff]  }
  0xa3   :  { %v2970_v55 = vld [vmem:[#allocation8 + $0x1b0] ss:$8 sps:$4 sm:$0xff]  }
  0xa5   :  { %599 = vmatpush2.bf16.msra.mxu0 %v2881_v56  ;;  %640 = vmatpush2.bf16.msra.mxu1 %v2882_v57  ;;  %v2975_v56 = vld [vmem:[#allocation8 + $0xa4] ss:$8 sps:$4 sm:$0xff]  }
  0xa6   :  { %600 = vmatprep.subr.bf16.mxu0 %v2883_v58  ;;  %641 = vmatprep.subr.bf16.mxu1 %v2885_v59  ;;  %v2978_v57 = vld [vmem:[#allocation8 + $0x1a4] ss:$8 sps:$4 sm:$0xff]   ;;  %v2973_v58 = vld [vmem:[#allocation8 + $0xa0] ss:$8 sps:$4 sm:$0xff]  }
  0xa7   :  { %v2976_v59 = vld [vmem:[#allocation8 + $0x1a0] ss:$8 sps:$4 sm:$0xff]  }
  0xa9   :  { %601 = vmatpush2.bf16.msra.mxu0 %v2887_v60  ;;  %642 = vmatpush2.bf16.msra.mxu1 %v2888_v61  ;;  %v2981_v60 = vld [vmem:[#allocation8 + $0x94] ss:$8 sps:$4 sm:$0xff]  }
  0xaa   :  { %602 = vmatprep.subr.bf16.mxu0 %v2889_v62  ;;  %643 = vmatprep.subr.bf16.mxu1 %v2891_v63  ;;  %v2984_v61 = vld [vmem:[#allocation8 + $0x194] ss:$8 sps:$4 sm:$0xff]   ;;  %v2979_v62 = vld [vmem:[#allocation8 + $0x90] ss:$8 sps:$4 sm:$0xff]  }
  0xab   :  { %v2982_v63 = vld [vmem:[#allocation8 + $0x190] ss:$8 sps:$4 sm:$0xff]  }
  0xad   :  { %603 = vmatpush2.bf16.msra.mxu0 %v2893_v0  ;;  %644 = vmatpush2.bf16.msra.mxu1 %v2894_v1  ;;  %v2987_v0 = vld [vmem:[#allocation8 + $0x84] ss:$8 sps:$4 sm:$0xff]  }
  0xae   :  { %1058 = vmatprep.subr.bf16.mxu0 %v2897_v3  ;;  %1099 = vmatprep.subr.bf16.mxu1 %v2900_v4  ;;  %v2990_v1 = vld [vmem:[#allocation8 + $0x184] ss:$8 sps:$4 sm:$0xff]   ;;  %v2988_v3 = vld [vmem:[#allocation8 + $0x180] ss:$8 sps:$4 sm:$0xff]   ;;  %v2991_v4 = vld [vmem:[#allocation10 + $0x78] sm:$0xff]  }
  0xb0   :  { %605 = vmatmul.mubr.bf16.vlgmr.msra.gmra.mxu0 %v164_v5  ;;  %646 = vmatmul.mubr.bf16.vlgmr.msra.gmra.mxu1 %v164_v5  ;;  %v232_v5 = vlaneseq }
  0xb1   :  { %1059 = vmatpush1.bf16.msra.mxu0 %v2895_v6  ;;  %1100 = vmatpush1.bf16.msra.mxu1 %v2898_v7 }
  0xb2   :  { %1060 = vmatprep.subr.bf16.mxu0 %v2903_v8  ;;  %1101 = vmatprep.subr.bf16.mxu1 %v2906_v9  ;;  %v3568_v6 = vshrl.u32 %v232_v5, 7  ;;  %v230_v9 = vld [vmem:[#allocation7] sm:$0xf] }
  0xb4   :  { %v3571_v7 = vsub.s32 0, %v3568_v6  ;;  %v242_v8 = vsub.s32 2, %v3568_v6 }
  0xb5   :  { %1061 = vmatpush1.bf16.msra.mxu0 %v2901_v10  ;;  %1102 = vmatpush1.bf16.msra.mxu1 %v2904_v11  ;;  %v3575_v10 = vsub.s32 1, %v3568_v6  ;;  %v246_v11 = vsub.s32 3, %v3568_v6 }
  0xb6   :  { %1062 = vmatprep.subr.bf16.mxu0 %v2909_v12  ;;  %1103 = vmatprep.subr.bf16.mxu1 %v2912_v13  ;;  %v235_v12 = vrot.slane %v230_v9, %v3571_v7  ;;  %v243_v13 = vrot.slane %v230_v9, %v242_v8 }
  0xb9   :  { %1063 = vmatpush1.bf16.msra.mxu0 %v2907_v14  ;;  %1104 = vmatpush1.bf16.msra.mxu1 %v2910_v15  ;;  %v239_v14 = vrot.slane %v230_v9, %v3575_v10  ;;  %v247_v15 = vrot.slane %v230_v9, %v246_v11 }
  0xba   :  { %1064 = vmatprep.subr.bf16.mxu0 %v2915_v16  ;;  %1105 = vmatprep.subr.bf16.mxu1 %v2918_v17 }
  0xbd   :  { %1065 = vmatpush1.bf16.msra.mxu0 %v2913_v18  ;;  %1106 = vmatpush1.bf16.msra.mxu1 %v2916_v19 }
  0xbe   :  { %1066 = vmatprep.subr.bf16.mxu0 %v2921_v20  ;;  %1107 = vmatprep.subr.bf16.mxu1 %v2924_v21 }
  0xc1   :  { %1067 = vmatpush1.bf16.msra.mxu0 %v2919_v22  ;;  %1108 = vmatpush1.bf16.msra.mxu1 %v2922_v23 }
  0xc2   :  { %1068 = vmatprep.subr.bf16.mxu0 %v2927_v24  ;;  %1109 = vmatprep.subr.bf16.mxu1 %v2930_v25 }
  0xc5   :  { %1069 = vmatpush1.bf16.msra.mxu0 %v2925_v26  ;;  %1110 = vmatpush1.bf16.msra.mxu1 %v2928_v27 }
  0xc6   :  { %1070 = vmatprep.subr.bf16.mxu0 %v2933_v28  ;;  %1111 = vmatprep.subr.bf16.mxu1 %v2936_v29 }
  0xc9   :  { %1071 = vmatpush1.bf16.msra.mxu0 %v2931_v30  ;;  %1112 = vmatpush1.bf16.msra.mxu1 %v2934_v31 }
  0xca   :  { %1072 = vmatprep.subr.bf16.mxu0 %v2939_v32  ;;  %1113 = vmatprep.subr.bf16.mxu1 %v2942_v33 }
  0xcd   :  { %1073 = vmatpush1.bf16.msra.mxu0 %v2937_v34  ;;  %1114 = vmatpush1.bf16.msra.mxu1 %v2940_v35  ;;  %v2992_v35 = vld [vmem:[#allocation10 + $0x38] sm:$0xff]  }
  0xce   :  { %1074 = vmatprep.subr.bf16.mxu0 %v2945_v36  ;;  %1115 = vmatprep.subr.bf16.mxu1 %v2948_v37  ;;  %v2993_v37 = vld [vmem:[#allocation10 + $0x70] sm:$0xff]  }
  0xd1   :  { %1075 = vmatpush2.bf16.msra.mxu0 %v2943_v38  ;;  %1116 = vmatpush2.bf16.msra.mxu1 %v2946_v39  ;;  %v2994_v38 = vld [vmem:[#allocation10 + $0x30] sm:$0xff]   ;;  %v2995_v39 = vld [vmem:[#allocation10 + $0x68] sm:$0xff]  }
  0xd2   :  { %1076 = vmatprep.subr.bf16.mxu0 %v2951_v40  ;;  %1117 = vmatprep.subr.bf16.mxu1 %v2954_v41  ;;  %v2996_v40 = vld [vmem:[#allocation10 + $0x28] sm:$0xff]   ;;  %v2997_v41 = vld [vmem:[#allocation10 + $0x60] sm:$0xff]  }
  0xd5   :  { %1077 = vmatpush2.bf16.msra.mxu0 %v2949_v42  ;;  %1118 = vmatpush2.bf16.msra.mxu1 %v2952_v43  ;;  %v2998_v42 = vld [vmem:[#allocation10 + $0x20] sm:$0xff]   ;;  %v2999_v43 = vld [vmem:[#allocation10 + $0x58] sm:$0xff]  }
  0xd6   :  { %1078 = vmatprep.subr.bf16.mxu0 %v2957_v44  ;;  %1119 = vmatprep.subr.bf16.mxu1 %v2960_v45  ;;  %v3000_v44 = vld [vmem:[#allocation10 + $0x18] sm:$0xff]   ;;  %v3001_v45 = vld [vmem:[#allocation10 + $0x50] sm:$0xff]  }
  0xd9   :  { %1079 = vmatpush2.bf16.msra.mxu0 %v2955_v46  ;;  %1120 = vmatpush2.bf16.msra.mxu1 %v2958_v47  ;;  %v3002_v46 = vld [vmem:[#allocation10 + $0x10] sm:$0xff]   ;;  %v3003_v47 = vld [vmem:[#allocation10 + $0x48] sm:$0xff]  }
  0xda   :  { %1080 = vmatprep.subr.bf16.mxu0 %v2963_v48  ;;  %1121 = vmatprep.subr.bf16.mxu1 %v2966_v49  ;;  %v3004_v48 = vld [vmem:[#allocation10 + $0x8] sm:$0xff]   ;;  %v3005_v49 = vld [vmem:[#allocation10 + $0x40] sm:$0xff]  }
  0xdd   :  { %1081 = vmatpush2.bf16.msra.mxu0 %v2961_v50  ;;  %1122 = vmatpush2.bf16.msra.mxu1 %v2964_v51  ;;  %v3006_v50 = vld [vmem:[#allocation10] sm:$0xff]   ;;  %v3007_v51 = vld [vmem:[#allocation13 + $0x70] ss:$8 sps:$4 sm:$0xff]  }
  0xde   :  { %1082 = vmatprep.subr.bf16.mxu0 %v2969_v52  ;;  %1123 = vmatprep.subr.bf16.mxu1 %v2972_v53  ;;  %v3009_v52 = vld [vmem:[#allocation13 + $0x74] ss:$8 sps:$4 sm:$0xff]   ;;  %v3012_v53 = vld [vmem:[#allocation13 + $0x64] ss:$8 sps:$4 sm:$0xff]  }
  0xe1   :  { %1083 = vmatpush2.bf16.msra.mxu0 %v2967_v54  ;;  %1124 = vmatpush2.bf16.msra.mxu1 %v2970_v55  ;;  %v3010_v54 = vld [vmem:[#allocation13 + $0x60] ss:$8 sps:$4 sm:$0xff]   ;;  %v3015_v55 = vld [vmem:[#allocation13 + $0x54] ss:$8 sps:$4 sm:$0xff]  }
  0xe2   :  { %1084 = vmatprep.subr.bf16.mxu0 %v2975_v56  ;;  %1125 = vmatprep.subr.bf16.mxu1 %v2978_v57  ;;  %v3013_v56 = vld [vmem:[#allocation13 + $0x50] ss:$8 sps:$4 sm:$0xff]   ;;  %v3018_v57 = vld [vmem:[#allocation13 + $0x44] ss:$8 sps:$4 sm:$0xff]  }
  0xe5   :  { %1085 = vmatpush2.bf16.msra.mxu0 %v2973_v58  ;;  %1126 = vmatpush2.bf16.msra.mxu1 %v2976_v59  ;;  %v3016_v58 = vld [vmem:[#allocation13 + $0x40] ss:$8 sps:$4 sm:$0xff]   ;;  %v3021_v59 = vld [vmem:[#allocation13 + $0x34] ss:$8 sps:$4 sm:$0xff]  }
  0xe6   :  { %1086 = vmatprep.subr.bf16.mxu0 %v2981_v60  ;;  %1127 = vmatprep.subr.bf16.mxu1 %v2984_v61  ;;  %v3019_v60 = vld [vmem:[#allocation13 + $0x30] ss:$8 sps:$4 sm:$0xff]   ;;  %v3024_v61 = vld [vmem:[#allocation13 + $0x24] ss:$8 sps:$4 sm:$0xff]  }
  0xe9   :  { %1087 = vmatpush2.bf16.msra.mxu0 %v2979_v62  ;;  %1128 = vmatpush2.bf16.msra.mxu1 %v2982_v63  ;;  %v3022_v62 = vld [vmem:[#allocation13 + $0x20] ss:$8 sps:$4 sm:$0xff]  }
  0xea   :  { %1088 = vmatprep.subr.bf16.mxu0 %v2987_v0  ;;  %1129 = vmatprep.subr.bf16.mxu1 %v2990_v1  ;;  %v726_v63 = vld [vmem:[%s3615_s4] sm:$0x3] }
  0xeb   :  { %v731_v0 = vrot.slane %v726_v63, %v3571_v7  ;;  %v735_v1 = vrot.slane %v726_v63, %v3575_v10 }
  0xed   :  { %1089 = vmatpush2.bf16.msra.mxu0 %v2985_v2  ;;  %1130 = vmatpush2.bf16.msra.mxu1 %v2988_v3 }
  0xee   :  { %2760 = vmatprep.subr.bf16.mxu0 %v2991_v4  ;;  %1429 = vmatprep.subr.bf16.mxu1 %v3009_v52  ;;  %v3097_v52 = vld [vmem:[#allocation14 + $0x180] ss:$16 sps:$4 sm:$0xff]  }
 0x170   :  { %v606_v16 = vpop.f32.mrf.mxu0  ;;  %v647_v17 = vpop.f32.mrf.mxu1 }
 0x171   :  { %v607_v18 = vadd.f32 %v606_v16, %v235_v12  ;;  %v648_v19 = vadd.f32 %v647_v17, %v243_v13 }
 0x172   :  { %v608_v20 = vpop.f32.mrf.mxu0  ;;  %v649_v21 = vpop.f32.mrf.mxu1 }
 0x173   :  { %v656_v22 = vmax.f32 %v648_v19, 0.0  ;;  %v609_v23 = vadd.f32 %v608_v20, %v239_v14  ;;  %v650_v24 = vadd.f32 %v649_v21, %v247_v15  ;;  %v654_v25 = vmax.f32 %v607_v18, 0.0 }
 0x174   :  { %v610_v26 = vpop.f32.mrf.mxu0  ;;  %v651_v27 = vpop.f32.mrf.mxu1 }
 0x175   :  { %v655_v28 = vmax.f32 %v609_v23, 0.0  ;;  %v657_v29 = vmax.f32 %v650_v24, 0.0  ;;  %v660_v30 = vpack.c.bf16 %v656_v22, %v656_v22  ;;  %v658_v36 = vpack.c.bf16 %v654_v25, %v654_v25  ;;  %v3027_v23 = vld [vmem:[#allocation13 + $0x14] ss:$8 sps:$4 sm:$0xff]   ;;  %v3025_v24 = vld [vmem:[#allocation13 + $0x10] ss:$8 sps:$4 sm:$0xff]  }
 0x176   :  { %v611_v31 = vpop.f32.mrf.mxu0  ;;  %v652_v32 = vpop.f32.mrf.mxu1  ;;  %v3030_v25 = vld [vmem:[#allocation13 + $0x4] ss:$8 sps:$4 sm:$0xff]   ;;  %v3028_v26 = vld [vmem:[#allocation13] ss:$8 sps:$4 sm:$0xff]   ;;  %v3454_v27 = vmov 0  }
 0x177   :  { %v659_v33 = vpack.c.bf16 %v655_v28, %v655_v28  ;;  %v661_v34 = vpack.c.bf16 %v657_v29, %v657_v29  ;;  %v3031_v28 = vld [vmem:[#allocation14 + $0xe0] ss:$16 sps:$4 sm:$0xff]   ;;  %v3033_v29 = vld [vmem:[#allocation14 + $0xe4] ss:$16 sps:$4 sm:$0xff]  }
 0x178   :  { %v3039_v31 = vld [vmem:[#allocation14 + $0xc4] ss:$16 sps:$4 sm:$0xff]   ;;  %v3037_v32 = vld [vmem:[#allocation14 + $0xc0] ss:$16 sps:$4 sm:$0xff]  }
 0x179   :  { %1090 = vmatprep.mubr.bf16.mxu0 %v659_v33  ;;  %1131 = vmatprep.mubr.bf16.mxu1 %v661_v34  ;;  %v3045_v33 = vld [vmem:[#allocation14 + $0xa4] ss:$16 sps:$4 sm:$0xff]   ;;  %v3043_v34 = vld [vmem:[#allocation14 + $0xa0] ss:$16 sps:$4 sm:$0xff]  }
 0x17a   :  { %1091 = vmatmul.mubr.bf16.vlgmr.msra.gmra.mxu0 %v658_v36  ;;  %1132 = vmatmul.mubr.bf16.vlgmr.msra.gmra.mxu1 %v660_v30  ;;  %v3036_v30 = vld [vmem:[#allocation14 + $0xec] ss:$16 sps:$4 sm:$0xff]   ;;  %v3049_v36 = vld [vmem:[#allocation14 + $0x80] ss:$16 sps:$4 sm:$0xff]  }
 0x17b   :  { %2761 = vmatpush3.bf16.msra.mxu0 %v2992_v35  ;;  %1430 = vmatpush1.bf16.msra.mxu1 %v3007_v51  ;;  %v3051_v35 = vld [vmem:[#allocation14 + $0x84] ss:$16 sps:$4 sm:$0xff]  }
 0x17c   :  { %2762 = vmatprep.subr.bf16.mxu0 %v2993_v37  ;;  %1431 = vmatprep.subr.bf16.mxu1 %v3012_v53  ;;  %v3057_v37 = vld [vmem:[#allocation14 + $0x64] ss:$16 sps:$4 sm:$0xff]  }
 0x17d   :  { %1461 = vmatprep.mubr.bf16.mxu1 %v3454_v27  ;;  %v3099_v51 = vld [vmem:[#allocation14 + $0x184] ss:$16 sps:$4 sm:$0xff]   ;;  %v3094_v27 = vld [vmem:[#allocation14 + $0x1a8] ss:$16 sps:$4 sm:$0xff]  }
 0x17e   :  { %v3105_v53 = vld [vmem:[#allocation14 + $0x164] ss:$16 sps:$4 sm:$0xff]  }
 0x17f   :  { %2763 = vmatpush3.bf16.msra.mxu0 %v2994_v38  ;;  %1432 = vmatpush1.bf16.msra.mxu1 %v3010_v54  ;;  %v3055_v38 = vld [vmem:[#allocation14 + $0x60] ss:$16 sps:$4 sm:$0xff]  }
 0x180   :  { %2764 = vmatprep.subr.bf16.mxu0 %v2995_v39  ;;  %1433 = vmatprep.subr.bf16.mxu1 %v3015_v55  ;;  %v3063_v39 = vld [vmem:[#allocation14 + $0x44] ss:$16 sps:$4 sm:$0xff]   ;;  %v3103_v54 = vld [vmem:[#allocation14 + $0x160] ss:$16 sps:$4 sm:$0xff]  }
 0x181   :  { %v3111_v55 = vld [vmem:[#allocation14 + $0x144] ss:$16 sps:$4 sm:$0xff]  }
 0x183   :  { %2765 = vmatpush3.bf16.msra.mxu0 %v2996_v40  ;;  %1434 = vmatpush1.bf16.msra.mxu1 %v3013_v56  ;;  %v3061_v40 = vld [vmem:[#allocation14 + $0x40] ss:$16 sps:$4 sm:$0xff]  }
 0x184   :  { %2766 = vmatprep.subr.bf16.mxu0 %v2997_v41  ;;  %1435 = vmatprep.subr.bf16.mxu1 %v3018_v57  ;;  %v3069_v41 = vld [vmem:[#allocation14 + $0x24] ss:$16 sps:$4 sm:$0xff]   ;;  %v3109_v56 = vld [vmem:[#allocation14 + $0x140] ss:$16 sps:$4 sm:$0xff]  }
 0x187   :  { %2767 = vmatpush3.bf16.msra.mxu0 %v2998_v42  ;;  %1436 = vmatpush1.bf16.msra.mxu1 %v3016_v58  ;;  %v3067_v42 = vld [vmem:[#allocation14 + $0x20] ss:$16 sps:$4 sm:$0xff]   ;;  %v2599_v58 = vld [vmem:[#allocation11] ss:$0 sm:$0xff] }
 0x188   :  { %2768 = vmatprep.subr.bf16.mxu0 %v2999_v43  ;;  %1437 = vmatprep.subr.bf16.mxu1 %v3021_v59  ;;  %v3075_v43 = vld [vmem:[#allocation14 + $0x4] ss:$16 sps:$4 sm:$0xff]  }
 0x18b   :  { %2769 = vmatpush3.bf16.msra.mxu0 %v3000_v44  ;;  %1438 = vmatpush1.bf16.msra.mxu1 %v3019_v60  ;;  %v3073_v44 = vld [vmem:[#allocation14] ss:$16 sps:$4 sm:$0xff]  }
 0x18c   :  { %2770 = vmatprep.subr.bf16.mxu0 %v3001_v45  ;;  %1439 = vmatprep.subr.bf16.mxu1 %v3024_v61  ;;  %v3081_v45 = vld [vmem:[#allocation14 + $0x1e4] ss:$16 sps:$4 sm:$0xff]  }
 0x18f   :  { %2771 = vmatpush3.bf16.msra.mxu0 %v3002_v46  ;;  %1440 = vmatpush1.bf16.msra.mxu1 %v3022_v62  ;;  %v3079_v46 = vld [vmem:[#allocation14 + $0x1e0] ss:$16 sps:$4 sm:$0xff]  }
 0x190   :  { %2772 = vmatprep.subr.bf16.mxu0 %v3003_v47  ;;  %1441 = vmatprep.subr.bf16.mxu1 %v3027_v23  ;;  %v3087_v47 = vld [vmem:[#allocation14 + $0x1c4] ss:$16 sps:$4 sm:$0xff]   ;;  %v3082_v23 = vld [vmem:[#allocation14 + $0x1e8] ss:$16 sps:$4 sm:$0xff]  }
 0x193   :  { %2773 = vmatpush3.bf16.msra.mxu0 %v3004_v48  ;;  %1442 = vmatpush1.bf16.msra.mxu1 %v3025_v24  ;;  %v3085_v48 = vld [vmem:[#allocation14 + $0x1c0] ss:$16 sps:$4 sm:$0xff]   ;;  %v3090_v24 = vld [vmem:[#allocation14 + $0x1cc] ss:$16 sps:$4 sm:$0xff]  }
 0x194   :  { %2774 = vmatprep.subr.bf16.mxu0 %v3005_v49  ;;  %1443 = vmatprep.subr.bf16.mxu1 %v3030_v25  ;;  %v3093_v49 = vld [vmem:[#allocation14 + $0x1a4] ss:$16 sps:$4 sm:$0xff]   ;;  %v3088_v25 = vld [vmem:[#allocation14 + $0x1c8] ss:$16 sps:$4 sm:$0xff]  }
 0x197   :  { %2775 = vmatpush3.bf16.msra.mxu0 %v3006_v50  ;;  %1444 = vmatpush1.bf16.msra.mxu1 %v3028_v26  ;;  %v3091_v50 = vld [vmem:[#allocation14 + $0x1a0] ss:$16 sps:$4 sm:$0xff]   ;;  %v3096_v26 = vld [vmem:[#allocation14 + $0x1ac] ss:$16 sps:$4 sm:$0xff]  }
 0x198   :  { %1880 = vmatprep.subr.bf16.mxu0 %v3033_v29  ;;  %1921 = vmatprep.subr.bf16.mxu1 %v3036_v30  ;;  %v3100_v29 = vld [vmem:[#allocation14 + $0x188] ss:$16 sps:$4 sm:$0xff]   ;;  %v3108_v30 = vld [vmem:[#allocation14 + $0x16c] ss:$16 sps:$4 sm:$0xff]  }
 0x23a   :  { %v1092_v2 = vpop.f32.mrf.mxu0  ;;  %v1133_v3 = vpop.f32.mrf.mxu1 }
 0x23b   :  { %v1093_v4 = vadd.f32 %v1092_v2, %v731_v0 }
 0x23c   :  { %v1094_v5 = vpop.f32.mrf.mxu0  ;;  %v1135_v9 = vpop.f32.mrf.mxu1 }
 0x23d   :  { %v1134_v12 = vadd.f32 %v1133_v3, %v1093_v4  ;;  %v1095_v13 = vadd.f32 %v1094_v5, %v735_v1  ;;  %v3034_v1 = vld [vmem:[#allocation14 + $0xe8] ss:$16 sps:$4 sm:$0xff]   ;;  %v3042_v3 = vld [vmem:[#allocation14 + $0xcc] ss:$16 sps:$4 sm:$0xff]  }
 0x23e   :  { %v1096_v14 = vpop.f32.mrf.mxu0  ;;  %v1137_v15 = vpop.f32.mrf.mxu1  ;;  %v3040_v4 = vld [vmem:[#allocation14 + $0xc8] ss:$16 sps:$4 sm:$0xff]   ;;  %v3048_v5 = vld [vmem:[#allocation14 + $0xac] ss:$16 sps:$4 sm:$0xff]  }
 0x23f   :  { %v1136_v16 = vadd.f32 %v1135_v9, %v1095_v13  ;;  %v1140_v17 = vmax.f32 %v1134_v12, 0.0  ;;  %v3046_v9 = vld [vmem:[#allocation14 + $0xa8] ss:$16 sps:$4 sm:$0xff]   ;;  %v3054_v12 = vld [vmem:[#allocation14 + $0x8c] ss:$16 sps:$4 sm:$0xff]  }
 0x240   :  { %v1097_v18 = vpop.f32.mrf.mxu0  ;;  %v1138_v19 = vpop.f32.mrf.mxu1  ;;  %v3052_v13 = vld [vmem:[#allocation14 + $0x88] ss:$16 sps:$4 sm:$0xff]   ;;  %v3060_v14 = vld [vmem:[#allocation14 + $0x6c] ss:$16 sps:$4 sm:$0xff]  }
 0x241   :  { %v1141_v20 = vmax.f32 %v1136_v16, 0.0  ;;  %v1142_v22 = vpack.c.bf16 %v1140_v17, %v1140_v17  ;;  %v3058_v15 = vld [vmem:[#allocation14 + $0x68] ss:$16 sps:$4 sm:$0xff]   ;;  %v3066_v16 = vld [vmem:[#allocation14 + $0x4c] ss:$16 sps:$4 sm:$0xff]  }
 0x242   :  { %v3064_v17 = vld [vmem:[#allocation14 + $0x48] ss:$16 sps:$4 sm:$0xff]   ;;  %v3072_v18 = vld [vmem:[#allocation14 + $0x2c] ss:$16 sps:$4 sm:$0xff]  }
 0x243   :  { %v1143_v21 = vpack.c.bf16 %v1141_v20, %v1141_v20  ;;  %v3070_v19 = vld [vmem:[#allocation14 + $0x28] ss:$16 sps:$4 sm:$0xff]   ;;  %v3078_v20 = vld [vmem:[#allocation14 + $0xc] ss:$16 sps:$4 sm:$0xff]  }
 0x245   :  { %1311 = vmatprep.mubr.bf16.mxu0 %v1143_v21  ;;  %v3076_v21 = vld [vmem:[#allocation14 + $0x8] ss:$16 sps:$4 sm:$0xff]  }
 0x246   :  { %1312 = vmatmul.mubr.bf16.vlgmr.msra.gmra.mxu0 %v1142_v22  ;;  %v3084_v22 = vld [vmem:[#allocation14 + $0x1ec] ss:$16 sps:$4 sm:$0xff]  }
 0x247   :  { %1881 = vmatpush1.bf16.msra.mxu0 %v3031_v28  ;;  %v3102_v28 = vld [vmem:[#allocation14 + $0x18c] ss:$16 sps:$4 sm:$0xff]  }
 0x248   :  { %1882 = vmatprep.subr.bf16.mxu0 %v3039_v31  ;;  %v3106_v31 = vld [vmem:[#allocation14 + $0x168] ss:$16 sps:$4 sm:$0xff]  }
 0x24b   :  { %1883 = vmatpush1.bf16.msra.mxu0 %v3037_v32  ;;  %v3114_v32 = vld [vmem:[#allocation14 + $0x14c] ss:$16 sps:$4 sm:$0xff]  }
 0x24c   :  { %1884 = vmatprep.subr.bf16.mxu0 %v3045_v33  ;;  %v3112_v33 = vld [vmem:[#allocation14 + $0x148] ss:$16 sps:$4 sm:$0xff]  }
 0x24f   :  { %1885 = vmatpush1.bf16.msra.mxu0 %v3043_v34  ;;  %v3117_v34 = vld [vmem:[#allocation14 + $0x124] ss:$16 sps:$4 sm:$0xff]  }
 0x250   :  { %1886 = vmatprep.subr.bf16.mxu0 %v3051_v35  ;;  %v3120_v35 = vld [vmem:[#allocation14 + $0x12c] ss:$16 sps:$4 sm:$0xff]  }
 0x253   :  { %1887 = vmatpush1.bf16.msra.mxu0 %v3049_v36  ;;  %v3115_v36 = vld [vmem:[#allocation14 + $0x120] ss:$16 sps:$4 sm:$0xff]  }
 0x254   :  { %1888 = vmatprep.subr.bf16.mxu0 %v3057_v37  ;;  %v3118_v37 = vld [vmem:[#allocation14 + $0x128] ss:$16 sps:$4 sm:$0xff]  }
 0x257   :  { %1889 = vmatpush1.bf16.msra.mxu0 %v3055_v38  ;;  %v3123_v38 = vld [vmem:[#allocation14 + $0x104] ss:$16 sps:$4 sm:$0xff]  }
 0x258   :  { %1890 = vmatprep.subr.bf16.mxu0 %v3063_v39  ;;  %v3126_v39 = vld [vmem:[#allocation14 + $0x10c] ss:$16 sps:$4 sm:$0xff]  }
 0x25b   :  { %1891 = vmatpush1.bf16.msra.mxu0 %v3061_v40  ;;  %v3121_v40 = vld [vmem:[#allocation14 + $0x100] ss:$16 sps:$4 sm:$0xff]  }
 0x25c   :  { %1892 = vmatprep.subr.bf16.mxu0 %v3069_v41  ;;  %v3124_v41 = vld [vmem:[#allocation14 + $0x108] ss:$16 sps:$4 sm:$0xff]  }
 0x25f   :  { %1893 = vmatpush1.bf16.msra.mxu0 %v3067_v42  ;;  %v3129_v42 = vld [vmem:[#allocation16 + $0x74] ss:$8 sps:$4 sm:$0xff]  }
 0x260   :  { %1894 = vmatprep.subr.bf16.mxu0 %v3075_v43  ;;  %v3132_v43 = vld [vmem:[#allocation16 + $0x174] ss:$8 sps:$4 sm:$0xff]  }
 0x263   :  { %1895 = vmatpush1.bf16.msra.mxu0 %v3073_v44  ;;  %v1337_v44 = vld [vmem:[%s3619_s8] sm:$0x3] }
 0x264   :  { %1896 = vmatprep.subr.bf16.mxu0 %v3081_v45  ;;  %v1342_v45 = vrot.slane %v1337_v44, %v3571_v7 }
 0x267   :  { %1897 = vmatpush2.bf16.msra.mxu0 %v3079_v46  ;;  %v1346_v46 = vrot.slane %v1337_v44, %v3575_v10  ;;  %v3201_v44 = vld [vmem:[#allocation16 + $0xb4] ss:$8 sps:$4 sm:$0xff]  }
 0x268   :  { %1898 = vmatprep.subr.bf16.mxu0 %v3087_v47 }
 0x26b   :  { %1899 = vmatpush2.bf16.msra.mxu0 %v3085_v48 }
 0x26c   :  { %1900 = vmatprep.subr.bf16.mxu0 %v3093_v49 }
 0x26f   :  { %1901 = vmatpush2.bf16.msra.mxu0 %v3091_v50 }
 0x270   :  { %1902 = vmatprep.subr.bf16.mxu0 %v3099_v51 }
 0x273   :  { %1903 = vmatpush2.bf16.msra.mxu0 %v3097_v52 }
 0x274   :  { %1904 = vmatprep.subr.bf16.mxu0 %v3105_v53 }
 0x277   :  { %1905 = vmatpush2.bf16.msra.mxu0 %v3103_v54 }
 0x278   :  { %1906 = vmatprep.subr.bf16.mxu0 %v3111_v55 }
 0x27b   :  { %1907 = vmatpush2.bf16.msra.mxu0 %v3109_v56  ;;  %v3127_v56 = vld [vmem:[#allocation16 + $0x70] ss:$8 sps:$4 sm:$0xff]  }
 0x27c   :  { %1908 = vmatprep.subr.bf16.mxu0 %v3117_v34  ;;  %v3181_v34 = vld [vmem:[#allocation16 + $0xe0] ss:$8 sps:$4 sm:$0xff]  }
 0x27f   :  { %1909 = vmatpush2.bf16.msra.mxu0 %v3115_v36  ;;  %v3189_v36 = vld [vmem:[#allocation16 + $0xd4] ss:$8 sps:$4 sm:$0xff]  }
 0x280   :  { %1910 = vmatprep.subr.bf16.mxu0 %v3123_v38  ;;  %v3187_v38 = vld [vmem:[#allocation16 + $0xd0] ss:$8 sps:$4 sm:$0xff]  }
 0x283   :  { %1911 = vmatpush2.bf16.msra.mxu0 %v3121_v40  ;;  %v3195_v40 = vld [vmem:[#allocation16 + $0xc4] ss:$8 sps:$4 sm:$0xff]  }
 0x284   :  { %2366 = vmatprep.subr.bf16.mxu0 %v3129_v42  ;;  %v3193_v42 = vld [vmem:[#allocation16 + $0xc0] ss:$8 sps:$4 sm:$0xff]  }
 0x306   :  { %v2776_v57 = vpop.f32.mrf.mxu0 }
 0x308   :  { %v2777_v59 = vpop.f32.mrf.mxu0 }
 0x309   :  { %v2778_v60 = vadd.f32 %v2777_v59, %v2776_v57  ;;  %v3130_v57 = vld [vmem:[#allocation16 + $0x170] ss:$8 sps:$4 sm:$0xff]   ;;  %v3135_v59 = vld [vmem:[#allocation16 + $0x64] ss:$8 sps:$4 sm:$0xff]  }
 0x30a   :  { %v2779_v61 = vpop.f32.mrf.mxu0 }
 0x30b   :  { %v1314_v62 = vadd.f32 %v2778_v60, %v2599_v58  ;;  %v3138_v60 = vld [vmem:[#allocation16 + $0x164] ss:$8 sps:$4 sm:$0xff]   ;;  %v3133_v61 = vld [vmem:[#allocation16 + $0x60] ss:$8 sps:$4 sm:$0xff]  }
 0x30c   :  { %v2780_v63 = vpop.f32.mrf.mxu0 }
 0x30d   :  { %v1319_v0 = vmax.f32 %v1314_v62, 0.0  ;;  %v3136_v62 = vld [vmem:[#allocation16 + $0x160] ss:$8 sps:$4 sm:$0xff]   ;;  %v3141_v63 = vld [vmem:[#allocation16 + $0x54] ss:$8 sps:$4 sm:$0xff]  }
 0x30f   :  { %v1320_v2 = vpack.c.bf16 %v1319_v0, %v1319_v0  ;;  %v3144_v0 = vld [vmem:[#allocation16 + $0x154] ss:$8 sps:$4 sm:$0xff]  }
 0x311   :  { %1462 = vmatmul.mubr.bf16.vlgmr.msra.gmra.mxu1 %v1320_v2  ;;  %v3142_v2 = vld [vmem:[#allocation16 + $0x150] ss:$8 sps:$4 sm:$0xff]  }
 0x312   :  { %1922 = vmatpush1.bf16.msra.mxu1 %v3034_v1  ;;  %v3139_v1 = vld [vmem:[#allocation16 + $0x50] ss:$8 sps:$4 sm:$0xff]  }
 0x313   :  { %1923 = vmatprep.subr.bf16.mxu1 %v3042_v3  ;;  %v3147_v3 = vld [vmem:[#allocation16 + $0x44] ss:$8 sps:$4 sm:$0xff]  }
 0x316   :  { %1924 = vmatpush1.bf16.msra.mxu1 %v3040_v4  ;;  %v3150_v4 = vld [vmem:[#allocation16 + $0x144] ss:$8 sps:$4 sm:$0xff]  }
 0x317   :  { %1925 = vmatprep.subr.bf16.mxu1 %v3048_v5  ;;  %v3145_v5 = vld [vmem:[#allocation16 + $0x40] ss:$8 sps:$4 sm:$0xff]  }
 0x31a   :  { %1926 = vmatpush1.bf16.msra.mxu1 %v3046_v9  ;;  %v3148_v9 = vld [vmem:[#allocation16 + $0x140] ss:$8 sps:$4 sm:$0xff]  }
 0x31b   :  { %1927 = vmatprep.subr.bf16.mxu1 %v3054_v12  ;;  %v3153_v12 = vld [vmem:[#allocation16 + $0x34] ss:$8 sps:$4 sm:$0xff]  }
 0x31e   :  { %1928 = vmatpush1.bf16.msra.mxu1 %v3052_v13  ;;  %v3156_v13 = vld [vmem:[#allocation16 + $0x134] ss:$8 sps:$4 sm:$0xff]  }
 0x31f   :  { %1929 = vmatprep.subr.bf16.mxu1 %v3060_v14  ;;  %v3151_v14 = vld [vmem:[#allocation16 + $0x30] ss:$8 sps:$4 sm:$0xff]  }
 0x322   :  { %1930 = vmatpush1.bf16.msra.mxu1 %v3058_v15  ;;  %v3154_v15 = vld [vmem:[#allocation16 + $0x130] ss:$8 sps:$4 sm:$0xff]  }
 0x323   :  { %1931 = vmatprep.subr.bf16.mxu1 %v3066_v16  ;;  %v3159_v16 = vld [vmem:[#allocation16 + $0x24] ss:$8 sps:$4 sm:$0xff]  }
 0x326   :  { %1932 = vmatpush1.bf16.msra.mxu1 %v3064_v17  ;;  %v3162_v17 = vld [vmem:[#allocation16 + $0x124] ss:$8 sps:$4 sm:$0xff]  }
 0x327   :  { %1933 = vmatprep.subr.bf16.mxu1 %v3072_v18  ;;  %v3157_v18 = vld [vmem:[#allocation16 + $0x20] ss:$8 sps:$4 sm:$0xff]  }
 0x32a   :  { %1934 = vmatpush1.bf16.msra.mxu1 %v3070_v19  ;;  %v3160_v19 = vld [vmem:[#allocation16 + $0x120] ss:$8 sps:$4 sm:$0xff]  }
 0x32b   :  { %1935 = vmatprep.subr.bf16.mxu1 %v3078_v20  ;;  %v3165_v20 = vld [vmem:[#allocation16 + $0x14] ss:$8 sps:$4 sm:$0xff]  }
 0x32e   :  { %1936 = vmatpush1.bf16.msra.mxu1 %v3076_v21  ;;  %v3168_v21 = vld [vmem:[#allocation16 + $0x114] ss:$8 sps:$4 sm:$0xff]  }
 0x32f   :  { %1937 = vmatprep.subr.bf16.mxu1 %v3084_v22  ;;  %v3163_v22 = vld [vmem:[#allocation16 + $0x10] ss:$8 sps:$4 sm:$0xff]  }
 0x332   :  { %1938 = vmatpush2.bf16.msra.mxu1 %v3082_v23  ;;  %v3166_v23 = vld [vmem:[#allocation16 + $0x110] ss:$8 sps:$4 sm:$0xff]  }
 0x333   :  { %1939 = vmatprep.subr.bf16.mxu1 %v3090_v24  ;;  %v3171_v24 = vld [vmem:[#allocation16 + $0x4] ss:$8 sps:$4 sm:$0xff]  }
 0x336   :  { %1940 = vmatpush2.bf16.msra.mxu1 %v3088_v25  ;;  %v3174_v25 = vld [vmem:[#allocation16 + $0x104] ss:$8 sps:$4 sm:$0xff]  }
 0x337   :  { %1941 = vmatprep.subr.bf16.mxu1 %v3096_v26  ;;  %v3169_v26 = vld [vmem:[#allocation16] ss:$8 sps:$4 sm:$0xff]  }
 0x33a   :  { %1942 = vmatpush2.bf16.msra.mxu1 %v3094_v27  ;;  %v3172_v27 = vld [vmem:[#allocation16 + $0x100] ss:$8 sps:$4 sm:$0xff]  }
 0x33b   :  { %1943 = vmatprep.subr.bf16.mxu1 %v3102_v28  ;;  %v3177_v28 = vld [vmem:[#allocation16 + $0xf4] ss:$8 sps:$4 sm:$0xff]  }
 0x33e   :  { %1944 = vmatpush2.bf16.msra.mxu1 %v3100_v29  ;;  %v3180_v29 = vld [vmem:[#allocation16 + $0x1f4] ss:$8 sps:$4 sm:$0xff]  }
 0x33f   :  { %1945 = vmatprep.subr.bf16.mxu1 %v3108_v30  ;;  %v3175_v30 = vld [vmem:[#allocation16 + $0xf0] ss:$8 sps:$4 sm:$0xff]  }
 0x342   :  { %1946 = vmatpush2.bf16.msra.mxu1 %v3106_v31  ;;  %v3178_v31 = vld [vmem:[#allocation16 + $0x1f0] ss:$8 sps:$4 sm:$0xff]  }
 0x343   :  { %1947 = vmatprep.subr.bf16.mxu1 %v3114_v32  ;;  %v3183_v32 = vld [vmem:[#allocation16 + $0xe4] ss:$8 sps:$4 sm:$0xff]  }
 0x346   :  { %1948 = vmatpush2.bf16.msra.mxu1 %v3112_v33  ;;  %v3186_v33 = vld [vmem:[#allocation16 + $0x1e4] ss:$8 sps:$4 sm:$0xff]  }
 0x347   :  { %1949 = vmatprep.subr.bf16.mxu1 %v3120_v35  ;;  %v3184_v35 = vld [vmem:[#allocation16 + $0x1e0] ss:$8 sps:$4 sm:$0xff]  }
 0x34a   :  { %1950 = vmatpush2.bf16.msra.mxu1 %v3118_v37  ;;  %v3192_v37 = vld [vmem:[#allocation16 + $0x1d4] ss:$8 sps:$4 sm:$0xff]  }
 0x34b   :  { %1951 = vmatprep.subr.bf16.mxu1 %v3126_v39  ;;  %v3190_v39 = vld [vmem:[#allocation16 + $0x1d0] ss:$8 sps:$4 sm:$0xff]  }
 0x34e   :  { %1952 = vmatpush2.bf16.msra.mxu1 %v3124_v41  ;;  %v3198_v41 = vld [vmem:[#allocation16 + $0x1c4] ss:$8 sps:$4 sm:$0xff]  }
 0x34f   :  { %2407 = vmatprep.subr.bf16.mxu1 %v3132_v43  ;;  %v3196_v43 = vld [vmem:[#allocation16 + $0x1c0] ss:$8 sps:$4 sm:$0xff]  }
 0x3d1   :  { %v1463_v47 = vpop.f32.mrf.mxu1 }
 0x3d2   :  { %v1464_v48 = vadd.f32 %v1463_v47, %v1342_v45  ;;  %v3204_v45 = vld [vmem:[#allocation16 + $0x1b4] ss:$8 sps:$4 sm:$0xff]   ;;  %v3202_v47 = vld [vmem:[#allocation16 + $0x1b0] ss:$8 sps:$4 sm:$0xff]  }
 0x3d3   :  { %v1465_v49 = vpop.f32.mrf.mxu1 }
 0x3d4   :  { %v1466_v50 = vadd.f32 %v1465_v49, %v1346_v46  ;;  %v1470_v51 = vmax.f32 %v1464_v48, 0.0  ;;  %v3199_v46 = vld [vmem:[#allocation16 + $0xb0] ss:$8 sps:$4 sm:$0xff]   ;;  %v3207_v48 = vld [vmem:[#allocation16 + $0xa4] ss:$8 sps:$4 sm:$0xff]  }
 0x3d5   :  { %v1467_v52 = vpop.f32.mrf.mxu1  ;;  %v3210_v49 = vld [vmem:[#allocation16 + $0x1a4] ss:$8 sps:$4 sm:$0xff]  }
 0x3d6   :  { %v1471_v53 = vmax.f32 %v1466_v50, 0.0  ;;  %v1472_v58 = vpack.c.bf16 %v1470_v51, %v1470_v51  ;;  %v3205_v50 = vld [vmem:[#allocation16 + $0xa0] ss:$8 sps:$4 sm:$0xff]   ;;  %v3213_v52 = vld [vmem:[#allocation16 + $0x94] ss:$8 sps:$4 sm:$0xff]  }
 0x3d7   :  { %v1468_v54 = vpop.f32.mrf.mxu1  ;;  %v3208_v51 = vld [vmem:[#allocation16 + $0x1a0] ss:$8 sps:$4 sm:$0xff]  }
 0x3d8   :  { %v1473_v55 = vpack.c.bf16 %v1471_v53, %v1471_v53  ;;  %v3216_v53 = vld [vmem:[#allocation16 + $0x194] ss:$8 sps:$4 sm:$0xff]   ;;  %v3211_v54 = vld [vmem:[#allocation16 + $0x90] ss:$8 sps:$4 sm:$0xff]  }
 0x3da   :  { %1912 = vmatprep.mubr.bf16.mxu0 %v1473_v55  ;;  %1953 = vmatprep.mubr.bf16.mxu1 %v1473_v55  ;;  %v3214_v55 = vld [vmem:[#allocation16 + $0x190] ss:$8 sps:$4 sm:$0xff]  }
 0x3db   :  { %1913 = vmatmul.mubr.bf16.vlgmr.msra.gmra.mxu0 %v1472_v58  ;;  %1954 = vmatmul.mubr.bf16.vlgmr.msra.gmra.mxu1 %v1472_v58  ;;  %v3217_v58 = vld [vmem:[#allocation16 + $0x80] ss:$8 sps:$4 sm:$0xff]  }
 0x3dc   :  { %2367 = vmatpush1.bf16.msra.mxu0 %v3127_v56  ;;  %2408 = vmatpush1.bf16.msra.mxu1 %v3130_v57  ;;  %v3219_v56 = vld [vmem:[#allocation16 + $0x84] ss:$8 sps:$4 sm:$0xff]  }
 0x3dd   :  { %2368 = vmatprep.subr.bf16.mxu0 %v3135_v59  ;;  %2409 = vmatprep.subr.bf16.mxu1 %v3138_v60  ;;  %v3222_v57 = vld [vmem:[#allocation16 + $0x184] ss:$8 sps:$4 sm:$0xff]   ;;  %v3220_v59 = vld [vmem:[#allocation16 + $0x180] ss:$8 sps:$4 sm:$0xff]  }
 0x3de   :  { %v1538_v60 = vld [vmem:[%s3621_s10] sm:$0xf] }
 0x3e0   :  { %2369 = vmatpush1.bf16.msra.mxu0 %v3133_v61  ;;  %2410 = vmatpush1.bf16.msra.mxu1 %v3136_v62  ;;  %v1543_v61 = vrot.slane %v1538_v60, %v3571_v7  ;;  %v1551_v62 = vrot.slane %v1538_v60, %v242_v8 }
 0x3e1   :  { %2370 = vmatprep.subr.bf16.mxu0 %v3141_v63  ;;  %2411 = vmatprep.subr.bf16.mxu1 %v3144_v0  ;;  %v1547_v63 = vrot.slane %v1538_v60, %v3575_v10  ;;  %v1555_v0 = vrot.slane %v1538_v60, %v246_v11 }
 0x3e4   :  { %2371 = vmatpush1.bf16.msra.mxu0 %v3139_v1  ;;  %2412 = vmatpush1.bf16.msra.mxu1 %v3142_v2 }
 0x3e5   :  { %2372 = vmatprep.subr.bf16.mxu0 %v3147_v3  ;;  %2413 = vmatprep.subr.bf16.mxu1 %v3150_v4 }
 0x3e8   :  { %2373 = vmatpush1.bf16.msra.mxu0 %v3145_v5  ;;  %2414 = vmatpush1.bf16.msra.mxu1 %v3148_v9 }
 0x3e9   :  { %2374 = vmatprep.subr.bf16.mxu0 %v3153_v12  ;;  %2415 = vmatprep.subr.bf16.mxu1 %v3156_v13 }
 0x3ec   :  { %2375 = vmatpush1.bf16.msra.mxu0 %v3151_v14  ;;  %2416 = vmatpush1.bf16.msra.mxu1 %v3154_v15 }
 0x3ed   :  { %2376 = vmatprep.subr.bf16.mxu0 %v3159_v16  ;;  %2417 = vmatprep.subr.bf16.mxu1 %v3162_v17 }
 0x3f0   :  { %2377 = vmatpush1.bf16.msra.mxu0 %v3157_v18  ;;  %2418 = vmatpush1.bf16.msra.mxu1 %v3160_v19 }
 0x3f1   :  { %2378 = vmatprep.subr.bf16.mxu0 %v3165_v20  ;;  %2419 = vmatprep.subr.bf16.mxu1 %v3168_v21 }
 0x3f4   :  { %2379 = vmatpush1.bf16.msra.mxu0 %v3163_v22  ;;  %2420 = vmatpush1.bf16.msra.mxu1 %v3166_v23  ;;  %v2034_v23 = vld [vmem:[%s3623_s12] sm:$0x3]  ;;  %s2458_s12 = sshll.u32 %s3455_s22, 4  ;;  %s2459_s12 = int_to_ptr.vmem [resolvable:$true] %s2458_s12 }
 0x3f5   :  { %2380 = vmatprep.subr.bf16.mxu0 %v3171_v24  ;;  %2421 = vmatprep.subr.bf16.mxu1 %v3174_v25  ;;  %v2039_v24 = vrot.slane %v2034_v23, %v3571_v7  ;;  %v2043_v25 = vrot.slane %v2034_v23, %v3575_v10  ;;  %s3407_s23 = scalar_lea.vmem %s2459_s12, 256  ;;  %p3412_p4 = scmp.lt.s32.totalorder %s2459_s12, %s2459_s12 }
 0x3f6   :  { %p3408_p3 = scmp.ne.s32.totalorder %s2459_s12, %s3407_s23  ;;  %p3413_p5 = scmp.lt.s32.totalorder %s3407_s23, %s3407_s23 }
 0x3f8   :  { %2381 = vmatpush1.bf16.msra.mxu0 %v3169_v26  ;;  %2422 = vmatpush1.bf16.msra.mxu1 %v3172_v27  ;;  %p3414_p6 = por %p3413_p5, %p3412_p4 }
 0x3f9   :  { %2382 = vmatprep.subr.bf16.mxu0 %v3177_v28  ;;  %2423 = vmatprep.subr.bf16.mxu1 %v3180_v29 }
 0x3fa   :  { %p3415_p7 = pnand %p3414_p6, %p3408_p3 }
 0x3fc   :  { %2383 = vmatpush2.bf16.msra.mxu0 %v3175_v30  ;;  %2424 = vmatpush2.bf16.msra.mxu1 %v3178_v31 }
 0x3fd   :  { %2384 = vmatprep.subr.bf16.mxu0 %v3183_v32  ;;  %2425 = vmatprep.subr.bf16.mxu1 %v3186_v33 }
 0x400   :  { %2385 = vmatpush2.bf16.msra.mxu0 %v3181_v34  ;;  %2426 = vmatpush2.bf16.msra.mxu1 %v3184_v35 }
 0x401   :  { %2386 = vmatprep.subr.bf16.mxu0 %v3189_v36  ;;  %2427 = vmatprep.subr.bf16.mxu1 %v3192_v37 }
 0x404   :  { %2387 = vmatpush2.bf16.msra.mxu0 %v3187_v38  ;;  %2428 = vmatpush2.bf16.msra.mxu1 %v3190_v39 }
 0x405   :  { %2388 = vmatprep.subr.bf16.mxu0 %v3195_v40  ;;  %2429 = vmatprep.subr.bf16.mxu1 %v3198_v41 }
 0x408   :  { %2389 = vmatpush2.bf16.msra.mxu0 %v3193_v42  ;;  %2430 = vmatpush2.bf16.msra.mxu1 %v3196_v43 }
 0x409   :  { %2390 = vmatprep.subr.bf16.mxu0 %v3201_v44  ;;  %2431 = vmatprep.subr.bf16.mxu1 %v3204_v45 }
 0x40c   :  { %2391 = vmatpush2.bf16.msra.mxu0 %v3199_v46  ;;  %2432 = vmatpush2.bf16.msra.mxu1 %v3202_v47 }
 0x40d   :  { %2392 = vmatprep.subr.bf16.mxu0 %v3207_v48  ;;  %2433 = vmatprep.subr.bf16.mxu1 %v3210_v49 }
 0x410   :  { %2393 = vmatpush2.bf16.msra.mxu0 %v3205_v50  ;;  %2434 = vmatpush2.bf16.msra.mxu1 %v3208_v51 }
 0x411   :  { %2394 = vmatprep.subr.bf16.mxu0 %v3213_v52  ;;  %2435 = vmatprep.subr.bf16.mxu1 %v3216_v53 }
 0x414   :  { %2395 = vmatpush2.bf16.msra.mxu0 %v3211_v54  ;;  %2436 = vmatpush2.bf16.msra.mxu1 %v3214_v55 }
 0x415   :  { %2396 = vmatprep.subr.bf16.mxu0 %v3219_v56  ;;  %2437 = vmatprep.subr.bf16.mxu1 %v3222_v57 }
 0x418   :  { %2397 = vmatpush2.bf16.msra.mxu0 %v3217_v58  ;;  %2438 = vmatpush2.bf16.msra.mxu1 %v3220_v59 }
 0x49b   :  { %v1914_v1 = vpop.f32.mrf.mxu0  ;;  %v1955_v2 = vpop.f32.mrf.mxu1 }
 0x49c   :  { %v1915_v3 = vadd.f32 %v1914_v1, %v1543_v61  ;;  %v1956_v4 = vadd.f32 %v1955_v2, %v1551_v62 }
 0x49d   :  { %v1916_v5 = vpop.f32.mrf.mxu0  ;;  %v1957_v9 = vpop.f32.mrf.mxu1 }
 0x49e   :  { %v1917_v12 = vadd.f32 %v1916_v5, %v1547_v63  ;;  %v1958_v13 = vadd.f32 %v1957_v9, %v1555_v0  ;;  %v1962_v14 = vmax.f32 %v1915_v3, 0.0  ;;  %v1964_v15 = vmax.f32 %v1956_v4, 0.0 }
 0x49f   :  { %v1918_v16 = vpop.f32.mrf.mxu0  ;;  %v1959_v17 = vpop.f32.mrf.mxu1 }
 0x4a0   :  { %v1963_v18 = vmax.f32 %v1917_v12, 0.0  ;;  %v1965_v19 = vmax.f32 %v1958_v13, 0.0  ;;  %v1966_v6 = vpack.c.bf16 %v1962_v14, %v1962_v14  ;;  %v1968_v11 = vpack.c.bf16 %v1964_v15, %v1964_v15 }
 0x4a1   :  { %v1919_v8 = vpop.f32.mrf.mxu0  ;;  %v1960_v20 = vpop.f32.mrf.mxu1 }
 0x4a2   :  { %v1967_v21 = vpack.c.bf16 %v1963_v18, %v1963_v18  ;;  %v1969_v22 = vpack.c.bf16 %v1965_v19, %v1965_v19 }
 0x4a4   :  { %2398 = vmatprep.mubr.bf16.mxu0 %v1967_v21  ;;  %2439 = vmatprep.mubr.bf16.mxu1 %v1969_v22 }
 0x4a5   :  { %2399 = vmatmul.mubr.bf16.vlgmr.msra.gmra.mxu0 %v1966_v6  ;;  %2440 = vmatmul.mubr.bf16.vlgmr.msra.gmra.mxu1 %v1968_v11 }
 0x565   :  { %v2400_v26 = vpop.f32.mrf.mxu0  ;;  %v2441_v27 = vpop.f32.mrf.mxu1 }
 0x566   :  { %v2401_v28 = vadd.f32 %v2400_v26, %v2039_v24 }
 0x567   :  { %v2402_v29 = vpop.f32.mrf.mxu0  ;;  %v2443_v30 = vpop.f32.mrf.mxu1 }
 0x568   :  { %v2442_v31 = vadd.f32 %v2441_v27, %v2401_v28  ;;  %v2403_v32 = vadd.f32 %v2402_v29, %v2043_v25 }
 0x569   :  { %v2404_v33 = vpop.f32.mrf.mxu0  ;;  %v2445_v34 = vpop.f32.mrf.mxu1 }
 0x56a   :  { %3223 = vtanh.f32 %v2442_v31  ;;  %v2444_v35 = vadd.f32 %v2443_v30, %v2403_v32 }
 0x56b   :  { %v2405_v36 = vpop.f32.mrf.mxu0  ;;  %v2446_v37 = vpop.f32.mrf.mxu1 }
 0x56c   :  { %3225 = vtanh.f32 %v2444_v35 }
 0x577   :  { %v3224_v38 = vpop.eup %3223 }
 0x578   :  { %2450 = vst [vmem:[#allocation17] sm:$0xff] %v3224_v38 }
 0x579   :  { %v3226_v7 = vpop.eup %3225 }
 0x57a   :  { %2451 = vst [vmem:[#allocation17 + $0x8] sm:$0xff] %v3226_v7 }
 0x57b   :  { %3418 = shalt.err (!%p3415_p7)
}
 0x57c   :  { %2461 = dma.vmem_to_hbm [thread:$0]  %s2459_s12, 256, %s3624_s13, [#allocation4]  }
 0x57d   :  { %3437 = dma.done.wait [#allocation4], 256  }
 0x57e   :  { %3438 = vsyncadd [#allocation4], 4294967040 }
 0x57f   :  { %2465 = vsyncpa [#allocation3], 1 }
 0x580   :  { %2466 = vsyncpa [#allocation6], 1 }
 0x581   :  { %2467 = vsyncpa [#allocation9], 1 }
 0x582   :  { %2468 = vsyncpa [#allocation12], 1 }
 0x583   :  { %2469 = vsyncpa [#allocation15], 1 }
 0x584   :  { %2470 = vsyncpa [#allocation4], 1 }

</bundles_post_ra>
